<compile_context>
chip_gen: v7x
topology: tpu7x:2x2x1
jax: 0.10.0
libtpu: 0.0.40
codegen_flags: <defaults>
</compile_context>

<pallas_src>
import functools

import jax
import jax.numpy as jnp
from jax import lax
from jax.experimental import pallas as pl
from jax.experimental.pallas import tpu as pltpu

N_IN = 2
N_HIDDEN = 256
N_OUT = 3
PAD_OUT = 128      # lane padding for the tiny output dim (lane-dense stores)
TB = 256           # batch tile per grid step
SUB = 128          # inner sub-block (MXU-row sized, bounds vreg pressure)


def _act(h, act, a):
    """Hidden-layer activation (static choice, f32 math)."""
    if act == "relu":
        return jnp.maximum(h, 0.0)
    if act == "gaussian":
        return jnp.exp(-0.5 * h * h / (a * a))
    if act == "laplacian":
        return jnp.exp(-jnp.abs(h) / a)
    if act == "quad":
        return 1.0 / (1.0 + (a * h) ** 2)
    if act == "multi_quad":
        return lax.rsqrt(1.0 + (a * h) ** 2)
    raise ValueError(f"unknown act: {act}")


def _mlp_kernel(x_ref, w1_ref, b1_ref, w2_ref, b2_ref, w3_ref, b3_ref,
                w4_ref, b4_ref, o_ref, *, act, a):
    w_dtype = w2_ref.dtype  # f32 or bf16 dot inputs; accumulation is f32

    # Bias loads hoisted out of the static sub-block loop.
    b1 = b1_ref[...]
    b2 = b2_ref[...]
    b3 = b3_ref[...]
    b4 = b4_ref[...]
    w1_r0 = w1_ref[0:1, :]
    w1_r1 = w1_ref[1:2, :]

    # Static inner loop over 128-row sub-blocks of the batch tile.
    for s in range(TB // SUB):
        x = x_ref[s * SUB:(s + 1) * SUB, :]                  # (SUB, 2) f32

        # Layer 1 (K=2): two rank-1 broadcast FMAs on the VPU, skip the MXU.
        h = x[:, 0:1] * w1_r0 + x[:, 1:2] * w1_r1 + b1
        h = _act(h, act, a)

        # Layer 2: (SUB, 256) @ (256, 256), f32 accumulate on the MXU.
        h = jnp.dot(h.astype(w_dtype), w2_ref[...],
                    preferred_element_type=jnp.float32)
        h = _act(h + b2, act, a)

        # Layer 3: (SUB, 256) @ (256, 256).
        h = jnp.dot(h.astype(w_dtype), w3_ref[...],
                    preferred_element_type=jnp.float32)
        h = _act(h + b3, act, a)

        # Output layer: (SUB, 256) @ (256, 128-padded), Sigmoid.
        y = jnp.dot(h.astype(w_dtype), w4_ref[...],
                    preferred_element_type=jnp.float32)
        y = y + b4
        # sigmoid = 1 / (1 + exp(-y)); exp and approx-reciprocal both on EUP.
        o_ref[s * SUB:(s + 1) * SUB, :] = pl.reciprocal(
            1.0 + jnp.exp(-y), approx=True)


def pack_params(params, use_bf16=False):
    """One-time packing: pad tiny output dim, optionally cast weights to bf16.

    Weights are stored (in, out), i.e. transposed w.r.t. nn.Linear's (out, in).
    Biases stay f32 (elementwise math runs in f32 on every chip generation).
    """
    w1, b1, w2, b2, w3, b3, w4, b4 = params
    wdt = jnp.bfloat16 if use_bf16 else jnp.float32
    w4_p = (jnp.zeros((N_HIDDEN, PAD_OUT), jnp.float32)
            .at[:, :N_OUT].set(w4)).astype(wdt)
    b4_p = jnp.zeros((1, PAD_OUT), jnp.float32).at[:, :N_OUT].set(b4[None, :])
    return (w1.astype(wdt), b1[None, :].astype(jnp.float32),
            w2.astype(wdt), b2[None, :].astype(jnp.float32),
            w3.astype(wdt), b3[None, :].astype(jnp.float32),
            w4_p, b4_p)


def mlp_pallas(x, packed, act="relu", a=1.0):
    """x: (B, N_IN) float32 -> (B, N_OUT) float32."""
    w1, b1, w2, b2, w3, b3, w4, b4 = packed
    B = x.shape[0]

    # Pad batch up to a multiple of TB; input keeps its tiny 2-wide lane dim.
    B_pad = pl.cdiv(B, TB) * TB
    x_p = jnp.zeros((B_pad, N_IN), jnp.float32).at[:B, :].set(x)

    full = lambda shape: pl.BlockSpec(shape, lambda i: (0, 0))

    w_bytes = sum(int(arr.size) * arr.dtype.itemsize
                  for arr in (w1, b1, w2, b2, w3, b3, w4, b4))
    cost = pl.CostEstimate(
        flops=2 * B_pad * (N_IN * N_HIDDEN
                           + 2 * N_HIDDEN * N_HIDDEN
                           + N_HIDDEN * PAD_OUT),
        transcendentals=B_pad * PAD_OUT,
        bytes_accessed=B_pad * N_IN * 4 + B_pad * PAD_OUT * 4 + w_bytes,
    )

    kernel = functools.partial(_mlp_kernel, act=act, a=float(a))

    out = pl.pallas_call(
        kernel,
        out_shape=jax.ShapeDtypeStruct((B_pad, PAD_OUT), jnp.float32),
        grid_spec=pltpu.PrefetchScalarGridSpec(
            num_scalar_prefetch=0,
            grid=(B_pad // TB,),
            in_specs=[
                pl.BlockSpec((TB, N_IN), lambda i: (i, 0)),        # x tile
                full((N_IN, N_HIDDEN)), full((1, N_HIDDEN)),       # w1, b1
                full((N_HIDDEN, N_HIDDEN)), full((1, N_HIDDEN)),   # w2, b2
                full((N_HIDDEN, N_HIDDEN)), full((1, N_HIDDEN)),   # w3, b3
                full((N_HIDDEN, PAD_OUT)), full((1, PAD_OUT)),     # w4, b4
            ],
            out_specs=pl.BlockSpec((TB, PAD_OUT), lambda i: (i, 0)),
        ),
        compiler_params=pltpu.CompilerParams(
            dimension_semantics=("parallel",)),
        cost_estimate=cost,
    )(x_p, w1, b1, w2, b2, w3, b3, w4, b4)

    return out[:B, :N_OUT]


def init_params(key):
    """Deterministic init mimicking nn.Linear U(-1/sqrt(fan_in), +1/sqrt(fan_in)).

    Weights are stored as (in, out) — transposed w.r.t. PyTorch's (out, in).
    """
    dims = [(N_IN, N_HIDDEN), (N_HIDDEN, N_HIDDEN),
            (N_HIDDEN, N_HIDDEN), (N_HIDDEN, N_OUT)]
    params = []
    for fan_in, fan_out in dims:
        key, kw, kb = jax.random.split(key, 3)
        bound = 1.0 / jnp.sqrt(fan_in)
        w = jax.random.uniform(kw, (fan_in, fan_out), jnp.float32, -bound, bound)
        b = jax.random.uniform(kb, (fan_out,), jnp.float32, -bound, bound)
        params += [w, b]
    return tuple(params)


def mlp_ref(x, params):
    w1, b1, w2, b2, w3, b3, w4, b4 = params
    h = jnp.maximum(x @ w1 + b1, 0.0)
    h = jnp.maximum(h @ w2 + b2, 0.0)
    h = jnp.maximum(h @ w3 + b3, 0.0)
    return jax.nn.sigmoid(h @ w4 + b4)


if __name__ == "__main__":
    key = jax.random.PRNGKey(0)
    kx, kp = jax.random.split(key)
    B = 64
    x = jax.random.uniform(kx, (B, N_IN), jnp.float32)  # normalized pixel uv
    params = init_params(kp)
    y_ref = mlp_ref(x, params)

    # f32 weight path (v5e default / strict numerics).
    y32 = mlp_pallas(x, pack_params(params, use_bf16=False))
    jax.block_until_ready(y32)
    assert y32.shape == (B, N_OUT)
    assert jnp.allclose(y32, y_ref, atol=5e-3, rtol=0), "f32 path mismatch"

    # bf16 dot-input path (v6e / v7x MXU fast path), f32 accumulation.
    y16 = mlp_pallas(x, pack_params(params, use_bf16=True))
    jax.block_until_ready(y16)
    assert y16.shape == (B, N_OUT)
    assert jnp.allclose(y16, y_ref, atol=5e-2, rtol=0), "bf16 path mismatch"

    print("KERNEL_OK")
</pallas_src>

<mosaic_0001>
module attributes {stable_mosaic.version = 11 : i64} {
  func.func @_mlp_kernel(%arg0: i32, %arg1: memref<256x2xf32, #tpu.memory_space<vmem>>, %arg2: memref<2x256xf32, #tpu.memory_space<vmem>>, %arg3: memref<1x256xf32, #tpu.memory_space<vmem>>, %arg4: memref<256x256xf32, #tpu.memory_space<vmem>>, %arg5: memref<1x256xf32, #tpu.memory_space<vmem>>, %arg6: memref<256x256xf32, #tpu.memory_space<vmem>>, %arg7: memref<1x256xf32, #tpu.memory_space<vmem>>, %arg8: memref<256x128xf32, #tpu.memory_space<vmem>>, %arg9: memref<1x128xf32, #tpu.memory_space<vmem>>, %arg10: memref<256x128xf32, #tpu.memory_space<vmem>>) attributes {dimension_semantics = [#tpu.dimension_semantics<parallel>], iteration_bounds = array<i64: 1>, scalar_prefetch = 0 : i64, scratch_operands = 0 : i64, tpu.core_type = #tpu.core_type<tc>, window_params = [{transform_indices = @transform_0, window_bounds = array<i64: 256, 2>}, {pipeline_mode = #tpu.pipeline_mode<synchronous>, transform_indices = @transform_1, window_bounds = array<i64: 2, 256>}, {pipeline_mode = #tpu.pipeline_mode<synchronous>, transform_indices = @transform_2, window_bounds = array<i64: 1, 256>}, {pipeline_mode = #tpu.pipeline_mode<synchronous>, transform_indices = @transform_3, window_bounds = array<i64: 256, 256>}, {pipeline_mode = #tpu.pipeline_mode<synchronous>, transform_indices = @transform_4, window_bounds = array<i64: 1, 256>}, {pipeline_mode = #tpu.pipeline_mode<synchronous>, transform_indices = @transform_5, window_bounds = array<i64: 256, 256>}, {pipeline_mode = #tpu.pipeline_mode<synchronous>, transform_indices = @transform_6, window_bounds = array<i64: 1, 256>}, {pipeline_mode = #tpu.pipeline_mode<synchronous>, transform_indices = @transform_7, window_bounds = array<i64: 256, 128>}, {pipeline_mode = #tpu.pipeline_mode<synchronous>, transform_indices = @transform_8, window_bounds = array<i64: 1, 128>}, {transform_indices = @transform_9, window_bounds = array<i64: 256, 128>}]} {
    %c0 = arith.constant 0 : index
    %c0_0 = arith.constant 0 : index
    %0 = vector.load %arg3[%c0, %c0_0] : memref<1x256xf32, #tpu.memory_space<vmem>>, vector<1x256xf32>
    %c0_1 = arith.constant 0 : index
    %c0_2 = arith.constant 0 : index
    %1 = vector.load %arg5[%c0_1, %c0_2] : memref<1x256xf32, #tpu.memory_space<vmem>>, vector<1x256xf32>
    %c0_3 = arith.constant 0 : index
    %c0_4 = arith.constant 0 : index
    %2 = vector.load %arg7[%c0_3, %c0_4] : memref<1x256xf32, #tpu.memory_space<vmem>>, vector<1x256xf32>
    %c0_5 = arith.constant 0 : index
    %c0_6 = arith.constant 0 : index
    %3 = vector.load %arg9[%c0_5, %c0_6] : memref<1x128xf32, #tpu.memory_space<vmem>>, vector<1x128xf32>
    %c0_7 = arith.constant 0 : index
    %c0_8 = arith.constant 0 : index
    %4 = vector.load %arg2[%c0_7, %c0_8] : memref<2x256xf32, #tpu.memory_space<vmem>>, vector<1x256xf32>
    %c1 = arith.constant 1 : index
    %c0_9 = arith.constant 0 : index
    %5 = vector.load %arg2[%c1, %c0_9] : memref<2x256xf32, #tpu.memory_space<vmem>>, vector<1x256xf32>
    %c0_10 = arith.constant 0 : index
    %c0_11 = arith.constant 0 : index
    %6 = vector.load %arg1[%c0_10, %c0_11] : memref<256x2xf32, #tpu.memory_space<vmem>>, vector<128x2xf32>
    %7 = vector.extract_strided_slice %6 {offsets = [0, 0], sizes = [128, 1], strides = [1, 1]} : vector<128x2xf32> to vector<128x1xf32>
    %8 = vector.broadcast %7 : vector<128x1xf32> to vector<128x256xf32>
    %9 = vector.broadcast %4 : vector<1x256xf32> to vector<128x256xf32>
    %10 = arith.mulf %8, %9 : vector<128x256xf32>
    %11 = vector.extract_strided_slice %6 {offsets = [0, 1], sizes = [128, 1], strides = [1, 1]} : vector<128x2xf32> to vector<128x1xf32>
    %12 = vector.broadcast %11 : vector<128x1xf32> to vector<128x256xf32>
    %13 = vector.broadcast %5 : vector<1x256xf32> to vector<128x256xf32>
    %14 = arith.mulf %12, %13 : vector<128x256xf32>
    %15 = arith.addf %10, %14 : vector<128x256xf32>
    %16 = vector.broadcast %0 : vector<1x256xf32> to vector<128x256xf32>
    %17 = arith.addf %15, %16 : vector<128x256xf32>
    %cst = arith.constant 0.000000e+00 : f32
    %18 = vector.broadcast %cst : f32 to vector<128x256xf32>
    %19 = arith.maximumf %17, %18 : vector<128x256xf32>
    %c0_12 = arith.constant 0 : index
    %c0_13 = arith.constant 0 : index
    %20 = vector.load %arg4[%c0_12, %c0_13] : memref<256x256xf32, #tpu.memory_space<vmem>>, vector<256x256xf32>
    %cst_14 = arith.constant dense<0.000000e+00> : vector<128x256xf32>
    %21 = tpu.matmul %19, %20, %cst_14 {dimension_numbers = #tpu.dot_dimension_numbers<[1], [0], [0], [1], [0, 0, 1, 1], [], []>} : vector<128x256xf32>, vector<256x256xf32>, vector<128x256xf32> -> vector<128x256xf32>
    %22 = vector.broadcast %1 : vector<1x256xf32> to vector<128x256xf32>
    %23 = arith.addf %21, %22 : vector<128x256xf32>
    %cst_15 = arith.constant 0.000000e+00 : f32
    %24 = vector.broadcast %cst_15 : f32 to vector<128x256xf32>
    %25 = arith.maximumf %23, %24 : vector<128x256xf32>
    %c0_16 = arith.constant 0 : index
    %c0_17 = arith.constant 0 : index
    %26 = vector.load %arg6[%c0_16, %c0_17] : memref<256x256xf32, #tpu.memory_space<vmem>>, vector<256x256xf32>
    %cst_18 = arith.constant dense<0.000000e+00> : vector<128x256xf32>
    %27 = tpu.matmul %25, %26, %cst_18 {dimension_numbers = #tpu.dot_dimension_numbers<[1], [0], [0], [1], [0, 0, 1, 1], [], []>} : vector<128x256xf32>, vector<256x256xf32>, vector<128x256xf32> -> vector<128x256xf32>
    %28 = vector.broadcast %2 : vector<1x256xf32> to vector<128x256xf32>
    %29 = arith.addf %27, %28 : vector<128x256xf32>
    %cst_19 = arith.constant 0.000000e+00 : f32
    %30 = vector.broadcast %cst_19 : f32 to vector<128x256xf32>
    %31 = arith.maximumf %29, %30 : vector<128x256xf32>
    %c0_20 = arith.constant 0 : index
    %c0_21 = arith.constant 0 : index
    %32 = vector.load %arg8[%c0_20, %c0_21] : memref<256x128xf32, #tpu.memory_space<vmem>>, vector<256x128xf32>
    %cst_22 = arith.constant dense<0.000000e+00> : vector<128x128xf32>
    %33 = tpu.matmul %31, %32, %cst_22 {dimension_numbers = #tpu.dot_dimension_numbers<[1], [0], [0], [1], [0, 0, 1, 1], [], []>} : vector<128x256xf32>, vector<256x128xf32>, vector<128x128xf32> -> vector<128x128xf32>
    %34 = vector.broadcast %3 : vector<1x128xf32> to vector<128x128xf32>
    %35 = arith.addf %33, %34 : vector<128x128xf32>
    %cst_23 = arith.constant 0.000000e+00 : f32
    %36 = vector.broadcast %cst_23 : f32 to vector<128x128xf32>
    %37 = arith.subf %36, %35 : vector<128x128xf32>
    %38 = math.exp %37 : vector<128x128xf32>
    %cst_24 = arith.constant 1.000000e+00 : f32
    %39 = vector.broadcast %cst_24 : f32 to vector<128x128xf32>
    %40 = arith.addf %39, %38 : vector<128x128xf32>
    %41 = tpu.reciprocal %40 {approx = true} : vector<128x128xf32> -> vector<128x128xf32>
    %c0_25 = arith.constant 0 : index
    %c0_26 = arith.constant 0 : index
    %42 = vector.load %arg10[%c0_25, %c0_26] : memref<256x128xf32, #tpu.memory_space<vmem>>, vector<128x128xf32>
    tpu.vector_store %arg10[%c0_25, %c0_26], %41 {strides = array<i32>} : memref<256x128xf32, #tpu.memory_space<vmem>>, vector<128x128xf32>,
    %c128 = arith.constant 128 : index
    %c0_27 = arith.constant 0 : index
    %43 = vector.load %arg1[%c128, %c0_27] : memref<256x2xf32, #tpu.memory_space<vmem>>, vector<128x2xf32>
    %44 = vector.extract_strided_slice %43 {offsets = [0, 0], sizes = [128, 1], strides = [1, 1]} : vector<128x2xf32> to vector<128x1xf32>
    %45 = vector.broadcast %44 : vector<128x1xf32> to vector<128x256xf32>
    %46 = vector.broadcast %4 : vector<1x256xf32> to vector<128x256xf32>
    %47 = arith.mulf %45, %46 : vector<128x256xf32>
    %48 = vector.extract_strided_slice %43 {offsets = [0, 1], sizes = [128, 1], strides = [1, 1]} : vector<128x2xf32> to vector<128x1xf32>
    %49 = vector.broadcast %48 : vector<128x1xf32> to vector<128x256xf32>
    %50 = vector.broadcast %5 : vector<1x256xf32> to vector<128x256xf32>
    %51 = arith.mulf %49, %50 : vector<128x256xf32>
    %52 = arith.addf %47, %51 : vector<128x256xf32>
    %53 = vector.broadcast %0 : vector<1x256xf32> to vector<128x256xf32>
    %54 = arith.addf %52, %53 : vector<128x256xf32>
    %cst_28 = arith.constant 0.000000e+00 : f32
    %55 = vector.broadcast %cst_28 : f32 to vector<128x256xf32>
    %56 = arith.maximumf %54, %55 : vector<128x256xf32>
    %c0_29 = arith.constant 0 : index
    %c0_30 = arith.constant 0 : index
    %57 = vector.load %arg4[%c0_29, %c0_30] : memref<256x256xf32, #tpu.memory_space<vmem>>, vector<256x256xf32>
    %cst_31 = arith.constant dense<0.000000e+00> : vector<128x256xf32>
    %58 = tpu.matmul %56, %57, %cst_31 {dimension_numbers = #tpu.dot_dimension_numbers<[1], [0], [0], [1], [0, 0, 1, 1], [], []>} : vector<128x256xf32>, vector<256x256xf32>, vector<128x256xf32> -> vector<128x256xf32>
    %59 = vector.broadcast %1 : vector<1x256xf32> to vector<128x256xf32>
    %60 = arith.addf %58, %59 : vector<128x256xf32>
    %cst_32 = arith.constant 0.000000e+00 : f32
    %61 = vector.broadcast %cst_32 : f32 to vector<128x256xf32>
    %62 = arith.maximumf %60, %61 : vector<128x256xf32>
    %c0_33 = arith.constant 0 : index
    %c0_34 = arith.constant 0 : index
    %63 = vector.load %arg6[%c0_33, %c0_34] : memref<256x256xf32, #tpu.memory_space<vmem>>, vector<256x256xf32>
    %cst_35 = arith.constant dense<0.000000e+00> : vector<128x256xf32>
    %64 = tpu.matmul %62, %63, %cst_35 {dimension_numbers = #tpu.dot_dimension_numbers<[1], [0], [0], [1], [0, 0, 1, 1], [], []>} : vector<128x256xf32>, vector<256x256xf32>, vector<128x256xf32> -> vector<128x256xf32>
    %65 = vector.broadcast %2 : vector<1x256xf32> to vector<128x256xf32>
    %66 = arith.addf %64, %65 : vector<128x256xf32>
    %cst_36 = arith.constant 0.000000e+00 : f32
    %67 = vector.broadcast %cst_36 : f32 to vector<128x256xf32>
    %68 = arith.maximumf %66, %67 : vector<128x256xf32>
    %c0_37 = arith.constant 0 : index
    %c0_38 = arith.constant 0 : index
    %69 = vector.load %arg8[%c0_37, %c0_38] : memref<256x128xf32, #tpu.memory_space<vmem>>, vector<256x128xf32>
    %cst_39 = arith.constant dense<0.000000e+00> : vector<128x128xf32>
    %70 = tpu.matmul %68, %69, %cst_39 {dimension_numbers = #tpu.dot_dimension_numbers<[1], [0], [0], [1], [0, 0, 1, 1], [], []>} : vector<128x256xf32>, vector<256x128xf32>, vector<128x128xf32> -> vector<128x128xf32>
    %71 = vector.broadcast %3 : vector<1x128xf32> to vector<128x128xf32>
    %72 = arith.addf %70, %71 : vector<128x128xf32>
    %cst_40 = arith.constant 0.000000e+00 : f32
    %73 = vector.broadcast %cst_40 : f32 to vector<128x128xf32>
    %74 = arith.subf %73, %72 : vector<128x128xf32>
    %75 = math.exp %74 : vector<128x128xf32>
    %cst_41 = arith.constant 1.000000e+00 : f32
    %76 = vector.broadcast %cst_41 : f32 to vector<128x128xf32>
    %77 = arith.addf %76, %75 : vector<128x128xf32>
    %78 = tpu.reciprocal %77 {approx = true} : vector<128x128xf32> -> vector<128x128xf32>
    %c128_42 = arith.constant 128 : index
    %c0_43 = arith.constant 0 : index
    %79 = vector.load %arg10[%c128_42, %c0_43] : memref<256x128xf32, #tpu.memory_space<vmem>>, vector<128x128xf32>
    tpu.vector_store %arg10[%c128_42, %c0_43], %78 {strides = array<i32>} : memref<256x128xf32, #tpu.memory_space<vmem>>, vector<128x128xf32>,
    return
  }
  func.func @transform_0(%arg0: i32) -> (i32, i32) {
    %c0_i32 = arith.constant 0 : i32
    %c0_i32_0 = arith.constant 0 : i32
    return %arg0, %c0_i32 : i32, i32
  }
  func.func @transform_1(%arg0: i32) -> (i32, i32) {
    %c0_i32 = arith.constant 0 : i32
    %c0_i32_0 = arith.constant 0 : i32
    %c0_i32_1 = arith.constant 0 : i32
    return %c0_i32, %c0_i32_0 : i32, i32
  }
  func.func @transform_2(%arg0: i32) -> (i32, i32) {
    %c0_i32 = arith.constant 0 : i32
    %c0_i32_0 = arith.constant 0 : i32
    %c0_i32_1 = arith.constant 0 : i32
    return %c0_i32, %c0_i32_0 : i32, i32
  }
  func.func @transform_3(%arg0: i32) -> (i32, i32) {
    %c0_i32 = arith.constant 0 : i32
    %c0_i32_0 = arith.constant 0 : i32
    %c0_i32_1 = arith.constant 0 : i32
    return %c0_i32, %c0_i32_0 : i32, i32
  }
  func.func @transform_4(%arg0: i32) -> (i32, i32) {
    %c0_i32 = arith.constant 0 : i32
    %c0_i32_0 = arith.constant 0 : i32
    %c0_i32_1 = arith.constant 0 : i32
    return %c0_i32, %c0_i32_0 : i32, i32
  }
  func.func @transform_5(%arg0: i32) -> (i32, i32) {
    %c0_i32 = arith.constant 0 : i32
    %c0_i32_0 = arith.constant 0 : i32
    %c0_i32_1 = arith.constant 0 : i32
    return %c0_i32, %c0_i32_0 : i32, i32
  }
  func.func @transform_6(%arg0: i32) -> (i32, i32) {
    %c0_i32 = arith.constant 0 : i32
    %c0_i32_0 = arith.constant 0 : i32
    %c0_i32_1 = arith.constant 0 : i32
    return %c0_i32, %c0_i32_0 : i32, i32
  }
  func.func @transform_7(%arg0: i32) -> (i32, i32) {
    %c0_i32 = arith.constant 0 : i32
    %c0_i32_0 = arith.constant 0 : i32
    %c0_i32_1 = arith.constant 0 : i32
    return %c0_i32, %c0_i32_0 : i32, i32
  }
  func.func @transform_8(%arg0: i32) -> (i32, i32) {
    %c0_i32 = arith.constant 0 : i32
    %c0_i32_0 = arith.constant 0 : i32
    %c0_i32_1 = arith.constant 0 : i32
    return %c0_i32, %c0_i32_0 : i32, i32
  }
  func.func @transform_9(%arg0: i32) -> (i32, i32) {
    %c0_i32 = arith.constant 0 : i32
    %c0_i32_0 = arith.constant 0 : i32
    return %arg0, %c0_i32 : i32, i32
  }
}

</mosaic_0001>

<bundles_post_ra>
// kernel: tpu_custom_call.1
= control target key start
LH: loop header
LB: loop body
LE: loop exit
PB: predicated region body
PF: predicated region fallthrough
CT: control target
= control target key end

     0   :  { %14 = vsyncpa [#allocation3], 0  ;;  %s3906_s0 = inlined_call_operand.vmem [shape: f32[256,2], index: 0, kind: input, shape index: {}]   ;;  %s3907_s1 = inlined_call_operand.vmem [shape: f32[2,256], index: 1, kind: input, shape index: {}]   ;;  %s3908_s2 = inlined_call_operand.vmem [shape: f32[1,256], index: 2, kind: input, shape index: {}]   ;;  %s3909_s3 = inlined_call_operand.hbm [shape: f32[256,256], index: 3, kind: input, shape index: {}]   ;;  %s3910_s4 = inlined_call_operand.vmem [shape: f32[1,256], index: 4, kind: input, shape index: {}]   ;;  %s3911_s5 = inlined_call_operand.hbm [shape: f32[256,256], index: 5, kind: input, shape index: {}]   ;;  %s3912_s6 = inlined_call_operand.vmem [shape: f32[1,256], index: 6, kind: input, shape index: {}]   ;;  %s3913_s7 = inlined_call_operand.vmem [shape: f32[256,128], index: 7, kind: input, shape index: {}]   ;;  %s3914_s8 = inlined_call_operand.vmem [shape: f32[1,128], index: 8, kind: input, shape index: {}]   ;;  %s3915_s9 = inlined_call_operand.hbm [shape: f32[256,128], index: 9, kind: output, shape index: {}]  }
   0x1   :  { %15 = vsyncpa [#allocation6], 0 }
   0x2   :  { %16 = vsyncpa [#allocation4], 0  ;;  %s3057_s30 = smov [#allocation2]   ;;  %s2985_s13 = scalar_lea.hbm %s3909_s3, 8192 }
   0x3   :  { %s28_s10 = sshll.u32 %s3057_s30, 4  ;;  %p2986_p0 = scmp.ne.s32.totalorder %s3909_s3, %s2985_s13  ;;  %s29_s10 = int_to_ptr.vmem [resolvable:$true] %s28_s10 }
   0x4   :  { %p2989_p1 = scmp.lt.u32.totalorder %s2985_s13, %s3909_s3 }
   0x6   :  { %p2991_p2 = pnand %p2989_p1, %p2986_p0 }
   0x8   :  { %2994 = shalt.err (!%p2991_p2)
}
   0x9   :  { %s2995_s18 = scalar_lea.vmem %s29_s10, 8192  ;;  %p3000_p4 = scmp.lt.s32.totalorder %s29_s10, %s29_s10 }
   0xa   :  { %p2996_p3 = scmp.ne.s32.totalorder %s29_s10, %s2995_s18  ;;  %p3001_p5 = scmp.lt.s32.totalorder %s2995_s18, %s2995_s18 }
   0xc   :  { %p3002_p6 = por %p3001_p5, %p3000_p4 }
   0xe   :  { %p3003_p7 = pnand %p3002_p6, %p2996_p3 }
  0x10   :  { %3006 = shalt.err (!%p3003_p7)
}
  0x11   :  { %s3058_s19 = smov 256   ;;  %s3059_s20 = smov 16  }
  0x12   :  { %34 = dma.hbm_to_vmem [thread:$0]  %s3909_s3, 8192, %s29_s10, [#allocation3], %s3058_s19, %s3058_s19, %s3059_s20  }
  0x13   :  { %s3060_s23 = smov [#allocation5]   ;;  %s3007_s27 = scalar_lea.hbm %s3911_s5, 8192 }
  0x14   :  { %s42_s24 = sshll.u32 %s3060_s23, 4  ;;  %p3008_p8 = scmp.ne.s32.totalorder %s3911_s5, %s3007_s27  ;;  %s43_s24 = int_to_ptr.vmem [resolvable:$true] %s42_s24 }
  0x15   :  { %p3011_p9 = scmp.lt.u32.totalorder %s3007_s27, %s3911_s5 }
  0x17   :  { %p3013_p10 = pnand %p3011_p9, %p3008_p8 }
  0x19   :  { %3016 = shalt.err (!%p3013_p10)
}
  0x1a   :  { %s3017_s12 = scalar_lea.vmem %s43_s24, 8192  ;;  %p3022_p12 = scmp.lt.s32.totalorder %s43_s24, %s43_s24 }
  0x1b   :  { %p3018_p11 = scmp.ne.s32.totalorder %s43_s24, %s3017_s12  ;;  %p3023_p13 = scmp.lt.s32.totalorder %s3017_s12, %s3017_s12 }
  0x1d   :  { %p3024_p0 = por %p3023_p13, %p3022_p12 }
  0x1f   :  { %p3025_p1 = pnand %p3024_p0, %p3018_p11 }
  0x21   :  { %3028 = shalt.err (!%p3025_p1)
}
  0x22   :  { %48 = dma.hbm_to_vmem [thread:$0]  %s3911_s5, 8192, %s43_s24, [#allocation6], %s3058_s19, %s3058_s19, %s3059_s20  }
  0x23   :  { %3051 = dma.done.wait [#allocation3], 8192  }
  0x24   :  { %3052 = vsyncadd [#allocation3], 4294959104 }
  0x25   :  { %3053 = dma.done.wait [#allocation6], 8192  }
  0x26   :  { %3054 = vsyncadd [#allocation6], 4294959104  ;;  %v3061_v0 = vmov 0   ;;  %v69_v1 = vld [vmem:[%s3906_s0 + $0x8] sm:$0xff]  ;;  %v68_v2 = vld [vmem:[%s3906_s0] sm:$0xff]  ;;  %v3062_v3 = vmov 1  }
  0x27   :  { %2854 = vset.pattern.permute.xlu1 %v3061_v0  ;;  %2852 = vset.pattern.permute.xlu0 %v3061_v0  ;;  %v70_v4 = vld [vmem:[%s3906_s0 + $0x10] sm:$0xff]  ;;  %v422_v5 = vld [vmem:[#allocation2 + $0x8] sm:$0xff]  ;;  %v424_v6 = vld [vmem:[#allocation2 + $0x18] sm:$0xff] }
  0x28   :  { %91 = vperm.xlu1 %2854, %v69_v1   ;;  %86 = vperm.xlu0 %2852, %v68_v2   ;;  %v421_v7 = vld [vmem:[#allocation2] sm:$0xff]  ;;  %v423_v8 = vld [vmem:[#allocation2 + $0x10] sm:$0xff]  ;;  %v2523_v9 = vpack.c.bf16 %v424_v6, %v422_v5  ;;  %v426_v11 = vld [vmem:[#allocation2 + $0x28] sm:$0xff] }
  0x29   :  { %v2525_v10 = vpack.c.bf16 %v423_v8, %v421_v7  ;;  %v428_v12 = vld [vmem:[#allocation2 + $0x38] sm:$0xff]  ;;  %v425_v14 = vld [vmem:[#allocation2 + $0x20] sm:$0xff]  ;;  %v427_v15 = vld [vmem:[#allocation2 + $0x30] sm:$0xff] }
  0x2a   :  { %v2527_v13 = vpack.c.bf16 %v428_v12, %v426_v11  ;;  %v430_v16 = vld [vmem:[#allocation2 + $0x48] sm:$0xff]  ;;  %v432_v17 = vld [vmem:[#allocation2 + $0x58] sm:$0xff]  ;;  %2524 = vmatprep.subr.bf16.mxu0 %v2523_v9  ;;  %v2529_v19 = vpack.c.bf16 %v427_v15, %v425_v14  ;;  %v429_v21 = vld [vmem:[#allocation2 + $0x40] sm:$0xff] }
  0x2b   :  { %v71_v18 = vld [vmem:[%s3906_s0 + $0x18] sm:$0xff]  ;;  %2526 = vmatpush1.bf16.msra.mxu0 %v2525_v10  ;;  %v2531_v20 = vpack.c.bf16 %v432_v17, %v430_v16  ;;  %v431_v22 = vld [vmem:[#allocation2 + $0x50] sm:$0xff]  ;;  %v434_v23 = vld [vmem:[#allocation2 + $0x68] sm:$0xff] }
  0x2c   :  { %2855 = vset.pattern.permute.xlu1 %v3062_v3  ;;  %2853 = vset.pattern.permute.xlu0 %v3062_v3  ;;  %v436_v24 = vld [vmem:[#allocation2 + $0x78] sm:$0xff]  ;;  %v72_v25 = vld [vmem:[%s3906_s0 + $0x20] sm:$0xff]  ;;  %v2533_v26 = vpack.c.bf16 %v431_v22, %v429_v21  ;;  %v435_v29 = vld [vmem:[#allocation2 + $0x70] sm:$0xff] }
  0x2d   :  { %212 = vperm.xlu1 %2855, %v69_v1   ;;  %208 = vperm.xlu0 %2853, %v68_v2   ;;  %v2535_v27 = vpack.c.bf16 %v436_v24, %v434_v23  ;;  %v433_v28 = vld [vmem:[#allocation2 + $0x60] sm:$0xff]  ;;  %v438_v30 = vld [vmem:[#allocation2 + $0x88] sm:$0xff]  ;;  %v440_v31 = vld [vmem:[#allocation2 + $0x98] sm:$0xff] }
  0x2e   :  { %2528 = vmatprep.subr.bf16.mxu0 %v2527_v13  ;;  %v73_v32 = vld [vmem:[%s3906_s0 + $0x28] sm:$0xff]  ;;  %v2537_v33 = vpack.c.bf16 %v435_v29, %v433_v28  ;;  %v2539_v34 = vpack.c.bf16 %v440_v31, %v438_v30  ;;  %v437_v35 = vld [vmem:[#allocation2 + $0x80] sm:$0xff]  ;;  %v439_v36 = vld [vmem:[#allocation2 + $0x90] sm:$0xff] }
  0x2f   :  { %2530 = vmatpush1.bf16.msra.mxu0 %v2529_v19  ;;  %v442_v37 = vld [vmem:[#allocation2 + $0xa8] sm:$0xff]  ;;  %v444_v38 = vld [vmem:[#allocation2 + $0xb8] sm:$0xff]  ;;  %v74_v39 = vld [vmem:[%s3906_s0 + $0x30] sm:$0xff]  ;;  %v2541_v40 = vpack.c.bf16 %v439_v36, %v437_v35 }
  0x30   :  { %2532 = vmatprep.subr.bf16.mxu0 %v2531_v20  ;;  %v2543_v41 = vpack.c.bf16 %v444_v38, %v442_v37  ;;  %v441_v42 = vld [vmem:[#allocation2 + $0xa0] sm:$0xff]  ;;  %v443_v43 = vld [vmem:[#allocation2 + $0xb0] sm:$0xff]  ;;  %v446_v44 = vld [vmem:[#allocation2 + $0xc8] sm:$0xff] }
  0x31   :  { %2856 = vset.pattern.permute.xlu1 %v3061_v0  ;;  %216 = vperm.xlu0 %2853, %v70_v4   ;;  %v448_v45 = vld [vmem:[#allocation2 + $0xd8] sm:$0xff]  ;;  %v2545_v47 = vpack.c.bf16 %v443_v43, %v441_v42  ;;  %v445_v49 = vld [vmem:[#allocation2 + $0xc0] sm:$0xff]  ;;  %v447_v50 = vld [vmem:[#allocation2 + $0xd0] sm:$0xff] }
  0x32   :  { %96 = vperm.xlu1 %2856, %v70_v4   ;;  %v75_v46 = vld [vmem:[%s3906_s0 + $0x38] sm:$0xff]  ;;  %v2547_v48 = vpack.c.bf16 %v448_v45, %v446_v44  ;;  %v450_v51 = vld [vmem:[#allocation2 + $0xe8] sm:$0xff]  ;;  %v76_v53 = vld [vmem:[%s3906_s0 + $0x40] sm:$0xff]  ;;  %v2549_v54 = vpack.c.bf16 %v447_v50, %v445_v49 }
  0x33   :  { %2534 = vmatpush1.bf16.msra.mxu0 %v2533_v26  ;;  %v452_v52 = vld [vmem:[#allocation2 + $0xf8] sm:$0xff]  ;;  %v449_v56 = vld [vmem:[#allocation2 + $0xe0] sm:$0xff]  ;;  %v451_v57 = vld [vmem:[#allocation2 + $0xf0] sm:$0xff] }
  0x34   :  { %2536 = vmatprep.subr.bf16.mxu0 %v2535_v27  ;;  %v2551_v55 = vpack.c.bf16 %v452_v52, %v450_v51  ;;  %v454_v58 = vld [vmem:[#allocation2 + $0x108] sm:$0xff]  ;;  %v456_v59 = vld [vmem:[#allocation2 + $0x118] sm:$0xff]  ;;  %v2553_v61 = vpack.c.bf16 %v451_v57, %v449_v56  ;;  %v453_v63 = vld [vmem:[#allocation2 + $0x100] sm:$0xff] }
  0x35   :  { %220 = vperm.xlu0 %2853, %v71_v18   ;;  %v77_v60 = vld [vmem:[%s3906_s0 + $0x48] sm:$0xff]  ;;  %v2555_v62 = vpack.c.bf16 %v456_v59, %v454_v58  ;;  %v455_v0 = vld [vmem:[#allocation2 + $0x110] sm:$0xff]  ;;  %v460_v2 = vld [vmem:[#allocation2 + $0x138] sm:$0xff] }
  0x36   :  { %101 = vperm.xlu1 %2856, %v71_v18   ;;  %v458_v1 = vld [vmem:[#allocation2 + $0x128] sm:$0xff]  ;;  %v78_v3 = vld [vmem:[%s3906_s0 + $0x50] sm:$0xff]  ;;  %v2557_v4 = vpack.c.bf16 %v455_v0, %v453_v63  ;;  %v457_v6 = vld [vmem:[#allocation2 + $0x120] sm:$0xff]  ;;  %v165_v0 = vlaneseq }
  0x37   :  { %2538 = vmatpush1.bf16.msra.mxu0 %v2537_v33  ;;  %v2559_v5 = vpack.c.bf16 %v460_v2, %v458_v1  ;;  %v459_v7 = vld [vmem:[#allocation2 + $0x130] sm:$0xff]  ;;  %v462_v8 = vld [vmem:[#allocation2 + $0x148] sm:$0xff]  ;;  %v464_v9 = vld [vmem:[#allocation2 + $0x158] sm:$0xff] }
  0x38   :  { %2540 = vmatprep.subr.bf16.mxu0 %v2539_v34  ;;  %v79_v10 = vld [vmem:[%s3906_s0 + $0x58] sm:$0xff]  ;;  %v2561_v11 = vpack.c.bf16 %v459_v7, %v457_v6  ;;  %v2563_v12 = vpack.c.bf16 %v464_v9, %v462_v8  ;;  %v461_v13 = vld [vmem:[#allocation2 + $0x140] sm:$0xff]  ;;  %v463_v14 = vld [vmem:[#allocation2 + $0x150] sm:$0xff]  ;;  %v166_v2 = vshrl.u32 %v165_v0, 7 }
  0x39   :  { %224 = vperm.xlu0 %2853, %v72_v25   ;;  %v466_v15 = vld [vmem:[#allocation2 + $0x168] sm:$0xff]  ;;  %v468_v16 = vld [vmem:[#allocation2 + $0x178] sm:$0xff]  ;;  %v80_v17 = vld [vmem:[%s3906_s0 + $0x60] sm:$0xff]  ;;  %v2565_v18 = vpack.c.bf16 %v463_v14, %v461_v13 }
  0x3a   :  { %106 = vperm.xlu1 %2856, %v72_v25   ;;  %v2567_v19 = vpack.c.bf16 %v468_v16, %v466_v15  ;;  %v465_v20 = vld [vmem:[#allocation2 + $0x160] sm:$0xff]  ;;  %v467_v21 = vld [vmem:[#allocation2 + $0x170] sm:$0xff]  ;;  %v470_v22 = vld [vmem:[#allocation2 + $0x188] sm:$0xff] }
  0x3b   :  { %2542 = vmatpush1.bf16.msra.mxu0 %v2541_v40  ;;  %v472_v23 = vld [vmem:[#allocation2 + $0x198] sm:$0xff]  ;;  %v81_v24 = vld [vmem:[%s3906_s0 + $0x68] sm:$0xff]  ;;  %v2569_v25 = vpack.c.bf16 %v467_v21, %v465_v20  ;;  %v469_v27 = vld [vmem:[#allocation2 + $0x180] sm:$0xff] }
  0x3c   :  { %2544 = vmatprep.subr.bf16.mxu0 %v2543_v41  ;;  %v2571_v26 = vpack.c.bf16 %v472_v23, %v470_v22  ;;  %v471_v28 = vld [vmem:[#allocation2 + $0x190] sm:$0xff]  ;;  %v474_v29 = vld [vmem:[#allocation2 + $0x1a8] sm:$0xff]  ;;  %v476_v30 = vld [vmem:[#allocation2 + $0x1b8] sm:$0xff] }
  0x3d   :  { %228 = vperm.xlu0 %2853, %v73_v32   ;;  %v82_v31 = vld [vmem:[%s3906_s0 + $0x70] sm:$0xff]  ;;  %v2575_v33 = vpack.c.bf16 %v476_v30, %v474_v29  ;;  %v473_v34 = vld [vmem:[#allocation2 + $0x1a0] sm:$0xff]  ;;  %v478_v36 = vld [vmem:[#allocation2 + $0x1c8] sm:$0xff] }
  0x3e   :  { %111 = vperm.xlu1 %2856, %v73_v32   ;;  %v2573_v32 = vpack.c.bf16 %v471_v28, %v469_v27  ;;  %v475_v35 = vld [vmem:[#allocation2 + $0x1b0] sm:$0xff]  ;;  %v480_v37 = vld [vmem:[#allocation2 + $0x1d8] sm:$0xff]  ;;  %v477_v41 = vld [vmem:[#allocation2 + $0x1c0] sm:$0xff] }
  0x3f   :  { %2546 = vmatpush1.bf16.msra.mxu0 %v2545_v47  ;;  %v83_v38 = vld [vmem:[%s3906_s0 + $0x78] sm:$0xff]  ;;  %v2579_v40 = vpack.c.bf16 %v480_v37, %v478_v36  ;;  %v479_v42 = vld [vmem:[#allocation2 + $0x1d0] sm:$0xff]  ;;  %v482_v43 = vld [vmem:[#allocation2 + $0x1e8] sm:$0xff] }
  0x40   :  { %2548 = vmatprep.subr.bf16.mxu0 %v2547_v48  ;;  %v484_v44 = vld [vmem:[#allocation2 + $0x1f8] sm:$0xff]  ;;  %v1236_v45 = vld [vmem:[%s3906_s0 + $0x80] sm:$0xff]  ;;  %v483_v49 = vld [vmem:[#allocation2 + $0x1f0] sm:$0xff] }
  0x41   :  { %232 = vperm.xlu0 %2853, %v74_v39   ;;  %v2583_v47 = vpack.c.bf16 %v484_v44, %v482_v43  ;;  %v481_v48 = vld [vmem:[#allocation2 + $0x1e0] sm:$0xff]  ;;  %v1237_v50 = vld [vmem:[%s3906_s0 + $0x88] sm:$0xff]  ;;  %v1238_v52 = vld [vmem:[%s3906_s0 + $0x90] sm:$0xff] }
  0x42   :  { %116 = vperm.xlu1 %2856, %v74_v39   ;;  %v2577_v39 = vpack.c.bf16 %v475_v35, %v473_v34  ;;  %v2585_v51 = vpack.c.bf16 %v483_v49, %v481_v48  ;;  %v1242_v56 = vld [vmem:[%s3906_s0 + $0xb0] sm:$0xff]  ;;  %v1243_v57 = vld [vmem:[%s3906_s0 + $0xb8] sm:$0xff]  ;;  %v1244_v58 = vld [vmem:[%s3906_s0 + $0xc0] sm:$0xff] }
  0x43   :  { %2550 = vmatpush1.bf16.msra.mxu0 %v2549_v54  ;;  %v1240_v54 = vld [vmem:[%s3906_s0 + $0xa0] sm:$0xff]  ;;  %v1245_v59 = vld [vmem:[%s3906_s0 + $0xc8] sm:$0xff]  ;;  %v1250_v1 = vld [vmem:[%s3906_s0 + $0xf0] sm:$0xff] }
  0x44   :  { %2552 = vmatprep.subr.bf16.mxu0 %v2551_v55  ;;  %v1241_v55 = vld [vmem:[%s3906_s0 + $0xa8] sm:$0xff]  ;;  %v65_v6 = vld [vmem:[%s3907_s1] ss:$2 sm:$0x3]  ;;  %v692_v14 = vld [vmem:[#allocation5 + $0x18] sm:$0xff] }
  0x45   :  { %236 = vperm.xlu0 %2853, %v75_v46   ;;  %v1249_v63 = vld [vmem:[%s3906_s0 + $0xe8] sm:$0xff]  ;;  %v2361_v7 = vld [vmem:[%s3907_s1 + $0x1] ss:$2 sm:$0x3]  ;;  %v696_v21 = vld [vmem:[#allocation5 + $0x38] sm:$0xff] }
  0x46   :  { %121 = vperm.xlu1 %2856, %v75_v46   ;;  %v2581_v46 = vpack.c.bf16 %v479_v42, %v477_v41  ;;  %v690_v13 = vld [vmem:[#allocation5 + $0x8] sm:$0xff]  ;;  %v689_v15 = vld [vmem:[#allocation5] sm:$0xff]  ;;  %v699_v43 = vld [vmem:[#allocation5 + $0x50] sm:$0xff] }
  0x47   :  { %2554 = vmatpush1.bf16.msra.mxu0 %v2553_v61  ;;  %v1247_v61 = vld [vmem:[%s3906_s0 + $0xd8] sm:$0xff]  ;;  %v694_v20 = vld [vmem:[#allocation5 + $0x28] sm:$0xff] }
  0x48   :  { %2556 = vmatprep.subr.bf16.mxu0 %v2555_v62  ;;  %v1248_v62 = vld [vmem:[%s3906_s0 + $0xe0] sm:$0xff]  ;;  %v2591_v23 = vpack.c.bf16 %v696_v21, %v694_v20  ;;  %v702_v44 = vld [vmem:[#allocation5 + $0x68] sm:$0xff]  ;;  %v708_v0 = vld [vmem:[#allocation5 + $0x98] sm:$0xff] }
  0x49   :  { %240 = vperm.xlu0 %2853, %v76_v53  }
  0x4a   :  { %126 = vperm.xlu1 %2856, %v76_v53   ;;  %v1239_v53 = vld [vmem:[%s3906_s0 + $0x98] sm:$0xff] }
  0x4b   :  { %2558 = vmatpush1.bf16.msra.mxu0 %v2557_v4  ;;  %v3236_v4 = vsub.s32 0, %v166_v2 }
  0x4c   :  { %2560 = vmatprep.subr.bf16.mxu0 %v2559_v5  ;;  %v3238_v5 = vsub.s32 1, %v166_v2 }
  0x4d   :  { %244 = vperm.xlu0 %2853, %v77_v60   ;;  %v3247_v9 = vrot.slane %v65_v6, %v3236_v4  ;;  %v3256_v16 = vrot.slane %v2361_v7, %v3236_v4 }
  0x4e   :  { %131 = vperm.xlu1 %2856, %v77_v60   ;;  %v1246_v60 = vld [vmem:[%s3906_s0 + $0xd0] sm:$0xff] }
  0x4f   :  { %2562 = vmatpush1.bf16.msra.mxu0 %v2561_v11 }
  0x50   :  { %2564 = vmatprep.subr.bf16.mxu0 %v2563_v12  ;;  %v61_v12 = vld [vmem:[%s3908_s2] sm:$0x3] }
  0x51   :  { %248 = vperm.xlu0 %2853, %v78_v3   ;;  %v3264_v29 = vrot.slane %v61_v12, %v3236_v4  ;;  %v3267_v30 = vrot.slane %v61_v12, %v3238_v5  ;;  %v705_v12 = vld [vmem:[#allocation5 + $0x80] sm:$0xff] }
  0x52   :  { %136 = vperm.xlu1 %2856, %v78_v3   ;;  %v1251_v3 = vld [vmem:[%s3906_s0 + $0xf8] sm:$0xff] }
  0x53   :  { %2566 = vmatpush1.bf16.msra.mxu0 %v2565_v18  ;;  %v2587_v18 = vpack.c.bf16 %v692_v14, %v690_v13  ;;  %v707_v13 = vld [vmem:[#allocation5 + $0x90] sm:$0xff] }
  0x54   :  { %2568 = vmatprep.subr.bf16.mxu0 %v2567_v19  ;;  %v691_v19 = vld [vmem:[#allocation5 + $0x10] sm:$0xff] }
  0x55   :  { %252 = vperm.xlu0 %2853, %v79_v10   ;;  %v2589_v22 = vpack.c.bf16 %v691_v19, %v689_v15  ;;  %2588 = vmatprep.subr.bf16.mxu1 %v2587_v18 }
  0x56   :  { %141 = vperm.xlu1 %2856, %v79_v10   ;;  %v3250_v10 = vrot.slane %v65_v6, %v3238_v5 }
  0x57   :  { %2570 = vmatpush1.bf16.msra.mxu0 %v2569_v25  ;;  %v695_v25 = vld [vmem:[#allocation5 + $0x30] sm:$0xff]  ;;  %2590 = vmatpush1.bf16.msra.mxu1 %v2589_v22 }
  0x58   :  { %2572 = vmatprep.subr.bf16.mxu0 %v2571_v26  ;;  %v698_v26 = vld [vmem:[#allocation5 + $0x48] sm:$0xff]  ;;  %2592 = vmatprep.subr.bf16.mxu1 %v2591_v23 }
  0x59   :  { %256 = vperm.xlu0 %2853, %v80_v17  }
  0x5a   :  { %146 = vperm.xlu1 %2856, %v80_v17   ;;  %v3259_v17 = vrot.slane %v2361_v7, %v3238_v5 }
  0x5b   :  { %2574 = vmatpush1.bf16.msra.mxu0 %v2573_v32 }
  0x5c   :  { %2576 = vmatprep.subr.bf16.mxu0 %v2575_v33 }
  0x5d   :  { %260 = vperm.xlu0 %2853, %v81_v24  }
  0x5e   :  { %151 = vperm.xlu1 %2856, %v81_v24   ;;  %v693_v24 = vld [vmem:[#allocation5 + $0x20] sm:$0xff] }
  0x5f   :  { %2578 = vmatpush1.bf16.msra.mxu0 %v2577_v39  ;;  %v2593_v36 = vpack.c.bf16 %v695_v25, %v693_v24  ;;  %v710_v24 = vld [vmem:[#allocation5 + $0xa8] sm:$0xff]  ;;  %v712_v25 = vld [vmem:[#allocation5 + $0xb8] sm:$0xff] }
  0x60   :  { %2580 = vmatprep.subr.bf16.mxu0 %v2579_v40 }
  0x61   :  { %264 = vperm.xlu0 %2853, %v82_v31   ;;  %2594 = vmatpush1.bf16.msra.mxu1 %v2593_v36  ;;  %v711_v36 = vld [vmem:[#allocation5 + $0xb0] sm:$0xff] }
  0x62   :  { %156 = vperm.xlu1 %2856, %v82_v31   ;;  %v700_v31 = vld [vmem:[#allocation5 + $0x58] sm:$0xff] }
  0x63   :  { %2582 = vmatpush1.bf16.msra.mxu0 %v2581_v46  ;;  %v2595_v37 = vpack.c.bf16 %v700_v31, %v698_v26 }
  0x64   :  { %2584 = vmatprep.subr.bf16.mxu0 %v2583_v47 }
  0x65   :  { %268 = vperm.xlu0 %2853, %v83_v38   ;;  %2596 = vmatprep.subr.bf16.mxu1 %v2595_v37 }
  0x66   :  { %161 = vperm.xlu1 %2856, %v83_v38   ;;  %v697_v38 = vld [vmem:[#allocation5 + $0x40] sm:$0xff] }
  0x67   :  { %2586 = vmatpush1.bf16.msra.mxu0 %v2585_v51  ;;  %v2597_v51 = vpack.c.bf16 %v699_v43, %v697_v38 }
  0x69   :  { %1365 = vperm.xlu0 %2853, %v1236_v45   ;;  %2598 = vmatpush1.bf16.msra.mxu1 %v2597_v51 }
  0x6a   :  { %1254 = vperm.xlu1 %2856, %v1236_v45   ;;  %v704_v45 = vld [vmem:[#allocation5 + $0x78] sm:$0xff] }
  0x6d   :  { %1369 = vperm.xlu0 %2853, %v1237_v50  }
  0x6e   :  { %1259 = vperm.xlu1 %2856, %v1237_v50  }
  0x71   :  { %1373 = vperm.xlu0 %2853, %v1238_v52  }
  0x72   :  { %1264 = vperm.xlu1 %2856, %v1238_v52   ;;  %v2599_v52 = vpack.c.bf16 %v704_v45, %v702_v44  ;;  %v714_v44 = vld [vmem:[#allocation5 + $0xc8] sm:$0xff]  ;;  %v716_v45 = vld [vmem:[#allocation5 + $0xd8] sm:$0xff] }
  0x74   :  { %2600 = vmatprep.subr.bf16.mxu1 %v2599_v52 }
  0x75   :  { %1377 = vperm.xlu0 %2853, %v1239_v53  }
  0x76   :  { %1269 = vperm.xlu1 %2856, %v1239_v53  }
  0x79   :  { %1381 = vperm.xlu0 %2853, %v1240_v54  }
  0x7a   :  { %1274 = vperm.xlu1 %2856, %v1240_v54  }
  0x7d   :  { %1385 = vperm.xlu0 %2853, %v1241_v55  }
  0x7e   :  { %1279 = vperm.xlu1 %2856, %v1241_v55  }
  0x81   :  { %1389 = vperm.xlu0 %2853, %v1242_v56  }
  0x82   :  { %1284 = vperm.xlu1 %2856, %v1242_v56  }
  0x85   :  { %1393 = vperm.xlu0 %2853, %v1243_v57  }
  0x86   :  { %1289 = vperm.xlu1 %2856, %v1243_v57  }
  0x89   :  { %1397 = vperm.xlu0 %2853, %v1244_v58  }
  0x8a   :  { %1294 = vperm.xlu1 %2856, %v1244_v58   ;;  %v701_v58 = vld [vmem:[#allocation5 + $0x60] sm:$0xff] }
  0x8d   :  { %1401 = vperm.xlu0 %2853, %v1245_v59  }
  0x8e   :  { %1299 = vperm.xlu1 %2856, %v1245_v59   ;;  %v703_v59 = vld [vmem:[#allocation5 + $0x70] sm:$0xff] }
  0x91   :  { %1405 = vperm.xlu0 %2853, %v1246_v60  }
  0x92   :  { %1304 = vperm.xlu1 %2856, %v1246_v60  }
  0x95   :  { %1409 = vperm.xlu0 %2853, %v1247_v61  }
  0x96   :  { %1309 = vperm.xlu1 %2856, %v1247_v61  }
  0x99   :  { %1413 = vperm.xlu0 %2853, %v1248_v62  }
  0x9a   :  { %1314 = vperm.xlu1 %2856, %v1248_v62  }
  0x9d   :  { %1417 = vperm.xlu0 %2853, %v1249_v63  }
  0x9e   :  { %1319 = vperm.xlu1 %2856, %v1249_v63   ;;  %v706_v63 = vld [vmem:[#allocation5 + $0x88] sm:$0xff] }
  0x9f   :  { %v2603_v20 = vpack.c.bf16 %v708_v0, %v706_v63  ;;  %v720_v63 = vld [vmem:[#allocation5 + $0xf8] sm:$0xff] }
  0xa1   :  { %1421 = vperm.xlu0 %2853, %v1250_v1  }
  0xa2   :  { %1324 = vperm.xlu1 %2856, %v1250_v1  }
  0xa5   :  { %1425 = vperm.xlu0 %2853, %v1251_v3  }
  0xa6   :  { %1329 = vperm.xlu1 %2856, %v1251_v3  }
  0xa7   :  { %v87_v8 = vpop.permute.xlu0 %86  ;;  %v92_v11 = vpop.permute.xlu1 %91 }
  0xa8   :  { %v175_v27 = vmul.f32 %v3247_v9, %v87_v8  ;;  %v176_v28 = vmul.f32 %v3250_v10, %v87_v8  ;;  %v177_v32 = vmul.f32 %v3247_v9, %v92_v11  ;;  %v178_v33 = vmul.f32 %v3250_v10, %v92_v11 }
  0xa9   :  { %v2601_v11 = vpack.c.bf16 %v703_v59, %v701_v58  ;;  %v2611_v58 = vpack.c.bf16 %v716_v45, %v714_v44 }
  0xab   :  { %2602 = vmatpush1.bf16.msra.mxu1 %v2601_v11  ;;  %v717_v11 = vld [vmem:[#allocation5 + $0xe0] sm:$0xff] }
  0xac   :  { %v213_v34 = vpop.permute.xlu1 %212  ;;  %v209_v35 = vpop.permute.xlu0 %208  ;;  %2604 = vmatprep.subr.bf16.mxu1 %v2603_v20 }
  0xad   :  { %v284_v39 = vmul.f32 %v3256_v16, %v213_v34  ;;  %v285_v40 = vmul.f32 %v3259_v17, %v213_v34  ;;  %v282_v41 = vmul.f32 %v3256_v16, %v209_v35  ;;  %v283_v42 = vmul.f32 %v3259_v17, %v209_v35  ;;  %v709_v35 = vld [vmem:[#allocation5 + $0xa0] sm:$0xff] }
  0xaf   :  { %v316_v46 = vadd.f32 %v284_v39, %v177_v32  ;;  %v317_v47 = vadd.f32 %v285_v40, %v178_v33  ;;  %v314_v48 = vadd.f32 %v282_v41, %v175_v27  ;;  %v315_v49 = vadd.f32 %v283_v42, %v176_v28 }
  0xb0   :  { %v217_v50 = vpop.permute.xlu0 %216  ;;  %v2605_v27 = vpack.c.bf16 %v707_v13, %v705_v12  ;;  %v2607_v40 = vpack.c.bf16 %v712_v25, %v710_v24  ;;  %v719_v12 = vld [vmem:[#allocation5 + $0xf0] sm:$0xff] }
  0xb1   :  { %v286_v53 = vmul.f32 %v3256_v16, %v217_v50  ;;  %v287_v54 = vmul.f32 %v3259_v17, %v217_v50  ;;  %v97_v55 = vpop.permute.xlu1 %96  ;;  %v358_v56 = vadd.f32 %v3267_v30, %v315_v49  ;;  %v357_v57 = vadd.f32 %v3264_v29, %v314_v48 }
  0xb2   :  { %v179_v60 = vmul.f32 %v3247_v9, %v97_v55  ;;  %v180_v61 = vmul.f32 %v3250_v10, %v97_v55  ;;  %v360_v62 = vadd.f32 %v3267_v30, %v317_v47  ;;  %v359_v3 = vadd.f32 %v3264_v29, %v316_v46  ;;  %2606 = vmatpush1.bf16.msra.mxu1 %v2605_v27 }
  0xb3   :  { %v390_v1 = vmax.f32 %v358_v56, 0.0  ;;  %v389_v2 = vmax.f32 %v357_v57, 0.0  ;;  %v2609_v47 = vpack.c.bf16 %v711_v36, %v709_v35  ;;  %2608 = vmatprep.subr.bf16.mxu1 %v2607_v40  ;;  %v2617_v25 = vpack.c.bf16 %v719_v12, %v717_v11 }
  0xb4   :  { %v318_v6 = vadd.f32 %v286_v53, %v179_v60  ;;  %v319_v7 = vadd.f32 %v287_v54, %v180_v61  ;;  %v221_v8 = vpop.permute.xlu0 %220  ;;  %v392_v19 = vmax.f32 %v360_v62, 0.0  ;;  %v391_v26 = vmax.f32 %v359_v3, 0.0  ;;  %v713_v53 = vld [vmem:[#allocation5 + $0xc0] sm:$0xff]  ;;  %v715_v54 = vld [vmem:[#allocation5 + $0xd0] sm:$0xff]  ;;  %v718_v62 = vld [vmem:[#allocation5 + $0xe8] sm:$0xff] }
  0xb5   :  { %v288_v14 = vmul.f32 %v3256_v16, %v221_v8  ;;  %v289_v15 = vmul.f32 %v3259_v17, %v221_v8  ;;  %v102_v18 = vpop.permute.xlu1 %101  ;;  %560 = vmatprep.mubr.f32.mxu0 %v390_v1  ;;  %v2613_v1 = vpack.c.bf16 %v715_v54, %v713_v53 }
  0xb6   :  { %v181_v21 = vmul.f32 %v3247_v9, %v102_v18  ;;  %v182_v22 = vmul.f32 %v3250_v10, %v102_v18  ;;  %561 = vmatmul.mubr.f32.vlgmr.msra.gmra.mrb[0].mxu0 %v389_v2  ;;  %v362_v23 = vadd.f32 %v3267_v30, %v319_v7  ;;  %v361_v34 = vadd.f32 %v3264_v29, %v318_v6 }
  0xb7   :  { %566 = vmatprep.mubr.f32.mxu0 %v392_v19  ;;  %2610 = vmatpush1.bf16.msra.mxu1 %v2609_v47  ;;  %v2615_v18 = vpack.c.bf16 %v720_v63, %v718_v62 }
  0xb8   :  { %v320_v28 = vadd.f32 %v288_v14, %v181_v21  ;;  %v321_v31 = vadd.f32 %v289_v15, %v182_v22  ;;  %v225_v32 = vpop.permute.xlu0 %224  ;;  %v394_v33 = vmax.f32 %v362_v23, 0.0  ;;  %v393_v51 = vmax.f32 %v361_v34, 0.0  ;;  %2612 = vmatprep.subr.bf16.mxu1 %v2611_v58  ;;  %v722_v22 = vld [vmem:[#allocation5 + $0x108] sm:$0xff]  ;;  %v724_v23 = vld [vmem:[#allocation5 + $0x118] sm:$0xff]  ;;  %v723_v34 = vld [vmem:[#allocation5 + $0x110] sm:$0xff] }
  0xb9   :  { %v290_v37 = vmul.f32 %v3256_v16, %v225_v32  ;;  %v291_v38 = vmul.f32 %v3259_v17, %v225_v32  ;;  %v107_v39 = vpop.permute.xlu1 %106 }
  0xba   :  { %v183_v41 = vmul.f32 %v3247_v9, %v107_v39  ;;  %v184_v42 = vmul.f32 %v3250_v10, %v107_v39  ;;  %567 = vmatmul.mubr.f32.gmra.mrb[2].mxu0 %v391_v26  ;;  %v364_v43 = vadd.f32 %v3267_v30, %v321_v31  ;;  %v363_v46 = vadd.f32 %v3264_v29, %v320_v28 }
  0xbb   :  { %572 = vmatprep.mubr.f32.mxu0 %v394_v33  ;;  %2614 = vmatpush1.bf16.msra.mxu1 %v2613_v1  ;;  %v721_v33 = vld [vmem:[#allocation5 + $0x100] sm:$0xff] }
  0xbc   :  { %v322_v48 = vadd.f32 %v290_v37, %v183_v41  ;;  %v323_v49 = vadd.f32 %v291_v38, %v184_v42  ;;  %v229_v50 = vpop.permute.xlu0 %228  ;;  %v396_v52 = vmax.f32 %v364_v43, 0.0  ;;  %v395_v0 = vmax.f32 %v363_v46, 0.0  ;;  %2616 = vmatprep.subr.bf16.mxu1 %v2615_v18  ;;  %v726_v42 = vld [vmem:[#allocation5 + $0x128] sm:$0xff]  ;;  %v728_v43 = vld [vmem:[#allocation5 + $0x138] sm:$0xff] }
  0xbd   :  { %v292_v55 = vmul.f32 %v3256_v16, %v229_v50  ;;  %v293_v56 = vmul.f32 %v3259_v17, %v229_v50  ;;  %v112_v57 = vpop.permute.xlu1 %111  ;;  %v2619_v38 = vpack.c.bf16 %v724_v23, %v722_v22  ;;  %v2621_v45 = vpack.c.bf16 %v723_v34, %v721_v33 }
  0xbe   :  { %v185_v59 = vmul.f32 %v3247_v9, %v112_v57  ;;  %v186_v60 = vmul.f32 %v3250_v10, %v112_v57  ;;  %573 = vmatmul.mubr.f32.gmra.mrb[4].mxu0 %v393_v51  ;;  %v366_v61 = vadd.f32 %v3267_v30, %v323_v49  ;;  %v365_v8 = vadd.f32 %v3264_v29, %v322_v48  ;;  %v725_v51 = vld [vmem:[#allocation5 + $0x120] sm:$0xff] }
  0xbf   :  { %578 = vmatprep.mubr.f32.mxu0 %v396_v52  ;;  %2618 = vmatpush1.bf16.msra.mxu1 %v2617_v25  ;;  %v727_v52 = vld [vmem:[#allocation5 + $0x130] sm:$0xff] }
  0xc0   :  { %v324_v2 = vadd.f32 %v292_v55, %v185_v59  ;;  %v325_v3 = vadd.f32 %v293_v56, %v186_v60  ;;  %v233_v6 = vpop.permute.xlu0 %232  ;;  %v398_v7 = vmax.f32 %v366_v61, 0.0  ;;  %v397_v31 = vmax.f32 %v365_v8, 0.0  ;;  %2620 = vmatprep.subr.bf16.mxu1 %v2619_v38  ;;  %v730_v60 = vld [vmem:[#allocation5 + $0x148] sm:$0xff]  ;;  %v732_v61 = vld [vmem:[#allocation5 + $0x158] sm:$0xff]  ;;  %v731_v8 = vld [vmem:[#allocation5 + $0x150] sm:$0xff] }
  0xc1   :  { %v294_v13 = vmul.f32 %v3256_v16, %v233_v6  ;;  %v295_v14 = vmul.f32 %v3259_v17, %v233_v6  ;;  %v117_v15 = vpop.permute.xlu1 %116  ;;  %v2623_v56 = vpack.c.bf16 %v728_v43, %v726_v42  ;;  %v2625_v63 = vpack.c.bf16 %v727_v52, %v725_v51 }
  0xc2   :  { %v187_v19 = vmul.f32 %v3247_v9, %v117_v15  ;;  %v188_v20 = vmul.f32 %v3250_v10, %v117_v15  ;;  %579 = vmatmul.mubr.f32.gmra.mrb[6].mxu0 %v395_v0  ;;  %v368_v21 = vadd.f32 %v3267_v30, %v325_v3  ;;  %v367_v24 = vadd.f32 %v3264_v29, %v324_v2 }
  0xc3   :  { %584 = vmatprep.mubr.f32.mxu0 %v398_v7  ;;  %2622 = vmatpush1.bf16.msra.mxu1 %v2621_v45  ;;  %v729_v7 = vld [vmem:[#allocation5 + $0x140] sm:$0xff] }
  0xc4   :  { %v326_v26 = vadd.f32 %v294_v13, %v187_v19  ;;  %v327_v27 = vadd.f32 %v295_v14, %v188_v20  ;;  %v237_v28 = vpop.permute.xlu0 %236  ;;  %v400_v32 = vmax.f32 %v368_v21, 0.0  ;;  %v399_v44 = vmax.f32 %v367_v24, 0.0  ;;  %2624 = vmatprep.subr.bf16.mxu1 %v2623_v56  ;;  %v734_v20 = vld [vmem:[#allocation5 + $0x168] sm:$0xff]  ;;  %v736_v21 = vld [vmem:[#allocation5 + $0x178] sm:$0xff] }
  0xc5   :  { %v296_v35 = vmul.f32 %v3256_v16, %v237_v28  ;;  %v297_v36 = vmul.f32 %v3259_v17, %v237_v28  ;;  %v122_v37 = vpop.permute.xlu1 %121  ;;  %v2627_v14 = vpack.c.bf16 %v732_v61, %v730_v60  ;;  %v2629_v23 = vpack.c.bf16 %v731_v8, %v729_v7 }
  0xc6   :  { %v189_v39 = vmul.f32 %v3247_v9, %v122_v37  ;;  %v190_v40 = vmul.f32 %v3250_v10, %v122_v37  ;;  %585 = vmatmul.mubr.f32.gmra.mrb[8].mxu0 %v397_v31  ;;  %v370_v41 = vadd.f32 %v3267_v30, %v327_v27  ;;  %v369_v50 = vadd.f32 %v3264_v29, %v326_v26  ;;  %v733_v31 = vld [vmem:[#allocation5 + $0x160] sm:$0xff] }
  0xc7   :  { %590 = vmatprep.mubr.f32.mxu0 %v400_v32  ;;  %2626 = vmatpush1.bf16.msra.mxu1 %v2625_v63  ;;  %v735_v32 = vld [vmem:[#allocation5 + $0x170] sm:$0xff] }
  0xc8   :  { %v328_v46 = vadd.f32 %v296_v35, %v189_v39  ;;  %v329_v47 = vadd.f32 %v297_v36, %v190_v40  ;;  %v241_v48 = vpop.permute.xlu0 %240  ;;  %v402_v49 = vmax.f32 %v370_v41, 0.0  ;;  %v401_v3 = vmax.f32 %v369_v50, 0.0  ;;  %2628 = vmatprep.subr.bf16.mxu1 %v2627_v14  ;;  %v738_v40 = vld [vmem:[#allocation5 + $0x188] sm:$0xff]  ;;  %v740_v41 = vld [vmem:[#allocation5 + $0x198] sm:$0xff]  ;;  %v739_v50 = vld [vmem:[#allocation5 + $0x190] sm:$0xff] }
  0xc9   :  { %v298_v53 = vmul.f32 %v3256_v16, %v241_v48  ;;  %v299_v54 = vmul.f32 %v3259_v17, %v241_v48  ;;  %v127_v55 = vpop.permute.xlu1 %126  ;;  %v2631_v36 = vpack.c.bf16 %v736_v21, %v734_v20  ;;  %v2633_v43 = vpack.c.bf16 %v735_v32, %v733_v31 }
  0xca   :  { %v191_v57 = vmul.f32 %v3247_v9, %v127_v55  ;;  %v192_v58 = vmul.f32 %v3250_v10, %v127_v55  ;;  %591 = vmatmul.mubr.f32.gmra.mrb[10].mxu0 %v399_v44  ;;  %v372_v59 = vadd.f32 %v3267_v30, %v329_v47  ;;  %v371_v62 = vadd.f32 %v3264_v29, %v328_v46 }
  0xcb   :  { %596 = vmatprep.mubr.f32.mxu0 %v402_v49  ;;  %2630 = vmatpush1.bf16.msra.mxu1 %v2629_v23  ;;  %v737_v49 = vld [vmem:[#allocation5 + $0x180] sm:$0xff] }
  0xcc   :  { %v330_v0 = vadd.f32 %v298_v53, %v191_v57  ;;  %v331_v1 = vadd.f32 %v299_v54, %v192_v58  ;;  %v245_v2 = vpop.permute.xlu0 %244  ;;  %v404_v6 = vmax.f32 %v372_v59, 0.0  ;;  %v403_v22 = vmax.f32 %v371_v62, 0.0  ;;  %2632 = vmatprep.subr.bf16.mxu1 %v2631_v36  ;;  %v742_v58 = vld [vmem:[#allocation5 + $0x1a8] sm:$0xff]  ;;  %v744_v59 = vld [vmem:[#allocation5 + $0x1b8] sm:$0xff] }
  0xcd   :  { %v300_v11 = vmul.f32 %v3256_v16, %v245_v2  ;;  %v301_v12 = vmul.f32 %v3259_v17, %v245_v2  ;;  %v132_v13 = vpop.permute.xlu1 %131  ;;  %v2635_v54 = vpack.c.bf16 %v740_v41, %v738_v40  ;;  %v2637_v61 = vpack.c.bf16 %v739_v50, %v737_v49 }
  0xce   :  { %v193_v15 = vmul.f32 %v3247_v9, %v132_v13  ;;  %v194_v18 = vmul.f32 %v3250_v10, %v132_v13  ;;  %597 = vmatmul.mubr.f32.gmra.mrb[12].mxu0 %v401_v3  ;;  %v374_v19 = vadd.f32 %v3267_v30, %v331_v1  ;;  %v373_v28 = vadd.f32 %v3264_v29, %v330_v0  ;;  %v741_v3 = vld [vmem:[#allocation5 + $0x1a0] sm:$0xff] }
  0xcf   :  { %602 = vmatprep.mubr.f32.mxu0 %v404_v6  ;;  %2634 = vmatpush1.bf16.msra.mxu1 %v2633_v43  ;;  %v743_v6 = vld [vmem:[#allocation5 + $0x1b0] sm:$0xff] }
  0xd0   :  { %v332_v24 = vadd.f32 %v300_v11, %v193_v15  ;;  %v333_v25 = vadd.f32 %v301_v12, %v194_v18  ;;  %v249_v26 = vpop.permute.xlu0 %248  ;;  %v406_v27 = vmax.f32 %v374_v19, 0.0  ;;  %v405_v47 = vmax.f32 %v373_v28, 0.0  ;;  %2636 = vmatprep.subr.bf16.mxu1 %v2635_v54  ;;  %v746_v18 = vld [vmem:[#allocation5 + $0x1c8] sm:$0xff]  ;;  %v748_v19 = vld [vmem:[#allocation5 + $0x1d8] sm:$0xff]  ;;  %v747_v28 = vld [vmem:[#allocation5 + $0x1d0] sm:$0xff] }
  0xd1   :  { %v302_v33 = vmul.f32 %v3256_v16, %v249_v26  ;;  %v303_v34 = vmul.f32 %v3259_v17, %v249_v26  ;;  %v137_v35 = vpop.permute.xlu1 %136  ;;  %v2639_v12 = vpack.c.bf16 %v744_v59, %v742_v58  ;;  %v2641_v21 = vpack.c.bf16 %v743_v6, %v741_v3 }
  0xd2   :  { %v195_v37 = vmul.f32 %v3247_v9, %v137_v35  ;;  %v196_v38 = vmul.f32 %v3250_v10, %v137_v35  ;;  %603 = vmatmul.mubr.f32.gmra.mrb[14].mxu0 %v403_v22  ;;  %v376_v39 = vadd.f32 %v3267_v30, %v333_v25  ;;  %v375_v42 = vadd.f32 %v3264_v29, %v332_v24 }
  0xd3   :  { %608 = vmatprep.mubr.f32.mxu0 %v406_v27  ;;  %2638 = vmatpush1.bf16.msra.mxu1 %v2637_v61  ;;  %v745_v27 = vld [vmem:[#allocation5 + $0x1c0] sm:$0xff] }
  0xd4   :  { %v334_v44 = vadd.f32 %v302_v33, %v195_v37  ;;  %v335_v45 = vadd.f32 %v303_v34, %v196_v38  ;;  %v253_v46 = vpop.permute.xlu0 %252  ;;  %v408_v48 = vmax.f32 %v376_v39, 0.0  ;;  %v407_v60 = vmax.f32 %v375_v42, 0.0  ;;  %2640 = vmatprep.subr.bf16.mxu1 %v2639_v12 }
  0xd5   :  { %v304_v51 = vmul.f32 %v3256_v16, %v253_v46  ;;  %v305_v52 = vmul.f32 %v3259_v17, %v253_v46  ;;  %v142_v53 = vpop.permute.xlu1 %141  ;;  %v2643_v34 = vpack.c.bf16 %v748_v19, %v746_v18  ;;  %v2645_v39 = vpack.c.bf16 %v747_v28, %v745_v27  ;;  %v749_v18 = vld [vmem:[#allocation5 + $0x1e0] sm:$0xff]  ;;  %v751_v19 = vld [vmem:[#allocation5 + $0x1f0] sm:$0xff] }
  0xd6   :  { %v197_v55 = vmul.f32 %v3247_v9, %v142_v53  ;;  %v198_v56 = vmul.f32 %v3250_v10, %v142_v53  ;;  %609 = vmatmul.mubr.f32.gmra.mrb[16].mxu0 %v405_v47  ;;  %v378_v57 = vadd.f32 %v3267_v30, %v335_v45  ;;  %v377_v2 = vadd.f32 %v3264_v29, %v334_v44  ;;  %v1556_v28 = vld [vmem:[#allocation2] sm:$0xff] }
  0xd7   :  { %614 = vmatprep.mubr.f32.mxu0 %v408_v48  ;;  %2642 = vmatpush1.bf16.msra.mxu1 %v2641_v21  ;;  %v1557_v21 = vld [vmem:[#allocation2 + $0x8] sm:$0xff] }
  0xd8   :  { %v336_v62 = vadd.f32 %v304_v51, %v197_v55  ;;  %v337_v63 = vadd.f32 %v305_v52, %v198_v56  ;;  %v257_v0 = vpop.permute.xlu0 %256  ;;  %v410_v1 = vmax.f32 %v378_v57, 0.0  ;;  %v409_v25 = vmax.f32 %v377_v2, 0.0  ;;  %2644 = vmatprep.subr.bf16.mxu1 %v2643_v34  ;;  %v1561_v34 = vld [vmem:[#allocation2 + $0x28] sm:$0xff] }
  0xd9   :  { %v306_v7 = vmul.f32 %v3256_v16, %v257_v0  ;;  %v307_v8 = vmul.f32 %v3259_v17, %v257_v0  ;;  %v147_v11 = vpop.permute.xlu1 %146 }
  0xda   :  { %v199_v13 = vmul.f32 %v3247_v9, %v147_v11  ;;  %v200_v14 = vmul.f32 %v3250_v10, %v147_v11  ;;  %615 = vmatmul.mubr.f32.gmra.mrb[18].mxu0 %v407_v60  ;;  %v380_v15 = vadd.f32 %v3267_v30, %v337_v63  ;;  %v379_v20 = vadd.f32 %v3264_v29, %v336_v62 }
  0xdb   :  { %620 = vmatprep.mubr.f32.mxu0 %v410_v1  ;;  %2646 = vmatpush1.bf16.msra.mxu1 %v2645_v39  ;;  %v973_v39 = vld [vmem:[%s3913_s7 + $0x80] sm:$0xff] }
  0xdc   :  { %v338_v22 = vadd.f32 %v306_v7, %v199_v13  ;;  %v339_v23 = vadd.f32 %v307_v8, %v200_v14  ;;  %v261_v24 = vpop.permute.xlu0 %260  ;;  %v412_v26 = vmax.f32 %v380_v15, 0.0  ;;  %v411_v38 = vmax.f32 %v379_v20, 0.0  ;;  %v750_v13 = vld [vmem:[#allocation5 + $0x1e8] sm:$0xff]  ;;  %v752_v14 = vld [vmem:[#allocation5 + $0x1f8] sm:$0xff] }
  0xdd   :  { %v308_v31 = vmul.f32 %v3256_v16, %v261_v24  ;;  %v309_v32 = vmul.f32 %v3259_v17, %v261_v24  ;;  %v152_v33 = vpop.permute.xlu1 %151  ;;  %v2647_v15 = vpack.c.bf16 %v752_v14, %v750_v13  ;;  %v2649_v20 = vpack.c.bf16 %v751_v19, %v749_v18  ;;  %v62_v24 = vld [vmem:[%s3910_s4] sm:$0x3]  ;;  %v1566_v14 = vld [vmem:[#allocation2 + $0x50] sm:$0xff]  ;;  %v980_v18 = vld [vmem:[%s3913_s7 + $0xb8] sm:$0xff] }
  0xde   :  { %v201_v35 = vmul.f32 %v3247_v9, %v152_v33  ;;  %v202_v36 = vmul.f32 %v3250_v10, %v152_v33  ;;  %621 = vmatmul.mubr.f32.gmra.mrb[20].mxu0 %v409_v25  ;;  %v382_v37 = vadd.f32 %v3267_v30, %v339_v23  ;;  %v381_v44 = vadd.f32 %v3264_v29, %v338_v22  ;;  %v1559_v22 = vld [vmem:[#allocation2 + $0x18] sm:$0xff]  ;;  %v1558_v33 = vld [vmem:[#allocation2 + $0x10] sm:$0xff] }
  0xdf   :  { %626 = vmatprep.mubr.f32.mxu0 %v412_v26  ;;  %2648 = vmatprep.subr.bf16.mxu1 %v2647_v15  ;;  %v2683_v23 = vpack.c.bf16 %v1559_v22, %v1557_v21  ;;  %v3367_v25 = vrot.slane %v62_v24, %v3236_v4  ;;  %v3370_v26 = vrot.slane %v62_v24, %v3238_v5  ;;  %v979_v15 = vld [vmem:[%s3913_s7 + $0xb0] sm:$0xff]  ;;  %v1571_v21 = vld [vmem:[#allocation2 + $0x78] sm:$0xff] }
  0xe0   :  { %v340_v40 = vadd.f32 %v308_v31, %v201_v35  ;;  %v341_v41 = vadd.f32 %v309_v32, %v202_v36  ;;  %v265_v42 = vpop.permute.xlu0 %264  ;;  %v414_v43 = vmax.f32 %v382_v37, 0.0  ;;  %v413_v55 = vmax.f32 %v381_v44, 0.0  ;;  %2650 = vmatpush1.bf16.msra.mxu1 %v2649_v20  ;;  %v1563_v35 = vld [vmem:[#allocation2 + $0x38] sm:$0xff]  ;;  %v1560_v37 = vld [vmem:[#allocation2 + $0x20] sm:$0xff]  ;;  %v1569_v20 = vld [vmem:[#allocation2 + $0x68] sm:$0xff] }
  0xe1   :  { %v310_v45 = vmul.f32 %v3256_v16, %v265_v42  ;;  %v311_v46 = vmul.f32 %v3259_v17, %v265_v42  ;;  %v157_v47 = vpop.permute.xlu1 %156  ;;  %2684 = vmatprep.subr.bf16.mxu1 %v2683_v23  ;;  %v2685_v44 = vpack.c.bf16 %v1558_v33, %v1556_v28  ;;  %v1568_v28 = vld [vmem:[#allocation2 + $0x60] sm:$0xff]  ;;  %v964_v33 = vld [vmem:[%s3913_s7 + $0x38] sm:$0xff] }
  0xe2   :  { %v203_v48 = vmul.f32 %v3247_v9, %v157_v47  ;;  %v204_v49 = vmul.f32 %v3250_v10, %v157_v47  ;;  %627 = vmatmul.mubr.f32.gmra.mrb[22].mxu0 %v411_v38  ;;  %v384_v50 = vadd.f32 %v3267_v30, %v341_v41  ;;  %v383_v51 = vadd.f32 %v3264_v29, %v340_v40  ;;  %v1562_v38 = vld [vmem:[#allocation2 + $0x30] sm:$0xff]  ;;  %v974_v40 = vld [vmem:[%s3913_s7 + $0x88] sm:$0xff]  ;;  %v957_v41 = vld [vmem:[%s3913_s7] sm:$0xff] }
  0xe3   :  { %632 = vmatprep.mubr.f32.mxu0 %v414_v43  ;;  %v958_v47 = vld [vmem:[%s3913_s7 + $0x8] sm:$0xff] }
  0xe4   :  { %v342_v52 = vadd.f32 %v310_v45, %v203_v48  ;;  %v343_v53 = vadd.f32 %v311_v46, %v204_v49  ;;  %v269_v54 = vpop.permute.xlu0 %268  ;;  %v416_v56 = vmax.f32 %v384_v50, 0.0  ;;  %v415_v63 = vmax.f32 %v383_v51, 0.0  ;;  %v975_v48 = vld [vmem:[%s3913_s7 + $0x90] sm:$0xff]  ;;  %v976_v49 = vld [vmem:[%s3913_s7 + $0x98] sm:$0xff] }
  0xe5   :  { %v312_v57 = vmul.f32 %v3256_v16, %v269_v54  ;;  %v313_v58 = vmul.f32 %v3259_v17, %v269_v54  ;;  %v162_v59 = vpop.permute.xlu1 %161  ;;  %v2687_v45 = vpack.c.bf16 %v1563_v35, %v1561_v34  ;;  %v3383_v46 = vpack.c.bf16 %v974_v40, %v973_v39  ;;  %v981_v39 = vld [vmem:[%s3913_s7 + $0xc0] sm:$0xff]  ;;  %v982_v40 = vld [vmem:[%s3913_s7 + $0xc8] sm:$0xff] }
  0xe6   :  { %v205_v60 = vmul.f32 %v3247_v9, %v162_v59  ;;  %v206_v61 = vmul.f32 %v3250_v10, %v162_v59  ;;  %633 = vmatmul.mubr.f32.gmra.mrb[24].mxu0 %v413_v55  ;;  %v386_v62 = vadd.f32 %v3267_v30, %v343_v53  ;;  %v385_v3 = vadd.f32 %v3264_v29, %v342_v52  ;;  %v959_v55 = vld [vmem:[%s3913_s7 + $0x10] sm:$0xff]  ;;  %v1565_v59 = vld [vmem:[#allocation2 + $0x48] sm:$0xff] }
  0xe7   :  { %638 = vmatprep.mubr.f32.mxu0 %v416_v56  ;;  %v3395_v53 = vpack.c.bf16 %v958_v47, %v957_v41  ;;  %v3397_v54 = vpack.c.bf16 %v976_v49, %v975_v48  ;;  %v960_v56 = vld [vmem:[%s3913_s7 + $0x18] sm:$0xff]  ;;  %2652 = vmatprep.subr.bf16.mxu0 %v3383_v46  ;;  %v1572_v49 = vld [vmem:[#allocation2 + $0x80] sm:$0xff] }
  0xe8   :  { %v344_v0 = vadd.f32 %v312_v57, %v205_v60  ;;  %v345_v1 = vadd.f32 %v313_v58, %v206_v61  ;;  %v418_v2 = vmax.f32 %v386_v62, 0.0  ;;  %v417_v7 = vmax.f32 %v385_v3, 0.0  ;;  %v977_v57 = vld [vmem:[%s3913_s7 + $0xa0] sm:$0xff]  ;;  %v1567_v60 = vld [vmem:[#allocation2 + $0x58] sm:$0xff]  ;;  %v978_v61 = vld [vmem:[%s3913_s7 + $0xa8] sm:$0xff] }
  0xe9   :  { %2654 = vmatpush3.bf16.msra.mxu0 %v3395_v53  ;;  %v3414_v62 = vpack.c.bf16 %v960_v56, %v959_v55  ;;  %v3417_v3 = vpack.c.bf16 %v978_v61, %v977_v57  ;;  %v2691_v13 = vpack.c.bf16 %v1567_v60, %v1565_v59  ;;  %v1574_v59 = vld [vmem:[#allocation2 + $0x90] sm:$0xff]  ;;  %v984_v61 = vld [vmem:[%s3913_s7 + $0xd8] sm:$0xff] }
  0xea   :  { %639 = vmatmul.mubr.f32.gmra.mrb[26].mxu0 %v415_v63  ;;  %v388_v6 = vadd.f32 %v3267_v30, %v345_v1  ;;  %v387_v11 = vadd.f32 %v3264_v29, %v344_v0  ;;  %v2689_v1 = vpack.c.bf16 %v1562_v38, %v1560_v37  ;;  %2656 = vmatprep.subr.bf16.mxu0 %v3397_v54  ;;  %v1570_v38 = vld [vmem:[#allocation2 + $0x70] sm:$0xff] }
  0xeb   :  { %644 = vmatprep.mubr.f32.mxu0 %v418_v2  ;;  %v1564_v2 = vld [vmem:[#allocation2 + $0x40] sm:$0xff]  ;;  %v2695_v37 = vpack.c.bf16 %v1571_v21, %v1569_v20  ;;  %v2697_v48 = vpack.c.bf16 %v1570_v38, %v1568_v28  ;;  %v983_v60 = vld [vmem:[%s3913_s7 + $0xd0] sm:$0xff]  ;;  %v986_v28 = vld [vmem:[%s3913_s7 + $0xe8] sm:$0xff] }
  0xec   :  { %v420_v8 = vmax.f32 %v388_v6, 0.0  ;;  %v419_v12 = vmax.f32 %v387_v11, 0.0  ;;  %v961_v6 = vld [vmem:[%s3913_s7 + $0x20] sm:$0xff] }
  0xed   :  { %2658 = vmatpush3.bf16.msra.mxu0 %v3414_v62  ;;  %v1580_v38 = vld [vmem:[#allocation2 + $0xc0] sm:$0xff] }
  0xee   :  { %645 = vmatmul.mubr.f32.gmra.mrb[28].mxu0 %v417_v7  ;;  %v962_v7 = vld [vmem:[%s3913_s7 + $0x28] sm:$0xff]  ;;  %2660 = vmatprep.subr.bf16.mxu0 %v3417_v3 }
  0xef   :  { %650 = vmatprep.mubr.f32.mxu0 %v420_v8  ;;  %v3434_v22 = vpack.c.bf16 %v962_v7, %v961_v6  ;;  %v3466_v6 = vpop.permute.xlu0 %1365 }
  0xf1   :  { %2662 = vmatpush3.bf16.msra.mxu0 %v3434_v22 }
  0xf2   :  { %651 = vmatmul.mubr.f32.gmra.mrb[30].mxu0 %v419_v12 }
 0x189   :  { %v562_v27 = vpop.f32.mrb[0].mxu0 }
 0x18a   :  { %v563_v31 = vadd.f32 %v562_v27, %v3367_v25  ;;  %v564_v32 = vpop.f32.mrb[1].mxu0  ;;  %v2693_v27 = vpack.c.bf16 %v1566_v14, %v1564_v2  ;;  %v967_v14 = vld [vmem:[%s3913_s7 + $0x50] sm:$0xff] }
 0x18b   :  { %v565_v36 = vadd.f32 %v564_v32, %v3370_v26  ;;  %v963_v32 = vld [vmem:[%s3913_s7 + $0x30] sm:$0xff] }
 0x18c   :  { %v657_v50 = vmax.f32 %v563_v31, 0.0  ;;  %v2663_v31 = vpack.c.bf16 %v980_v18, %v979_v15  ;;  %v968_v15 = vld [vmem:[%s3913_s7 + $0x58] sm:$0xff]  ;;  %v3474_v18 = vpop.permute.xlu1 %1254 }
 0x18d   :  { %v568_v42 = vpop.f32.mrb[2].mxu0  ;;  %v658_v43 = vmax.f32 %v565_v36, 0.0 }
 0x18e   :  { %v569_v51 = vadd.f32 %v568_v42, %v3367_v25  ;;  %v570_v52 = vpop.f32.mrb[3].mxu0  ;;  %v1573_v42 = vld [vmem:[#allocation2 + $0x88] sm:$0xff]  ;;  %2664 = vmatprep.subr.bf16.mxu0 %v2663_v31 }
 0x18f   :  { %v571_v58 = vadd.f32 %v570_v52, %v3370_v26  ;;  %828 = vmatprep.mubr.f32.mxu1 %v658_v43  ;;  %v1575_v43 = vld [vmem:[#allocation2 + $0x98] sm:$0xff]  ;;  %v966_v52 = vld [vmem:[%s3913_s7 + $0x48] sm:$0xff] }
 0x190   :  { %829 = vmatmul.mubr.f32.vlgmr.msra.gmra.mrb[0].mxu1 %v657_v50  ;;  %v659_v8 = vmax.f32 %v569_v51, 0.0  ;;  %v2667_v50 = vpack.c.bf16 %v982_v40, %v981_v39  ;;  %v965_v51 = vld [vmem:[%s3913_s7 + $0x40] sm:$0xff] }
 0x191   :  { %v660_v63 = vmax.f32 %v571_v58, 0.0  ;;  %2686 = vmatpush1.bf16.msra.mxu1 %v2685_v44  ;;  %v574_v0 = vpop.f32.mrb[4].mxu0  ;;  %v2665_v44 = vpack.c.bf16 %v964_v33, %v963_v32  ;;  %v2699_v58 = vpack.c.bf16 %v1575_v43, %v1573_v42  ;;  %v2669_v2 = vpack.c.bf16 %v966_v52, %v965_v51  ;;  %v1581_v32 = vld [vmem:[#allocation2 + $0xc8] sm:$0xff]  ;;  %v1583_v33 = vld [vmem:[#allocation2 + $0xd8] sm:$0xff]  ;;  %v969_v40 = vld [vmem:[%s3913_s7 + $0x60] sm:$0xff] }
 0x192   :  { %v575_v11 = vadd.f32 %v574_v0, %v3367_v25  ;;  %v576_v12 = vpop.f32.mrb[5].mxu0  ;;  %2688 = vmatprep.subr.bf16.mxu1 %v2687_v45  ;;  %v1577_v0 = vld [vmem:[#allocation2 + $0xa8] sm:$0xff] }
 0x193   :  { %v577_v19 = vadd.f32 %v576_v12, %v3370_v26  ;;  %834 = vmatprep.mubr.f32.mxu1 %v660_v63  ;;  %2666 = vmatpush3.bf16.msra.mxu0 %v2665_v44  ;;  %v1576_v12 = vld [vmem:[#allocation2 + $0xa0] sm:$0xff]  ;;  %v1585_v52 = vld [vmem:[#allocation2 + $0xe8] sm:$0xff] }
 0x194   :  { %835 = vmatmul.mubr.f32.gmra.mrb[2].mxu1 %v659_v8  ;;  %v661_v34 = vmax.f32 %v575_v11, 0.0  ;;  %v2701_v11 = vpack.c.bf16 %v1574_v59, %v1572_v49  ;;  %2668 = vmatprep.subr.bf16.mxu0 %v2667_v50  ;;  %v988_v49 = vld [vmem:[%s3913_s7 + $0xf8] sm:$0xff]  ;;  %v3497_v50 = vpop.permute.xlu0 %1369 }
 0x195   :  { %v662_v23 = vmax.f32 %v577_v19, 0.0  ;;  %2690 = vmatpush1.bf16.msra.mxu1 %v2689_v1  ;;  %v580_v24 = vpop.f32.mrb[6].mxu0  ;;  %v1579_v1 = vld [vmem:[#allocation2 + $0xb8] sm:$0xff] }
 0x196   :  { %v581_v35 = vadd.f32 %v580_v24, %v3367_v25  ;;  %v582_v36 = vpop.f32.mrb[7].mxu0  ;;  %2692 = vmatprep.subr.bf16.mxu1 %v2691_v13  ;;  %v2671_v13 = vpack.c.bf16 %v984_v61, %v983_v60  ;;  %v1578_v24 = vld [vmem:[#allocation2 + $0xb0] sm:$0xff] }
 0x197   :  { %v583_v41 = vadd.f32 %v582_v36, %v3370_v26  ;;  %840 = vmatprep.mubr.f32.mxu1 %v662_v23  ;;  %v2703_v23 = vpack.c.bf16 %v1579_v1, %v1577_v0  ;;  %2670 = vmatpush3.bf16.msra.mxu0 %v2669_v2  ;;  %v972_v0 = vld [vmem:[%s3913_s7 + $0x78] sm:$0xff] }
 0x198   :  { %841 = vmatmul.mubr.f32.gmra.mrb[4].mxu1 %v661_v34  ;;  %v663_v55 = vmax.f32 %v581_v35, 0.0  ;;  %v2673_v34 = vpack.c.bf16 %v968_v15, %v967_v14  ;;  %2672 = vmatprep.subr.bf16.mxu0 %v2671_v13  ;;  %v1589_v14 = vld [vmem:[#allocation2 + $0x108] sm:$0xff]  ;;  %v1591_v15 = vld [vmem:[#allocation2 + $0x118] sm:$0xff] }
 0x199   :  { %v664_v45 = vmax.f32 %v583_v41, 0.0  ;;  %2694 = vmatpush1.bf16.msra.mxu1 %v2693_v27  ;;  %v586_v47 = vpop.f32.mrb[8].mxu0  ;;  %v985_v27 = vld [vmem:[%s3913_s7 + $0xe0] sm:$0xff]  ;;  %v970_v41 = vld [vmem:[%s3913_s7 + $0x68] sm:$0xff] }
 0x19a   :  { %v587_v56 = vadd.f32 %v586_v47, %v3367_v25  ;;  %v588_v57 = vpop.f32.mrb[9].mxu0  ;;  %2696 = vmatprep.subr.bf16.mxu1 %v2695_v37  ;;  %v2705_v37 = vpack.c.bf16 %v1578_v24, %v1576_v12  ;;  %v2675_v39 = vpack.c.bf16 %v986_v28, %v985_v27  ;;  %v1582_v47 = vld [vmem:[#allocation2 + $0xd0] sm:$0xff] }
 0x19b   :  { %v589_v63 = vadd.f32 %v588_v57, %v3370_v26  ;;  %846 = vmatprep.mubr.f32.mxu1 %v664_v45  ;;  %v2707_v45 = vpack.c.bf16 %v1583_v33, %v1581_v32  ;;  %2674 = vmatpush3.bf16.msra.mxu0 %v2673_v34  ;;  %v2677_v57 = vpack.c.bf16 %v970_v41, %v969_v40  ;;  %v1586_v12 = vld [vmem:[#allocation2 + $0xf0] sm:$0xff]  ;;  %v1588_v34 = vld [vmem:[#allocation2 + $0x100] sm:$0xff] }
 0x19c   :  { %847 = vmatmul.mubr.f32.gmra.mrb[6].mxu1 %v663_v55  ;;  %v665_v19 = vmax.f32 %v587_v56, 0.0  ;;  %v1587_v55 = vld [vmem:[#allocation2 + $0xf8] sm:$0xff]  ;;  %v3500_v56 = vpop.permute.xlu1 %1259  ;;  %v2709_v60 = vpack.c.bf16 %v1582_v47, %v1580_v38  ;;  %2676 = vmatprep.subr.bf16.mxu0 %v2675_v39  ;;  %v2715_v33 = vpack.c.bf16 %v1591_v15, %v1589_v14  ;;  %v1592_v47 = vld [vmem:[#allocation2 + $0x120] sm:$0xff] }
 0x19d   :  { %v666_v7 = vmax.f32 %v589_v63, 0.0  ;;  %2698 = vmatpush1.bf16.msra.mxu1 %v2697_v48  ;;  %v592_v8 = vpop.f32.mrb[10].mxu0  ;;  %v987_v48 = vld [vmem:[%s3913_s7 + $0xf0] sm:$0xff]  ;;  %v1595_v38 = vld [vmem:[#allocation2 + $0x138] sm:$0xff] }
 0x19e   :  { %v593_v20 = vadd.f32 %v592_v8, %v3367_v25  ;;  %v594_v21 = vpop.f32.mrb[11].mxu0  ;;  %2700 = vmatprep.subr.bf16.mxu1 %v2699_v58  ;;  %v2679_v61 = vpack.c.bf16 %v988_v49, %v987_v48  ;;  %v971_v63 = vld [vmem:[%s3913_s7 + $0x70] sm:$0xff]  ;;  %v2711_v8 = vpack.c.bf16 %v1587_v55, %v1585_v52  ;;  %v1597_v52 = vld [vmem:[#allocation2 + $0x148] sm:$0xff]  ;;  %v1599_v55 = vld [vmem:[#allocation2 + $0x158] sm:$0xff] }
 0x19f   :  { %v595_v31 = vadd.f32 %v594_v21, %v3370_v26  ;;  %852 = vmatprep.mubr.f32.mxu1 %v666_v7  ;;  %2678 = vmatpush3.bf16.msra.mxu0 %v2677_v57  ;;  %v1594_v48 = vld [vmem:[#allocation2 + $0x130] sm:$0xff] }
 0x1a0   :  { %853 = vmatmul.mubr.f32.gmra.mrb[8].mxu1 %v665_v19  ;;  %v667_v42 = vmax.f32 %v593_v20, 0.0  ;;  %v2681_v19 = vpack.c.bf16 %v972_v0, %v971_v63  ;;  %v3510_v20 = vpop.permute.xlu0 %1373  ;;  %2680 = vmatprep.subr.bf16.mxu0 %v2679_v61  ;;  %v3512_v27 = vpop.permute.xlu1 %1264 }
 0x1a1   :  { %v668_v35 = vmax.f32 %v595_v31, 0.0  ;;  %2702 = vmatpush1.bf16.msra.mxu1 %v2701_v11  ;;  %v598_v36 = vpop.f32.mrb[12].mxu0  ;;  %v1584_v11 = vld [vmem:[#allocation2 + $0xe0] sm:$0xff] }
 0x1a2   :  { %v599_v43 = vadd.f32 %v598_v36, %v3367_v25  ;;  %v600_v44 = vpop.f32.mrb[13].mxu0  ;;  %2704 = vmatprep.subr.bf16.mxu1 %v2703_v23  ;;  %v2713_v24 = vpack.c.bf16 %v1586_v12, %v1584_v11  ;;  %v1601_v11 = vld [vmem:[#allocation2 + $0x168] sm:$0xff]  ;;  %v1603_v12 = vld [vmem:[#allocation2 + $0x178] sm:$0xff] }
 0x1a3   :  { %v601_v51 = vadd.f32 %v600_v44, %v3370_v26  ;;  %858 = vmatprep.mubr.f32.mxu1 %v668_v35  ;;  %v1590_v35 = vld [vmem:[#allocation2 + $0x110] sm:$0xff]  ;;  %2682 = vmatpush3.bf16.msra.mxu0 %v2681_v19 }
 0x1a4   :  { %859 = vmatmul.mubr.f32.gmra.mrb[10].mxu1 %v667_v42  ;;  %v669_v1 = vmax.f32 %v599_v43, 0.0  ;;  %v2717_v41 = vpack.c.bf16 %v1590_v35, %v1588_v34  ;;  %v3517_v49 = vpop.permute.xlu0 %1377  ;;  %v3520_v57 = vpop.permute.xlu1 %1269  ;;  %v1605_v35 = vld [vmem:[#allocation2 + $0x188] sm:$0xff] }
 0x1a5   :  { %v670_v58 = vmax.f32 %v601_v51, 0.0  ;;  %2706 = vmatpush1.bf16.msra.mxu1 %v2705_v37  ;;  %v604_v59 = vpop.f32.mrb[14].mxu0  ;;  %v1593_v37 = vld [vmem:[#allocation2 + $0x128] sm:$0xff] }
 0x1a6   :  { %v605_v2 = vadd.f32 %v604_v59, %v3367_v25  ;;  %v606_v7 = vpop.f32.mrb[15].mxu0  ;;  %2708 = vmatprep.subr.bf16.mxu1 %v2707_v45  ;;  %v2719_v45 = vpack.c.bf16 %v1595_v38, %v1593_v37 }
 0x1a7   :  { %v607_v13 = vadd.f32 %v606_v7, %v3370_v26  ;;  %864 = vmatprep.mubr.f32.mxu1 %v670_v58  ;;  %v1598_v7 = vld [vmem:[#allocation2 + $0x150] sm:$0xff] }
 0x1a8   :  { %865 = vmatmul.mubr.f32.gmra.mrb[12].mxu1 %v669_v1  ;;  %v671_v28 = vmax.f32 %v605_v2, 0.0  ;;  %v2723_v1 = vpack.c.bf16 %v1599_v55, %v1597_v52  ;;  %v1596_v2 = vld [vmem:[#allocation2 + $0x140] sm:$0xff]  ;;  %v1611_v52 = vld [vmem:[#allocation2 + $0x1b8] sm:$0xff] }
 0x1a9   :  { %v672_v21 = vmax.f32 %v607_v13, 0.0  ;;  %2710 = vmatpush1.bf16.msra.mxu1 %v2709_v60  ;;  %v610_v23 = vpop.f32.mrb[16].mxu0  ;;  %v2721_v60 = vpack.c.bf16 %v1594_v48, %v1592_v47  ;;  %v3524_v13 = vpop.permute.xlu0 %1381  ;;  %v2725_v19 = vpack.c.bf16 %v1598_v7, %v1596_v2 }
 0x1aa   :  { %v611_v31 = vadd.f32 %v610_v23, %v3367_v25  ;;  %v612_v32 = vpop.f32.mrb[17].mxu0  ;;  %2712 = vmatprep.subr.bf16.mxu1 %v2711_v8 }
 0x1ab   :  { %v613_v36 = vadd.f32 %v612_v32, %v3370_v26  ;;  %870 = vmatprep.mubr.f32.mxu1 %v672_v21  ;;  %v3526_v21 = vpop.permute.xlu1 %1274  ;;  %v1600_v32 = vld [vmem:[#allocation2 + $0x160] sm:$0xff] }
 0x1ac   :  { %871 = vmatmul.mubr.f32.gmra.mrb[14].mxu1 %v671_v28  ;;  %v673_v42 = vmax.f32 %v611_v31, 0.0  ;;  %v2727_v31 = vpack.c.bf16 %v1603_v12, %v1601_v11  ;;  %v1610_v11 = vld [vmem:[#allocation2 + $0x1b0] sm:$0xff] }
 0x1ad   :  { %v674_v39 = vmax.f32 %v613_v36, 0.0  ;;  %2714 = vmatpush1.bf16.msra.mxu1 %v2713_v24  ;;  %v616_v40 = vpop.f32.mrb[18].mxu0  ;;  %v1607_v36 = vld [vmem:[#allocation2 + $0x198] sm:$0xff]  ;;  %v3531_v47 = vpop.permute.xlu0 %1385 }
 0x1ae   :  { %v617_v43 = vadd.f32 %v616_v40, %v3367_v25  ;;  %v618_v44 = vpop.f32.mrb[19].mxu0  ;;  %2716 = vmatprep.subr.bf16.mxu1 %v2715_v33  ;;  %v1602_v33 = vld [vmem:[#allocation2 + $0x170] sm:$0xff] }
 0x1af   :  { %v619_v51 = vadd.f32 %v618_v44, %v3370_v26  ;;  %876 = vmatprep.mubr.f32.mxu1 %v674_v39  ;;  %v2729_v39 = vpack.c.bf16 %v1602_v33, %v1600_v32  ;;  %v1604_v44 = vld [vmem:[#allocation2 + $0x180] sm:$0xff]  ;;  %v3534_v55 = vpop.permute.xlu1 %1279 }
 0x1b0   :  { %877 = vmatmul.mubr.f32.gmra.mrb[16].mxu1 %v673_v42  ;;  %v675_v61 = vmax.f32 %v617_v43, 0.0  ;;  %v2731_v43 = vpack.c.bf16 %v1607_v36, %v1605_v35 }
 0x1b1   :  { %v676_v58 = vmax.f32 %v619_v51, 0.0  ;;  %2718 = vmatpush1.bf16.msra.mxu1 %v2717_v41  ;;  %v622_v59 = vpop.f32.mrb[20].mxu0  ;;  %v1609_v51 = vld [vmem:[#allocation2 + $0x1a8] sm:$0xff] }
 0x1b2   :  { %v623_v63 = vadd.f32 %v622_v59, %v3367_v25  ;;  %v624_v0 = vpop.f32.mrb[21].mxu0  ;;  %2720 = vmatprep.subr.bf16.mxu1 %v2719_v45  ;;  %v1606_v45 = vld [vmem:[#allocation2 + $0x190] sm:$0xff]  ;;  %v2735_v7 = vpack.c.bf16 %v1611_v52, %v1609_v51 }
 0x1b3   :  { %v625_v8 = vadd.f32 %v624_v0, %v3370_v26  ;;  %882 = vmatprep.mubr.f32.mxu1 %v676_v58  ;;  %v1429_v58 = vmul.f32 %v3466_v6, %v3259_v17 }
 0x1b4   :  { %883 = vmatmul.mubr.f32.gmra.mrb[18].mxu1 %v675_v61  ;;  %v677_v23 = vmax.f32 %v623_v63, 0.0  ;;  %v2733_v61 = vpack.c.bf16 %v1606_v45, %v1604_v44  ;;  %v1333_v63 = vmul.f32 %v3474_v18, %v3250_v10  ;;  %v1430_v45 = vmul.f32 %v3497_v50, %v3256_v16 }
 0x1b5   :  { %v678_v14 = vmax.f32 %v625_v8, 0.0  ;;  %2722 = vmatpush1.bf16.msra.mxu1 %v2721_v60  ;;  %v628_v15 = vpop.f32.mrb[22].mxu0  ;;  %v1608_v8 = vld [vmem:[#allocation2 + $0x1a0] sm:$0xff] }
 0x1b6   :  { %v629_v24 = vadd.f32 %v628_v15, %v3367_v25  ;;  %v630_v28 = vpop.f32.mrb[23].mxu0  ;;  %2724 = vmatprep.subr.bf16.mxu1 %v2723_v1  ;;  %v1615_v15 = vld [vmem:[#allocation2 + $0x1d8] sm:$0xff]  ;;  %v2737_v32 = vpack.c.bf16 %v1610_v11, %v1608_v8  ;;  %v1461_v33 = vadd.f32 %v1429_v58, %v1333_v63 }
 0x1b7   :  { %v631_v34 = vadd.f32 %v630_v28, %v3370_v26  ;;  %888 = vmatprep.mubr.f32.mxu1 %v678_v14  ;;  %v1613_v14 = vld [vmem:[#allocation2 + $0x1c8] sm:$0xff] }
 0x1b8   :  { %889 = vmatmul.mubr.f32.gmra.mrb[20].mxu1 %v677_v23  ;;  %v679_v40 = vmax.f32 %v629_v24, 0.0  ;;  %v1332_v23 = vmul.f32 %v3474_v18, %v3247_v9  ;;  %v3546_v24 = vpop.permute.xlu0 %1389  ;;  %v1431_v18 = vmul.f32 %v3497_v50, %v3259_v17  ;;  %v1433_v50 = vmul.f32 %v3510_v20, %v3259_v17 }
 0x1b9   :  { %v680_v37 = vmax.f32 %v631_v34, 0.0  ;;  %2726 = vmatpush1.bf16.msra.mxu1 %v2725_v19  ;;  %v634_v38 = vpop.f32.mrb[24].mxu0  ;;  %v1428_v19 = vmul.f32 %v3466_v6, %v3256_v16  ;;  %v3548_v34 = vpop.permute.xlu1 %1284  ;;  %v1612_v6 = vld [vmem:[#allocation2 + $0x1c0] sm:$0xff] }
 0x1ba   :  { %v635_v41 = vadd.f32 %v634_v38, %v3367_v25  ;;  %v636_v42 = vpop.f32.mrb[25].mxu0  ;;  %2728 = vmatprep.subr.bf16.mxu1 %v2727_v31  ;;  %v2739_v38 = vpack.c.bf16 %v1615_v15, %v1613_v14 }
 0x1bb   :  { %v637_v48 = vadd.f32 %v636_v42, %v3370_v26  ;;  %894 = vmatprep.mubr.f32.mxu1 %v680_v37  ;;  %v1617_v42 = vld [vmem:[#allocation2 + $0x1e8] sm:$0xff]  ;;  %v1460_v44 = vadd.f32 %v1428_v19, %v1332_v23 }
 0x1bc   :  { %895 = vmatmul.mubr.f32.gmra.mrb[22].mxu1 %v679_v40  ;;  %v681_v0 = vmax.f32 %v635_v41, 0.0  ;;  %v1335_v40 = vmul.f32 %v3500_v56, %v3250_v10  ;;  %v3567_v11 = vpop.permute.xlu0 %1393 }
 0x1bd   :  { %v682_v59 = vmax.f32 %v637_v48, 0.0  ;;  %2730 = vmatpush1.bf16.msra.mxu1 %v2729_v39  ;;  %v640_v60 = vpop.f32.mrb[26].mxu0  ;;  %v1614_v39 = vld [vmem:[#allocation2 + $0x1d0] sm:$0xff]  ;;  %v1334_v48 = vmul.f32 %v3500_v56, %v3247_v9  ;;  %v1337_v56 = vmul.f32 %v3512_v27, %v3250_v10  ;;  %v1492_v14 = vadd.f32 %v1460_v44, %v3264_v29 }
 0x1be   :  { %v641_v1 = vadd.f32 %v640_v60, %v3367_v25  ;;  %v642_v2 = vpop.f32.mrb[27].mxu0  ;;  %2732 = vmatprep.subr.bf16.mxu1 %v2731_v43  ;;  %v1619_v43 = vld [vmem:[#allocation2 + $0x1f8] sm:$0xff]  ;;  %v2741_v58 = vpack.c.bf16 %v1614_v39, %v1612_v6 }
 0x1bf   :  { %v643_v12 = vadd.f32 %v642_v2, %v3370_v26  ;;  %900 = vmatprep.mubr.f32.mxu1 %v682_v59  ;;  %v2743_v63 = vpack.c.bf16 %v1619_v43, %v1617_v42  ;;  %v1493_v2 = vadd.f32 %v1461_v33, %v3267_v30  ;;  %v1462_v15 = vadd.f32 %v1430_v45, %v1334_v48 }
 0x1c0   :  { %901 = vmatmul.mubr.f32.gmra.mrb[24].mxu1 %v681_v0  ;;  %v683_v35 = vmax.f32 %v641_v1, 0.0  ;;  %v1616_v0 = vld [vmem:[#allocation2 + $0x1e0] sm:$0xff]  ;;  %v1618_v1 = vld [vmem:[#allocation2 + $0x1f0] sm:$0xff]  ;;  %v1524_v6 = vmax.f32 %v1492_v14, 0.0  ;;  %v1436_v48 = vmul.f32 %v3524_v13, %v3256_v16 }
 0x1c1   :  { %v684_v28 = vmax.f32 %v643_v12, 0.0  ;;  %2734 = vmatpush1.bf16.msra.mxu1 %v2733_v61  ;;  %v646_v31 = vpop.f32.mrb[28].mxu0  ;;  %v3569_v12 = vpop.permute.xlu1 %1289  ;;  %v2745_v23 = vpack.c.bf16 %v1618_v1, %v1616_v0  ;;  %v1525_v33 = vmax.f32 %v1493_v2, 0.0  ;;  %v1494_v43 = vadd.f32 %v1462_v15, %v3264_v29 }
 0x1c2   :  { %v647_v36 = vadd.f32 %v646_v31, %v3367_v25  ;;  %v648_v37 = vpop.f32.mrb[29].mxu0  ;;  %2736 = vmatprep.subr.bf16.mxu1 %v2735_v7  ;;  %v1463_v7 = vadd.f32 %v1431_v18, %v1335_v40  ;;  %v1336_v31 = vmul.f32 %v3512_v27, %v3247_v9  ;;  %v1338_v27 = vmul.f32 %v3520_v57, %v3247_v9 }
 0x1c3   :  { %v649_v41 = vadd.f32 %v648_v37, %v3370_v26  ;;  %906 = vmatprep.mubr.f32.mxu1 %v684_v28  ;;  %v1432_v28 = vmul.f32 %v3510_v20, %v3256_v16  ;;  %v1339_v37 = vmul.f32 %v3520_v57, %v3250_v10  ;;  %v1434_v20 = vmul.f32 %v3517_v49, %v3256_v16 }
 0x1c4   :  { %907 = vmatmul.mubr.f32.gmra.mrb[26].mxu1 %v683_v35  ;;  %v685_v59 = vmax.f32 %v647_v36, 0.0  ;;  %v1465_v35 = vadd.f32 %v1433_v50, %v1337_v56  ;;  %v1435_v36 = vmul.f32 %v3517_v49, %v3259_v17  ;;  %v1437_v18 = vmul.f32 %v3524_v13, %v3259_v17 }
 0x1c5   :  { %v686_v51 = vmax.f32 %v649_v41, 0.0  ;;  %2738 = vmatpush1.bf16.msra.mxu1 %v2737_v32  ;;  %v652_v52 = vpop.f32.mrb[30].mxu0  ;;  %v1464_v39 = vadd.f32 %v1432_v28, %v1336_v31  ;;  %v1341_v40 = vmul.f32 %v3526_v21, %v3250_v10  ;;  %v3589_v41 = vpop.permute.xlu0 %1397  ;;  %v1466_v45 = vadd.f32 %v1434_v20, %v1338_v27 }
 0x1c6   :  { %v653_v60 = vadd.f32 %v652_v52, %v3367_v25  ;;  %v654_v61 = vpop.f32.mrb[31].mxu0  ;;  %2740 = vmatprep.subr.bf16.mxu1 %v2739_v38  ;;  %v1495_v38 = vadd.f32 %v1463_v7, %v3267_v30  ;;  %v3591_v42 = vpop.permute.xlu1 %1294  ;;  %v1467_v49 = vadd.f32 %v1435_v36, %v1339_v37  ;;  %v1497_v57 = vadd.f32 %v1465_v35, %v3267_v30 }
 0x1c7   :  { %v655_v8 = vadd.f32 %v654_v61, %v3370_v26  ;;  %912 = vmatprep.mubr.f32.mxu1 %v686_v51  ;;  %v1340_v51 = vmul.f32 %v3526_v21, %v3247_v9  ;;  %v1469_v52 = vadd.f32 %v1437_v18, %v1341_v40  ;;  %v1342_v1 = vmul.f32 %v3534_v55, %v3247_v9 }
 0x1c8   :  { %913 = vmatmul.mubr.f32.gmra.mrb[28].mxu1 %v685_v59  ;;  %v687_v32 = vmax.f32 %v653_v60, 0.0  ;;  %v1527_v44 = vmax.f32 %v1495_v38, 0.0  ;;  %v1496_v59 = vadd.f32 %v1464_v39, %v3264_v29  ;;  %v1343_v60 = vmul.f32 %v3534_v55, %v3250_v10 }
 0x1c9   :  { %v688_v19 = vmax.f32 %v655_v8, 0.0  ;;  %2742 = vmatpush1.bf16.msra.mxu1 %v2741_v58  ;;  %v1526_v58 = vmax.f32 %v1494_v43, 0.0  ;;  %v1529_v61 = vmax.f32 %v1497_v57, 0.0  ;;  %v1499_v13 = vadd.f32 %v1467_v49, %v3267_v30 }
 0x1ca   :  { %2744 = vmatprep.subr.bf16.mxu1 %v2743_v63  ;;  %v1402_v63 = vpop.permute.xlu0 %1401  ;;  %v1300_v21 = vpop.permute.xlu1 %1299  ;;  %v1468_v0 = vadd.f32 %v1436_v48, %v1340_v51  ;;  %v1528_v2 = vmax.f32 %v1496_v59, 0.0  ;;  %v1501_v7 = vadd.f32 %v1469_v52, %v3267_v30  ;;  %v1441_v56 = vmul.f32 %v3546_v24, %v3259_v17 }
 0x1cb   :  { %918 = vmatprep.mubr.f32.mxu1 %v688_v19  ;;  %v1345_v8 = vmul.f32 %v3548_v34, %v3250_v10  ;;  %v1531_v14 = vmax.f32 %v1499_v13, 0.0  ;;  %v1440_v15 = vmul.f32 %v3546_v24, %v3256_v16  ;;  %v1346_v24 = vmul.f32 %v3569_v12, %v3247_v9 }
 0x1cc   :  { %919 = vmatmul.mubr.f32.gmra.mrb[30].mxu1 %v687_v32  ;;  %v1533_v28 = vmax.f32 %v1501_v7, 0.0  ;;  %v1443_v32 = vmul.f32 %v3567_v11, %v3259_v17  ;;  %v1445_v37 = vmul.f32 %v3589_v41, %v3259_v17  ;;  %v1349_v38 = vmul.f32 %v3591_v42, %v3250_v10  ;;  %v1816_v7 = vld [vmem:[#allocation5 + $0x18] sm:$0xff] }
 0x1cd   :  { %2746 = vmatpush1.bf16.msra.mxu1 %v2745_v23  ;;  %1684 = vmatprep.mubr.f32.mxu1 %v1525_v33  ;;  %v1473_v31 = vadd.f32 %v1441_v56, %v1345_v8  ;;  %v1347_v33 = vmul.f32 %v3569_v12, %v3250_v10  ;;  %v1444_v12 = vmul.f32 %v3589_v41, %v3256_v16 }
 0x1ce   :  { %2812 = vmatprep.subr.bf16.mxu1 %v3383_v46  ;;  %v1439_v46 = vmul.f32 %v3531_v47, %v3259_v17  ;;  %v1406_v19 = vpop.permute.xlu0 %1405  ;;  %v1305_v23 = vpop.permute.xlu1 %1304  ;;  %v1348_v43 = vmul.f32 %v3591_v42, %v3247_v9  ;;  %v1477_v49 = vadd.f32 %v1445_v37, %v1349_v38  ;;  %v1351_v48 = vmul.f32 %v1300_v21, %v3250_v10 }
 0x1cf   :  { %v1475_v20 = vadd.f32 %v1443_v32, %v1347_v33  ;;  %v1505_v39 = vadd.f32 %v1473_v31, %v3267_v30  ;;  %v1446_v59 = vmul.f32 %v1402_v63, %v3256_v16  ;;  %v1350_v42 = vmul.f32 %v1300_v21, %v3247_v9 }
 0x1d0   :  { %1685 = vmatmul.mubr.f32.vlgmr.msra.gmra.mrb[32].mxu1 %v1524_v6  ;;  %v1471_v50 = vadd.f32 %v1439_v46, %v1343_v60  ;;  %v1509_v13 = vadd.f32 %v1477_v49, %v3267_v30  ;;  %v1448_v8 = vmul.f32 %v1406_v19, %v3256_v16 }
 0x1d1   :  { %1690 = vmatprep.mubr.f32.mxu1 %v1527_v44  ;;  %2814 = vmatpush3.bf16.msra.mxu1 %v3395_v53  ;;  %v1498_v53 = vadd.f32 %v1466_v45, %v3264_v29  ;;  %v1447_v45 = vmul.f32 %v1402_v63, %v3259_v17  ;;  %v1537_v51 = vmax.f32 %v1505_v39, 0.0  ;;  %v1507_v52 = vadd.f32 %v1475_v20, %v3267_v30 }
 0x1d2   :  { %2816 = vmatprep.subr.bf16.mxu1 %v3397_v54  ;;  %v1438_v54 = vmul.f32 %v3531_v47, %v3256_v16  ;;  %v1500_v47 = vadd.f32 %v1468_v0, %v3264_v29  ;;  %v1503_v35 = vadd.f32 %v1471_v50, %v3267_v30  ;;  %v1410_v18 = vpop.permute.xlu0 %1409  ;;  %v1478_v21 = vadd.f32 %v1446_v59, %v1350_v42 }
 0x1d3   :  { %v1479_v0 = vadd.f32 %v1447_v45, %v1351_v48  ;;  %v1450_v32 = vmul.f32 %v1410_v18, %v3256_v16 }
 0x1d4   :  { %1691 = vmatmul.mubr.f32.gmra.mrb[34].mxu1 %v1526_v58  ;;  %v1470_v55 = vadd.f32 %v1438_v54, %v1342_v1  ;;  %v1535_v27 = vmax.f32 %v1503_v35, 0.0  ;;  %v1476_v58 = vadd.f32 %v1444_v12, %v1348_v43  ;;  %v1353_v54 = vmul.f32 %v1305_v23, %v3250_v10 }
 0x1d5   :  { %1696 = vmatprep.mubr.f32.mxu1 %v1529_v61  ;;  %2818 = vmatpush3.bf16.msra.mxu1 %v3414_v62  ;;  %v1530_v62 = vmax.f32 %v1498_v53, 0.0  ;;  %v1449_v53 = vmul.f32 %v1406_v19, %v3259_v17  ;;  %v1539_v1 = vmax.f32 %v1507_v52, 0.0 }
 0x1d6   :  { %2820 = vmatprep.subr.bf16.mxu1 %v3417_v3  ;;  %v1344_v3 = vmul.f32 %v3548_v34, %v3247_v9  ;;  %v1532_v34 = vmax.f32 %v1500_v47, 0.0  ;;  %v1502_v6 = vadd.f32 %v1470_v55, %v3264_v29  ;;  %v1414_v46 = vpop.permute.xlu0 %1413  ;;  %v1508_v63 = vadd.f32 %v1476_v58, %v3264_v29 }
 0x1d7   :  { %v1481_v47 = vadd.f32 %v1449_v53, %v1353_v54  ;;  %v1451_v55 = vmul.f32 %v1410_v18, %v3259_v17 }
 0x1d8   :  { %1697 = vmatmul.mubr.f32.gmra.mrb[36].mxu1 %v1528_v2  ;;  %v1472_v36 = vadd.f32 %v1440_v15, %v1344_v3  ;;  %v1534_v44 = vmax.f32 %v1502_v6, 0.0  ;;  %v1814_v2 = vld [vmem:[#allocation5 + $0x8] sm:$0xff]  ;;  %v1511_v3 = vadd.f32 %v1479_v0, %v3267_v30  ;;  %v1540_v19 = vmax.f32 %v1508_v63, 0.0 }
 0x1d9   :  { %1702 = vmatprep.mubr.f32.mxu1 %v1531_v14  ;;  %2822 = vmatpush3.bf16.msra.mxu1 %v3434_v22  ;;  %v1442_v22 = vmul.f32 %v3567_v11, %v3256_v16  ;;  %v1310_v11 = vpop.permute.xlu1 %1309  ;;  %v2747_v56 = vpack.c.bf16 %v1816_v7, %v1814_v2  ;;  %v1352_v14 = vmul.f32 %v1305_v23, %v3247_v9 }
 0x1da   :  { %v1504_v57 = vadd.f32 %v1472_v36, %v3264_v29  ;;  %v1355_v15 = vmul.f32 %v1310_v11, %v3250_v10  ;;  %v1354_v33 = vmul.f32 %v1310_v11, %v3247_v9  ;;  %v1453_v23 = vmul.f32 %v1414_v46, %v3259_v17 }
 0x1db   :  { %v1474_v40 = vadd.f32 %v1442_v22, %v1346_v24  ;;  %2748 = vmatprep.subr.bf16.mxu0 %v2747_v56  ;;  %v1480_v35 = vadd.f32 %v1448_v8, %v1352_v14  ;;  %v1510_v24 = vadd.f32 %v1478_v21, %v3264_v29  ;;  %v1543_v36 = vmax.f32 %v1511_v3, 0.0 }
 0x1dc   :  { %1703 = vmatmul.mubr.f32.gmra.mrb[38].mxu1 %v1530_v62  ;;  %v1536_v61 = vmax.f32 %v1504_v57, 0.0  ;;  %v1541_v62 = vmax.f32 %v1509_v13, 0.0  ;;  %v1513_v37 = vadd.f32 %v1481_v47, %v3267_v30  ;;  %v1482_v38 = vadd.f32 %v1450_v32, %v1354_v33 }
 0x1dd   :  { %1708 = vmatprep.mubr.f32.mxu1 %v1533_v28  ;;  %v1506_v41 = vadd.f32 %v1474_v40, %v3264_v29  ;;  %v1315_v60 = vpop.permute.xlu1 %1314  ;;  %v1418_v28 = vpop.permute.xlu0 %1417  ;;  %v1452_v6 = vmul.f32 %v1414_v46, %v3256_v16  ;;  %v1542_v11 = vmax.f32 %v1510_v24, 0.0  ;;  %v1512_v40 = vadd.f32 %v1480_v35, %v3264_v29  ;;  %v63_v35 = vld [vmem:[%s3912_s6] sm:$0x3] }
 0x1de   :  { %v1357_v22 = vmul.f32 %v1315_v60, %v3250_v10  ;;  %v1356_v20 = vmul.f32 %v1315_v60, %v3247_v9  ;;  %v1455_v12 = vmul.f32 %v1418_v28, %v3259_v17  ;;  %v1545_v49 = vmax.f32 %v1513_v37, 0.0 }
 0x1df   :  { %v1538_v50 = vmax.f32 %v1506_v41, 0.0  ;;  %v1514_v45 = vadd.f32 %v1482_v38, %v3264_v29  ;;  %v1454_v48 = vmul.f32 %v1418_v28, %v3256_v16  ;;  %v1544_v52 = vmax.f32 %v1512_v40, 0.0  ;;  %v1818_v38 = vld [vmem:[#allocation5 + $0x28] sm:$0xff] }
 0x1e0   :  { %1709 = vmatmul.mubr.f32.gmra.mrb[40].mxu1 %v1532_v34  ;;  %v1483_v34 = vadd.f32 %v1451_v55, %v1355_v15  ;;  %v1484_v57 = vadd.f32 %v1452_v6, %v1356_v20  ;;  %v1820_v6 = vld [vmem:[#allocation5 + $0x38] sm:$0xff] }
 0x1e1   :  { %1714 = vmatprep.mubr.f32.mxu1 %v1535_v27  ;;  %v1320_v31 = vpop.permute.xlu1 %1319  ;;  %v1485_v27 = vadd.f32 %v1453_v23, %v1357_v22  ;;  %v1422_v39 = vpop.permute.xlu0 %1421  ;;  %v1546_v13 = vmax.f32 %v1514_v45, 0.0  ;;  %v3696_v23 = vrot.slane %v63_v35, %v3236_v4  ;;  %v3699_v22 = vrot.slane %v63_v35, %v3238_v5  ;;  %v1817_v5 = vld [vmem:[#allocation5 + $0x20] sm:$0xff] }
 0x1e2   :  { %v1359_v43 = vmul.f32 %v1320_v31, %v3250_v10  ;;  %v1457_v59 = vmul.f32 %v1422_v39, %v3259_v17  ;;  %v1516_v0 = vadd.f32 %v1484_v57, %v3264_v29  ;;  %v1456_v54 = vmul.f32 %v1422_v39, %v3256_v16 }
 0x1e3   :  { %v1517_v58 = vadd.f32 %v1485_v27, %v3267_v30  ;;  %v2751_v40 = vpack.c.bf16 %v1820_v6, %v1818_v38  ;;  %v1838_v38 = vld [vmem:[#allocation5 + $0xc8] sm:$0xff]  ;;  %v1840_v6 = vld [vmem:[#allocation5 + $0xd8] sm:$0xff] }
 0x1e4   :  { %1715 = vmatmul.mubr.f32.gmra.mrb[42].mxu1 %v1534_v44  ;;  %v1515_v44 = vadd.f32 %v1483_v34, %v3267_v30  ;;  %v1487_v41 = vadd.f32 %v1455_v12, %v1359_v43  ;;  %v1548_v21 = vmax.f32 %v1516_v0, 0.0  ;;  %v1819_v12 = vld [vmem:[#allocation5 + $0x30] sm:$0xff] }
 0x1e5   :  { %1720 = vmatprep.mubr.f32.mxu1 %v1537_v51  ;;  %v1325_v18 = vpop.permute.xlu1 %1324  ;;  %v1358_v51 = vmul.f32 %v1320_v31, %v3247_v9  ;;  %v1426_v60 = vpop.permute.xlu0 %1425  ;;  %v1549_v2 = vmax.f32 %v1517_v58, 0.0 }
 0x1e6   :  { %v1361_v42 = vmul.f32 %v1325_v18, %v3250_v10  ;;  %v1547_v46 = vmax.f32 %v1515_v44, 0.0  ;;  %v1519_v56 = vadd.f32 %v1487_v41, %v3267_v30  ;;  %v1458_v14 = vmul.f32 %v1426_v60, %v3256_v16  ;;  %v1824_v44 = vld [vmem:[#allocation5 + $0x58] sm:$0xff] }
 0x1e7   :  { %v1486_v53 = vadd.f32 %v1454_v48, %v1358_v51  ;;  %v2753_v48 = vpack.c.bf16 %v1819_v12, %v1817_v5  ;;  %v1837_v5 = vld [vmem:[#allocation5 + $0xc0] sm:$0xff]  ;;  %v1839_v12 = vld [vmem:[#allocation5 + $0xd0] sm:$0xff] }
 0x1e8   :  { %1721 = vmatmul.mubr.f32.gmra.mrb[44].mxu1 %v1536_v61  ;;  %v1489_v7 = vadd.f32 %v1457_v59, %v1361_v42  ;;  %v1551_v15 = vmax.f32 %v1519_v56, 0.0  ;;  %v1821_v59 = vld [vmem:[#allocation5 + $0x40] sm:$0xff]  ;;  %v1823_v42 = vld [vmem:[#allocation5 + $0x50] sm:$0xff] }
 0x1e9   :  { %1726 = vmatprep.mubr.f32.mxu1 %v1539_v1  ;;  %v1330_v61 = vpop.permute.xlu1 %1329  ;;  %v1360_v1 = vmul.f32 %v1325_v18, %v3247_v9  ;;  %v1518_v47 = vadd.f32 %v1486_v53, %v3264_v29  ;;  %v2757_v53 = vpack.c.bf16 %v1823_v42, %v1821_v59  ;;  %v1841_v59 = vld [vmem:[#allocation5 + $0xe0] sm:$0xff]  ;;  %v1843_v42 = vld [vmem:[#allocation5 + $0xf0] sm:$0xff] }
 0x1ea   :  { %v1363_v63 = vmul.f32 %v1330_v61, %v3250_v10  ;;  %v1521_v3 = vadd.f32 %v1489_v7, %v3267_v30 }
 0x1eb   :  { %v1488_v8 = vadd.f32 %v1456_v54, %v1360_v1  ;;  %v1550_v10 = vmax.f32 %v1518_v47, 0.0 }
 0x1ec   :  { %1727 = vmatmul.mubr.f32.gmra.mrb[46].mxu1 %v1538_v50  ;;  %v1459_v50 = vmul.f32 %v1426_v60, %v3259_v17  ;;  %v1553_v31 = vmax.f32 %v1521_v3, 0.0  ;;  %v1826_v60 = vld [vmem:[#allocation5 + $0x68] sm:$0xff] }
 0x1ed   :  { %1732 = vmatprep.mubr.f32.mxu1 %v1541_v62  ;;  %v1362_v62 = vmul.f32 %v1330_v61, %v3247_v9  ;;  %v1520_v28 = vadd.f32 %v1488_v8, %v3264_v29  ;;  %v1828_v61 = vld [vmem:[#allocation5 + $0x78] sm:$0xff] }
 0x1ee   :  { %v1491_v55 = vadd.f32 %v1459_v50, %v1363_v63  ;;  %v2759_v7 = vpack.c.bf16 %v1828_v61, %v1826_v60  ;;  %v1825_v50 = vld [vmem:[#allocation5 + $0x60] sm:$0xff]  ;;  %v1827_v63 = vld [vmem:[#allocation5 + $0x70] sm:$0xff]  ;;  %v1832_v8 = vld [vmem:[#allocation5 + $0x98] sm:$0xff] }
 0x1ef   :  { %v1490_v17 = vadd.f32 %v1458_v14, %v1362_v62  ;;  %v1552_v16 = vmax.f32 %v1520_v28, 0.0  ;;  %v2761_v47 = vpack.c.bf16 %v1827_v63, %v1825_v50  ;;  %v1831_v28 = vld [vmem:[#allocation5 + $0x90] sm:$0xff]  ;;  %v1846_v60 = vld [vmem:[#allocation5 + $0x108] sm:$0xff]  ;;  %v1848_v61 = vld [vmem:[#allocation5 + $0x118] sm:$0xff] }
 0x1f0   :  { %1733 = vmatmul.mubr.f32.gmra.mrb[48].mxu1 %v1540_v19  ;;  %v1523_v32 = vadd.f32 %v1491_v55, %v3267_v30  ;;  %v1845_v50 = vld [vmem:[#allocation5 + $0x100] sm:$0xff]  ;;  %v1847_v63 = vld [vmem:[#allocation5 + $0x110] sm:$0xff] }
 0x1f1   :  { %1738 = vmatprep.mubr.f32.mxu1 %v1543_v36  ;;  %v1522_v9 = vadd.f32 %v1490_v17, %v3264_v29  ;;  %v1813_v29 = vld [vmem:[#allocation5] sm:$0xff]  ;;  %v1815_v36 = vld [vmem:[#allocation5 + $0x10] sm:$0xff] }
 0x1f2   :  { %v1555_v33 = vmax.f32 %v1523_v32, 0.0  ;;  %v2749_v39 = vpack.c.bf16 %v1815_v36, %v1813_v29  ;;  %v1834_v32 = vld [vmem:[#allocation5 + $0xa8] sm:$0xff]  ;;  %v1833_v29 = vld [vmem:[#allocation5 + $0xa0] sm:$0xff]  ;;  %v1835_v36 = vld [vmem:[#allocation5 + $0xb0] sm:$0xff] }
 0x1f3   :  { %v1554_v19 = vmax.f32 %v1522_v9, 0.0 }
 0x1f4   :  { %1739 = vmatmul.mubr.f32.gmra.mrb[50].mxu1 %v1542_v11 }
 0x1f5   :  { %1744 = vmatprep.mubr.f32.mxu1 %v1545_v49  ;;  %v1822_v49 = vld [vmem:[#allocation5 + $0x48] sm:$0xff] }
 0x1f6   :  { %v2755_v41 = vpack.c.bf16 %v1824_v44, %v1822_v49  ;;  %v1842_v49 = vld [vmem:[#allocation5 + $0xe8] sm:$0xff]  ;;  %v1844_v44 = vld [vmem:[#allocation5 + $0xf8] sm:$0xff] }
 0x1f8   :  { %1745 = vmatmul.mubr.f32.gmra.mrb[52].mxu1 %v1544_v52 }
 0x1f9   :  { %1750 = vmatprep.mubr.f32.mxu1 %v1547_v46 }
 0x1fc   :  { %1751 = vmatmul.mubr.f32.gmra.mrb[54].mxu1 %v1546_v13 }
 0x1fd   :  { %1756 = vmatprep.mubr.f32.mxu1 %v1549_v2 }
 0x200   :  { %1757 = vmatmul.mubr.f32.gmra.mrb[56].mxu1 %v1548_v21  ;;  %v1830_v21 = vld [vmem:[#allocation5 + $0x88] sm:$0xff] }
 0x201   :  { %1762 = vmatprep.mubr.f32.mxu1 %v1551_v15  ;;  %v2763_v17 = vpack.c.bf16 %v1832_v8, %v1830_v21  ;;  %v1850_v21 = vld [vmem:[#allocation5 + $0x128] sm:$0xff]  ;;  %v1852_v8 = vld [vmem:[#allocation5 + $0x138] sm:$0xff] }
 0x204   :  { %1763 = vmatmul.mubr.f32.gmra.mrb[58].mxu1 %v1550_v10  ;;  %v1829_v10 = vld [vmem:[#allocation5 + $0x80] sm:$0xff] }
 0x205   :  { %1768 = vmatprep.mubr.f32.mxu1 %v1553_v31 }
 0x208   :  { %1769 = vmatmul.mubr.f32.gmra.mrb[60].mxu1 %v1552_v16  ;;  %v1836_v16 = vld [vmem:[#allocation5 + $0xb8] sm:$0xff] }
 0x209   :  { %1774 = vmatprep.mubr.f32.mxu1 %v1555_v33 }
 0x20c   :  { %1775 = vmatmul.mubr.f32.gmra.mrb[62].mxu1 %v1554_v19  ;;  %v2765_v19 = vpack.c.bf16 %v1831_v28, %v1829_v10  ;;  %v1849_v10 = vld [vmem:[#allocation5 + $0x120] sm:$0xff]  ;;  %v1851_v28 = vld [vmem:[#allocation5 + $0x130] sm:$0xff] }
 0x263   :  { %v830_v30 = vpop.f32.mrb[0].mxu1 }
 0x264   :  { %v831_v24 = vadd.f32 %v830_v30, %v3696_v23  ;;  %v832_v34 = vpop.f32.mrb[1].mxu1 }
 0x265   :  { %v833_v37 = vadd.f32 %v832_v34, %v3699_v22  ;;  %v2767_v34 = vpack.c.bf16 %v1836_v16, %v1834_v32  ;;  %v1854_v32 = vld [vmem:[#allocation5 + $0x148] sm:$0xff]  ;;  %v1856_v16 = vld [vmem:[#allocation5 + $0x158] sm:$0xff] }
 0x266   :  { %v925_v18 = vmax.f32 %v831_v24, 0.0 }
 0x267   :  { %v926_v20 = vmax.f32 %v833_v37, 0.0  ;;  %v836_v27 = vpop.f32.mrb[2].mxu1 }
 0x268   :  { %v837_v4 = vadd.f32 %v836_v27, %v3696_v23  ;;  %v838_v11 = vpop.f32.mrb[3].mxu1 }
 0x269   :  { %v839_v43 = vadd.f32 %v838_v11, %v3699_v22  ;;  %1059 = vmatprep.mubr.f32.mxu0 %v926_v20 }
 0x26a   :  { %1060 = vmatmul.mubr.f32.vlgmr.msra.gmra.mrb[32].mxu0 %v925_v18  ;;  %v927_v51 = vmax.f32 %v837_v4, 0.0 }
 0x26b   :  { %v928_v57 = vmax.f32 %v839_v43, 0.0  ;;  %2750 = vmatpush1.bf16.msra.mxu0 %v2749_v39  ;;  %v842_v45 = vpop.f32.mrb[4].mxu1  ;;  %v2769_v39 = vpack.c.bf16 %v1835_v36, %v1833_v29  ;;  %v1853_v29 = vld [vmem:[#allocation5 + $0x140] sm:$0xff]  ;;  %v1855_v36 = vld [vmem:[#allocation5 + $0x150] sm:$0xff] }
 0x26c   :  { %v843_v52 = vadd.f32 %v842_v45, %v3696_v23  ;;  %v844_v58 = vpop.f32.mrb[5].mxu1  ;;  %2752 = vmatprep.subr.bf16.mxu0 %v2751_v40  ;;  %v2771_v40 = vpack.c.bf16 %v1840_v6, %v1838_v38  ;;  %v1858_v38 = vld [vmem:[#allocation5 + $0x168] sm:$0xff]  ;;  %v1860_v6 = vld [vmem:[#allocation5 + $0x178] sm:$0xff] }
 0x26d   :  { %v845_v46 = vadd.f32 %v844_v58, %v3699_v22  ;;  %1064 = vmatprep.mubr.f32.mxu0 %v928_v57 }
 0x26e   :  { %1065 = vmatmul.mubr.f32.gmra.mrb[34].mxu0 %v927_v51  ;;  %v929_v54 = vmax.f32 %v843_v52, 0.0 }
 0x26f   :  { %v930_v13 = vmax.f32 %v845_v46, 0.0  ;;  %2754 = vmatpush1.bf16.msra.mxu0 %v2753_v48  ;;  %v848_v0 = vpop.f32.mrb[6].mxu1  ;;  %v2773_v48 = vpack.c.bf16 %v1839_v12, %v1837_v5  ;;  %v1857_v5 = vld [vmem:[#allocation5 + $0x160] sm:$0xff]  ;;  %v1859_v12 = vld [vmem:[#allocation5 + $0x170] sm:$0xff] }
 0x270   :  { %v849_v1 = vadd.f32 %v848_v0, %v3696_v23  ;;  %v850_v2 = vpop.f32.mrb[7].mxu1  ;;  %2756 = vmatprep.subr.bf16.mxu0 %v2755_v41  ;;  %v2775_v41 = vpack.c.bf16 %v1844_v44, %v1842_v49  ;;  %v1862_v49 = vld [vmem:[#allocation5 + $0x188] sm:$0xff]  ;;  %v1864_v44 = vld [vmem:[#allocation5 + $0x198] sm:$0xff] }
 0x271   :  { %v851_v56 = vadd.f32 %v850_v2, %v3699_v22  ;;  %1069 = vmatprep.mubr.f32.mxu0 %v930_v13 }
 0x272   :  { %1070 = vmatmul.mubr.f32.gmra.mrb[36].mxu0 %v929_v54  ;;  %v931_v55 = vmax.f32 %v849_v1, 0.0 }
 0x273   :  { %v932_v14 = vmax.f32 %v851_v56, 0.0  ;;  %2758 = vmatpush1.bf16.msra.mxu0 %v2757_v53  ;;  %v854_v62 = vpop.f32.mrb[8].mxu1  ;;  %v2777_v53 = vpack.c.bf16 %v1843_v42, %v1841_v59  ;;  %v1861_v59 = vld [vmem:[#allocation5 + $0x180] sm:$0xff]  ;;  %v1863_v42 = vld [vmem:[#allocation5 + $0x190] sm:$0xff] }
 0x274   :  { %v855_v15 = vadd.f32 %v854_v62, %v3696_v23  ;;  %v856_v3 = vpop.f32.mrb[9].mxu1  ;;  %2760 = vmatprep.subr.bf16.mxu0 %v2759_v7  ;;  %v2779_v7 = vpack.c.bf16 %v1848_v61, %v1846_v60  ;;  %v1866_v60 = vld [vmem:[#allocation5 + $0x1a8] sm:$0xff]  ;;  %v1868_v61 = vld [vmem:[#allocation5 + $0x1b8] sm:$0xff] }
 0x275   :  { %v857_v31 = vadd.f32 %v856_v3, %v3699_v22  ;;  %1074 = vmatprep.mubr.f32.mxu0 %v932_v14 }
 0x276   :  { %1075 = vmatmul.mubr.f32.gmra.mrb[38].mxu0 %v931_v55  ;;  %v933_v35 = vmax.f32 %v855_v15, 0.0 }
 0x277   :  { %v934_v9 = vmax.f32 %v857_v31, 0.0  ;;  %2762 = vmatpush1.bf16.msra.mxu0 %v2761_v47  ;;  %v860_v33 = vpop.f32.mrb[10].mxu1  ;;  %v2781_v47 = vpack.c.bf16 %v1847_v63, %v1845_v50  ;;  %v1865_v50 = vld [vmem:[#allocation5 + $0x1a0] sm:$0xff]  ;;  %v1867_v63 = vld [vmem:[#allocation5 + $0x1b0] sm:$0xff] }
 0x278   :  { %v861_v30 = vadd.f32 %v860_v33, %v3696_v23  ;;  %v862_v24 = vpop.f32.mrb[11].mxu1  ;;  %2764 = vmatprep.subr.bf16.mxu0 %v2763_v17  ;;  %v2783_v17 = vpack.c.bf16 %v1852_v8, %v1850_v21  ;;  %v1870_v21 = vld [vmem:[#allocation5 + $0x1c8] sm:$0xff]  ;;  %v1872_v8 = vld [vmem:[#allocation5 + $0x1d8] sm:$0xff] }
 0x279   :  { %v863_v37 = vadd.f32 %v862_v24, %v3699_v22  ;;  %1079 = vmatprep.mubr.f32.mxu0 %v934_v9 }
 0x27a   :  { %1080 = vmatmul.mubr.f32.gmra.mrb[40].mxu0 %v933_v35  ;;  %v935_v18 = vmax.f32 %v861_v30, 0.0 }
 0x27b   :  { %v936_v20 = vmax.f32 %v863_v37, 0.0  ;;  %2766 = vmatpush1.bf16.msra.mxu0 %v2765_v19  ;;  %v866_v27 = vpop.f32.mrb[12].mxu1  ;;  %v2785_v19 = vpack.c.bf16 %v1851_v28, %v1849_v10  ;;  %v1869_v10 = vld [vmem:[#allocation5 + $0x1c0] sm:$0xff]  ;;  %v1871_v28 = vld [vmem:[#allocation5 + $0x1d0] sm:$0xff] }
 0x27c   :  { %v867_v4 = vadd.f32 %v866_v27, %v3696_v23  ;;  %v868_v11 = vpop.f32.mrb[13].mxu1  ;;  %2768 = vmatprep.subr.bf16.mxu0 %v2767_v34  ;;  %v2787_v34 = vpack.c.bf16 %v1856_v16, %v1854_v32  ;;  %v1874_v32 = vld [vmem:[#allocation5 + $0x1e8] sm:$0xff]  ;;  %v1876_v16 = vld [vmem:[#allocation5 + $0x1f8] sm:$0xff] }
 0x27d   :  { %v869_v43 = vadd.f32 %v868_v11, %v3699_v22  ;;  %1084 = vmatprep.mubr.f32.mxu0 %v936_v20 }
 0x27e   :  { %1085 = vmatmul.mubr.f32.gmra.mrb[42].mxu0 %v935_v18  ;;  %v937_v51 = vmax.f32 %v867_v4, 0.0 }
 0x27f   :  { %v938_v57 = vmax.f32 %v869_v43, 0.0  ;;  %2770 = vmatpush1.bf16.msra.mxu0 %v2769_v39  ;;  %v872_v45 = vpop.f32.mrb[14].mxu1  ;;  %v2789_v39 = vpack.c.bf16 %v1855_v36, %v1853_v29  ;;  %v1873_v29 = vld [vmem:[#allocation5 + $0x1e0] sm:$0xff]  ;;  %v1875_v36 = vld [vmem:[#allocation5 + $0x1f0] sm:$0xff] }
 0x280   :  { %v873_v52 = vadd.f32 %v872_v45, %v3696_v23  ;;  %v874_v58 = vpop.f32.mrb[15].mxu1  ;;  %2772 = vmatprep.subr.bf16.mxu0 %v2771_v40  ;;  %v2791_v40 = vpack.c.bf16 %v1860_v6, %v1858_v38 }
 0x281   :  { %v875_v46 = vadd.f32 %v874_v58, %v3699_v22  ;;  %1089 = vmatprep.mubr.f32.mxu0 %v938_v57 }
 0x282   :  { %1090 = vmatmul.mubr.f32.gmra.mrb[44].mxu0 %v937_v51  ;;  %v939_v54 = vmax.f32 %v873_v52, 0.0 }
 0x283   :  { %v940_v13 = vmax.f32 %v875_v46, 0.0  ;;  %2774 = vmatpush1.bf16.msra.mxu0 %v2773_v48  ;;  %v878_v0 = vpop.f32.mrb[16].mxu1  ;;  %v2793_v48 = vpack.c.bf16 %v1859_v12, %v1857_v5 }
 0x284   :  { %v879_v1 = vadd.f32 %v878_v0, %v3696_v23  ;;  %v880_v2 = vpop.f32.mrb[17].mxu1  ;;  %2776 = vmatprep.subr.bf16.mxu0 %v2775_v41  ;;  %v2795_v41 = vpack.c.bf16 %v1864_v44, %v1862_v49 }
 0x285   :  { %v881_v56 = vadd.f32 %v880_v2, %v3699_v22  ;;  %1094 = vmatprep.mubr.f32.mxu0 %v940_v13 }
 0x286   :  { %1095 = vmatmul.mubr.f32.gmra.mrb[46].mxu0 %v939_v54  ;;  %v941_v55 = vmax.f32 %v879_v1, 0.0 }
 0x287   :  { %v942_v14 = vmax.f32 %v881_v56, 0.0  ;;  %2778 = vmatpush1.bf16.msra.mxu0 %v2777_v53  ;;  %v884_v62 = vpop.f32.mrb[18].mxu1  ;;  %v2797_v53 = vpack.c.bf16 %v1863_v42, %v1861_v59 }
 0x288   :  { %v885_v15 = vadd.f32 %v884_v62, %v3696_v23  ;;  %v886_v3 = vpop.f32.mrb[19].mxu1  ;;  %2780 = vmatprep.subr.bf16.mxu0 %v2779_v7  ;;  %v2799_v7 = vpack.c.bf16 %v1868_v61, %v1866_v60 }
 0x289   :  { %v887_v31 = vadd.f32 %v886_v3, %v3699_v22  ;;  %1099 = vmatprep.mubr.f32.mxu0 %v942_v14 }
 0x28a   :  { %1100 = vmatmul.mubr.f32.gmra.mrb[48].mxu0 %v941_v55  ;;  %v943_v35 = vmax.f32 %v885_v15, 0.0 }
 0x28b   :  { %v944_v9 = vmax.f32 %v887_v31, 0.0  ;;  %2782 = vmatpush1.bf16.msra.mxu0 %v2781_v47  ;;  %v890_v33 = vpop.f32.mrb[20].mxu1  ;;  %v2801_v47 = vpack.c.bf16 %v1867_v63, %v1865_v50 }
 0x28c   :  { %v891_v30 = vadd.f32 %v890_v33, %v3696_v23  ;;  %v892_v24 = vpop.f32.mrb[21].mxu1  ;;  %2784 = vmatprep.subr.bf16.mxu0 %v2783_v17  ;;  %v2803_v17 = vpack.c.bf16 %v1872_v8, %v1870_v21 }
 0x28d   :  { %v893_v37 = vadd.f32 %v892_v24, %v3699_v22  ;;  %1104 = vmatprep.mubr.f32.mxu0 %v944_v9 }
 0x28e   :  { %1105 = vmatmul.mubr.f32.gmra.mrb[50].mxu0 %v943_v35  ;;  %v945_v18 = vmax.f32 %v891_v30, 0.0 }
 0x28f   :  { %v946_v20 = vmax.f32 %v893_v37, 0.0  ;;  %2786 = vmatpush1.bf16.msra.mxu0 %v2785_v19  ;;  %v896_v27 = vpop.f32.mrb[22].mxu1  ;;  %v2805_v19 = vpack.c.bf16 %v1871_v28, %v1869_v10 }
 0x290   :  { %v897_v4 = vadd.f32 %v896_v27, %v3696_v23  ;;  %v898_v11 = vpop.f32.mrb[23].mxu1  ;;  %2788 = vmatprep.subr.bf16.mxu0 %v2787_v34  ;;  %v2807_v34 = vpack.c.bf16 %v1876_v16, %v1874_v32 }
 0x291   :  { %v899_v43 = vadd.f32 %v898_v11, %v3699_v22  ;;  %1109 = vmatprep.mubr.f32.mxu0 %v946_v20  ;;  %v2809_v20 = vpack.c.bf16 %v1875_v36, %v1873_v29 }
 0x292   :  { %1110 = vmatmul.mubr.f32.gmra.mrb[52].mxu0 %v945_v18  ;;  %v947_v51 = vmax.f32 %v897_v4, 0.0 }
 0x293   :  { %v948_v57 = vmax.f32 %v899_v43, 0.0  ;;  %2790 = vmatpush1.bf16.msra.mxu0 %v2789_v39  ;;  %v902_v45 = vpop.f32.mrb[24].mxu1 }
 0x294   :  { %v903_v52 = vadd.f32 %v902_v45, %v3696_v23  ;;  %v904_v58 = vpop.f32.mrb[25].mxu1  ;;  %2792 = vmatprep.subr.bf16.mxu0 %v2791_v40 }
 0x295   :  { %v905_v46 = vadd.f32 %v904_v58, %v3699_v22  ;;  %1114 = vmatprep.mubr.f32.mxu0 %v948_v57 }
 0x296   :  { %1115 = vmatmul.mubr.f32.gmra.mrb[54].mxu0 %v947_v51  ;;  %v949_v54 = vmax.f32 %v903_v52, 0.0 }
 0x297   :  { %v950_v13 = vmax.f32 %v905_v46, 0.0  ;;  %2794 = vmatpush1.bf16.msra.mxu0 %v2793_v48  ;;  %v908_v0 = vpop.f32.mrb[26].mxu1 }
 0x298   :  { %v909_v1 = vadd.f32 %v908_v0, %v3696_v23  ;;  %v910_v2 = vpop.f32.mrb[27].mxu1  ;;  %2796 = vmatprep.subr.bf16.mxu0 %v2795_v41 }
 0x299   :  { %v911_v56 = vadd.f32 %v910_v2, %v3699_v22  ;;  %1119 = vmatprep.mubr.f32.mxu0 %v950_v13 }
 0x29a   :  { %1120 = vmatmul.mubr.f32.gmra.mrb[56].mxu0 %v949_v54  ;;  %v951_v55 = vmax.f32 %v909_v1, 0.0 }
 0x29b   :  { %v952_v14 = vmax.f32 %v911_v56, 0.0  ;;  %2798 = vmatpush1.bf16.msra.mxu0 %v2797_v53  ;;  %v914_v62 = vpop.f32.mrb[28].mxu1 }
 0x29c   :  { %v915_v15 = vadd.f32 %v914_v62, %v3696_v23  ;;  %v916_v3 = vpop.f32.mrb[29].mxu1  ;;  %2800 = vmatprep.subr.bf16.mxu0 %v2799_v7 }
 0x29d   :  { %v917_v31 = vadd.f32 %v916_v3, %v3699_v22  ;;  %1124 = vmatprep.mubr.f32.mxu0 %v952_v14 }
 0x29e   :  { %1125 = vmatmul.mubr.f32.gmra.mrb[58].mxu0 %v951_v55  ;;  %v953_v35 = vmax.f32 %v915_v15, 0.0 }
 0x29f   :  { %v954_v9 = vmax.f32 %v917_v31, 0.0  ;;  %2802 = vmatpush1.bf16.msra.mxu0 %v2801_v47  ;;  %v920_v33 = vpop.f32.mrb[30].mxu1 }
 0x2a0   :  { %v921_v30 = vadd.f32 %v920_v33, %v3696_v23  ;;  %v922_v24 = vpop.f32.mrb[31].mxu1  ;;  %2804 = vmatprep.subr.bf16.mxu0 %v2803_v17 }
 0x2a1   :  { %v923_v37 = vadd.f32 %v922_v24, %v3699_v22  ;;  %1129 = vmatprep.mubr.f32.mxu0 %v954_v9 }
 0x2a2   :  { %1130 = vmatmul.mubr.f32.gmra.mrb[60].mxu0 %v953_v35  ;;  %v955_v27 = vmax.f32 %v921_v30, 0.0 }
 0x2a3   :  { %v956_v38 = vmax.f32 %v923_v37, 0.0  ;;  %2806 = vmatpush1.bf16.msra.mxu0 %v2805_v19  ;;  %v1686_v6 = vpop.f32.mrb[32].mxu1 }
 0x2a4   :  { %v1687_v39 = vadd.f32 %v1686_v6, %v3367_v25  ;;  %v1688_v18 = vpop.f32.mrb[33].mxu1  ;;  %2808 = vmatprep.subr.bf16.mxu0 %v2807_v34 }
 0x2a5   :  { %v1689_v4 = vadd.f32 %v1688_v18, %v3370_v26  ;;  %1134 = vmatprep.mubr.f32.mxu0 %v956_v38 }
 0x2a6   :  { %1135 = vmatmul.mubr.f32.gmra.mrb[62].mxu0 %v955_v27  ;;  %v1781_v5 = vmax.f32 %v1687_v39, 0.0 }
 0x2a7   :  { %v1782_v11 = vmax.f32 %v1689_v4, 0.0  ;;  %2810 = vmatpush1.bf16.msra.mxu0 %v2809_v20  ;;  %v1692_v40 = vpop.f32.mrb[34].mxu1 }
 0x2a8   :  { %v1693_v12 = vadd.f32 %v1692_v40, %v3367_v25  ;;  %v1694_v43 = vpop.f32.mrb[35].mxu1 }
 0x2a9   :  { %v1695_v49 = vadd.f32 %v1694_v43, %v3370_v26  ;;  %1941 = vmatprep.mubr.f32.mxu0 %v1782_v11 }
 0x2aa   :  { %1942 = vmatmul.mubr.f32.vlgmr.msra.gmra.mrb[64].mxu0 %v1781_v5  ;;  %v1783_v45 = vmax.f32 %v1693_v12, 0.0 }
 0x2ab   :  { %v1784_v44 = vmax.f32 %v1695_v49, 0.0  ;;  %v1698_v57 = vpop.f32.mrb[36].mxu1 }
 0x2ac   :  { %v1699_v48 = vadd.f32 %v1698_v57, %v3367_v25  ;;  %v1700_v51 = vpop.f32.mrb[37].mxu1 }
 0x2ad   :  { %v1701_v52 = vadd.f32 %v1700_v51, %v3370_v26  ;;  %1947 = vmatprep.mubr.f32.mxu0 %v1784_v44 }
 0x2ae   :  { %1948 = vmatmul.mubr.f32.gmra.mrb[66].mxu0 %v1783_v45  ;;  %v1785_v59 = vmax.f32 %v1699_v48, 0.0 }
 0x2af   :  { %v1786_v58 = vmax.f32 %v1701_v52, 0.0  ;;  %v1704_v41 = vpop.f32.mrb[38].mxu1 }
 0x2b0   :  { %v1705_v42 = vadd.f32 %v1704_v41, %v3367_v25  ;;  %v1706_v46 = vpop.f32.mrb[39].mxu1 }
 0x2b1   :  { %v1707_v60 = vadd.f32 %v1706_v46, %v3370_v26  ;;  %1953 = vmatprep.mubr.f32.mxu0 %v1786_v58 }
 0x2b2   :  { %1954 = vmatmul.mubr.f32.gmra.mrb[68].mxu0 %v1785_v59  ;;  %v1787_v0 = vmax.f32 %v1705_v42, 0.0 }
 0x2b3   :  { %v1788_v61 = vmax.f32 %v1707_v60, 0.0  ;;  %v1710_v13 = vpop.f32.mrb[40].mxu1 }
 0x2b4   :  { %v1711_v53 = vadd.f32 %v1710_v13, %v3367_v25  ;;  %v1712_v54 = vpop.f32.mrb[41].mxu1 }
 0x2b5   :  { %v1713_v1 = vadd.f32 %v1712_v54, %v3370_v26  ;;  %1959 = vmatprep.mubr.f32.mxu0 %v1788_v61 }
 0x2b6   :  { %1960 = vmatmul.mubr.f32.gmra.mrb[70].mxu0 %v1787_v0  ;;  %v1789_v50 = vmax.f32 %v1711_v53, 0.0 }
 0x2b7   :  { %v1790_v2 = vmax.f32 %v1713_v1, 0.0  ;;  %v1716_v7 = vpop.f32.mrb[42].mxu1 }
 0x2b8   :  { %v1717_v63 = vadd.f32 %v1716_v7, %v3367_v25  ;;  %v1718_v56 = vpop.f32.mrb[43].mxu1 }
 0x2b9   :  { %v1719_v21 = vadd.f32 %v1718_v56, %v3370_v26  ;;  %1965 = vmatprep.mubr.f32.mxu0 %v1790_v2 }
 0x2ba   :  { %1966 = vmatmul.mubr.f32.gmra.mrb[72].mxu0 %v1789_v50  ;;  %v1791_v62 = vmax.f32 %v1717_v63, 0.0 }
 0x2bb   :  { %v1792_v8 = vmax.f32 %v1719_v21, 0.0  ;;  %v1722_v14 = vpop.f32.mrb[44].mxu1 }
 0x2bc   :  { %v1723_v47 = vadd.f32 %v1722_v14, %v3367_v25  ;;  %v1724_v55 = vpop.f32.mrb[45].mxu1 }
 0x2bd   :  { %v1725_v15 = vadd.f32 %v1724_v55, %v3370_v26  ;;  %1971 = vmatprep.mubr.f32.mxu0 %v1792_v8 }
 0x2be   :  { %1972 = vmatmul.mubr.f32.gmra.mrb[74].mxu0 %v1791_v62  ;;  %v1793_v10 = vmax.f32 %v1723_v47, 0.0  ;;  %v2092_v62 = vld [vmem:[%s3913_s7 + $0xb0] sm:$0xff]  ;;  %v2093_v47 = vld [vmem:[%s3913_s7 + $0xb8] sm:$0xff] }
 0x2bf   :  { %v1794_v3 = vmax.f32 %v1725_v15, 0.0  ;;  %v1728_v17 = vpop.f32.mrb[46].mxu1  ;;  %v2823_v55 = vpack.c.bf16 %v2093_v47, %v2092_v62 }
 0x2c0   :  { %v1729_v28 = vadd.f32 %v1728_v17, %v3367_v25  ;;  %v1730_v31 = vpop.f32.mrb[47].mxu1  ;;  %v2095_v17 = vld [vmem:[%s3913_s7 + $0xc8] sm:$0xff] }
 0x2c1   :  { %v1731_v32 = vadd.f32 %v1730_v31, %v3370_v26  ;;  %1977 = vmatprep.mubr.f32.mxu0 %v1794_v3  ;;  %2824 = vmatprep.subr.bf16.mxu1 %v2823_v55  ;;  %v2094_v3 = vld [vmem:[%s3913_s7 + $0xc0] sm:$0xff]  ;;  %v2079_v31 = vld [vmem:[%s3913_s7 + $0x48] sm:$0xff] }
 0x2c2   :  { %1978 = vmatmul.mubr.f32.gmra.mrb[76].mxu0 %v1793_v10  ;;  %v1795_v33 = vmax.f32 %v1729_v28, 0.0  ;;  %v2827_v10 = vpack.c.bf16 %v2095_v17, %v2094_v3  ;;  %v2078_v28 = vld [vmem:[%s3913_s7 + $0x40] sm:$0xff] }
 0x2c3   :  { %v1796_v16 = vmax.f32 %v1731_v32, 0.0  ;;  %v1734_v9 = vpop.f32.mrb[48].mxu1  ;;  %v2829_v32 = vpack.c.bf16 %v2079_v31, %v2078_v28 }
 0x2c4   :  { %v1735_v19 = vadd.f32 %v1734_v9, %v3367_v25  ;;  %v1736_v35 = vpop.f32.mrb[49].mxu1  ;;  %v2097_v9 = vld [vmem:[%s3913_s7 + $0xd8] sm:$0xff] }
 0x2c5   :  { %v1737_v30 = vadd.f32 %v1736_v35, %v3370_v26  ;;  %1983 = vmatprep.mubr.f32.mxu0 %v1796_v16  ;;  %v2096_v16 = vld [vmem:[%s3913_s7 + $0xd0] sm:$0xff]  ;;  %v2081_v35 = vld [vmem:[%s3913_s7 + $0x58] sm:$0xff] }
 0x2c6   :  { %1984 = vmatmul.mubr.f32.gmra.mrb[78].mxu0 %v1795_v33  ;;  %v1797_v29 = vmax.f32 %v1735_v19, 0.0  ;;  %v2831_v33 = vpack.c.bf16 %v2097_v9, %v2096_v16  ;;  %v2080_v19 = vld [vmem:[%s3913_s7 + $0x50] sm:$0xff] }
 0x2c7   :  { %v1798_v24 = vmax.f32 %v1737_v30, 0.0  ;;  %v1740_v34 = vpop.f32.mrb[50].mxu1  ;;  %v2833_v30 = vpack.c.bf16 %v2081_v35, %v2080_v19 }
 0x2c8   :  { %v1741_v36 = vadd.f32 %v1740_v34, %v3367_v25  ;;  %v1742_v37 = vpop.f32.mrb[51].mxu1  ;;  %v2099_v34 = vld [vmem:[%s3913_s7 + $0xe8] sm:$0xff] }
 0x2c9   :  { %v1743_v38 = vadd.f32 %v1742_v37, %v3370_v26  ;;  %1989 = vmatprep.mubr.f32.mxu0 %v1798_v24  ;;  %v2098_v24 = vld [vmem:[%s3913_s7 + $0xe0] sm:$0xff]  ;;  %v2083_v37 = vld [vmem:[%s3913_s7 + $0x68] sm:$0xff] }
 0x2ca   :  { %1990 = vmatmul.mubr.f32.gmra.mrb[80].mxu0 %v1797_v29  ;;  %v1799_v27 = vmax.f32 %v1741_v36, 0.0  ;;  %v2835_v29 = vpack.c.bf16 %v2099_v34, %v2098_v24  ;;  %v2082_v36 = vld [vmem:[%s3913_s7 + $0x60] sm:$0xff] }
 0x2cb   :  { %v1800_v6 = vmax.f32 %v1743_v38, 0.0  ;;  %v1746_v20 = vpop.f32.mrb[52].mxu1  ;;  %v2837_v38 = vpack.c.bf16 %v2083_v37, %v2082_v36 }
 0x2cc   :  { %v1747_v39 = vadd.f32 %v1746_v20, %v3367_v25  ;;  %v1748_v18 = vpop.f32.mrb[53].mxu1  ;;  %v2101_v20 = vld [vmem:[%s3913_s7 + $0xf8] sm:$0xff] }
 0x2cd   :  { %v1749_v4 = vadd.f32 %v1748_v18, %v3370_v26  ;;  %1995 = vmatprep.mubr.f32.mxu0 %v1800_v6  ;;  %v2100_v6 = vld [vmem:[%s3913_s7 + $0xf0] sm:$0xff]  ;;  %v2085_v18 = vld [vmem:[%s3913_s7 + $0x78] sm:$0xff] }
 0x2ce   :  { %1996 = vmatmul.mubr.f32.gmra.mrb[82].mxu0 %v1799_v27  ;;  %v1801_v5 = vmax.f32 %v1747_v39, 0.0  ;;  %v2839_v27 = vpack.c.bf16 %v2101_v20, %v2100_v6  ;;  %v2084_v39 = vld [vmem:[%s3913_s7 + $0x70] sm:$0xff] }
 0x2cf   :  { %v1802_v11 = vmax.f32 %v1749_v4, 0.0  ;;  %v1752_v40 = vpop.f32.mrb[54].mxu1  ;;  %v2841_v4 = vpack.c.bf16 %v2085_v18, %v2084_v39 }
 0x2d0   :  { %v1753_v12 = vadd.f32 %v1752_v40, %v3367_v25  ;;  %v1754_v43 = vpop.f32.mrb[55].mxu1  ;;  %v3828_v40 = vld [vmem:[%s3914_s8] ss:$0 sm:$0xff] }
 0x2d1   :  { %v1755_v49 = vadd.f32 %v1754_v43, %v3370_v26  ;;  %2001 = vmatprep.mubr.f32.mxu0 %v1802_v11 }
 0x2d2   :  { %2002 = vmatmul.mubr.f32.gmra.mrb[84].mxu0 %v1801_v5  ;;  %v1803_v45 = vmax.f32 %v1753_v12, 0.0 }
 0x2d3   :  { %v1804_v44 = vmax.f32 %v1755_v49, 0.0  ;;  %v1758_v57 = vpop.f32.mrb[56].mxu1 }
 0x2d4   :  { %v1759_v48 = vadd.f32 %v1758_v57, %v3367_v25  ;;  %v1760_v51 = vpop.f32.mrb[57].mxu1 }
 0x2d5   :  { %v1761_v52 = vadd.f32 %v1760_v51, %v3370_v26  ;;  %2007 = vmatprep.mubr.f32.mxu0 %v1804_v44 }
 0x2d6   :  { %2008 = vmatmul.mubr.f32.gmra.mrb[86].mxu0 %v1803_v45  ;;  %v1805_v59 = vmax.f32 %v1759_v48, 0.0 }
 0x2d7   :  { %v1806_v58 = vmax.f32 %v1761_v52, 0.0  ;;  %v1764_v41 = vpop.f32.mrb[58].mxu1 }
 0x2d8   :  { %v1765_v42 = vadd.f32 %v1764_v41, %v3367_v25  ;;  %v1766_v46 = vpop.f32.mrb[59].mxu1 }
 0x2d9   :  { %v1767_v60 = vadd.f32 %v1766_v46, %v3370_v26  ;;  %2013 = vmatprep.mubr.f32.mxu0 %v1806_v58 }
 0x2da   :  { %2014 = vmatmul.mubr.f32.gmra.mrb[88].mxu0 %v1805_v59  ;;  %v1807_v0 = vmax.f32 %v1765_v42, 0.0 }
 0x2db   :  { %v1808_v61 = vmax.f32 %v1767_v60, 0.0  ;;  %v1770_v13 = vpop.f32.mrb[60].mxu1 }
 0x2dc   :  { %v1771_v53 = vadd.f32 %v1770_v13, %v3367_v25  ;;  %v1772_v54 = vpop.f32.mrb[61].mxu1 }
 0x2dd   :  { %v1773_v1 = vadd.f32 %v1772_v54, %v3370_v26  ;;  %2019 = vmatprep.mubr.f32.mxu0 %v1808_v61 }
 0x2de   :  { %2020 = vmatmul.mubr.f32.gmra.mrb[90].mxu0 %v1807_v0  ;;  %v1809_v50 = vmax.f32 %v1771_v53, 0.0 }
 0x2df   :  { %v1810_v2 = vmax.f32 %v1773_v1, 0.0  ;;  %v1776_v7 = vpop.f32.mrb[62].mxu1 }
 0x2e0   :  { %v1777_v63 = vadd.f32 %v1776_v7, %v3367_v25  ;;  %v1778_v56 = vpop.f32.mrb[63].mxu1  ;;  %v2076_v25 = vld [vmem:[%s3913_s7 + $0x30] sm:$0xff] }
 0x2e1   :  { %v1779_v21 = vadd.f32 %v1778_v56, %v3370_v26  ;;  %2025 = vmatprep.mubr.f32.mxu0 %v1810_v2  ;;  %v2077_v26 = vld [vmem:[%s3913_s7 + $0x38] sm:$0xff]  ;;  %s3063_s7 = smov [#allocation7]  }
 0x2e2   :  { %2026 = vmatmul.mubr.f32.gmra.mrb[92].mxu0 %v1809_v50  ;;  %v1811_v14 = vmax.f32 %v1777_v63, 0.0  ;;  %v2825_v15 = vpack.c.bf16 %v2077_v26, %v2076_v25  ;;  %s2348_s8 = sshll.u32 %s3063_s7, 4  ;;  %s2349_s8 = int_to_ptr.vmem [resolvable:$true] %s2348_s8 }
 0x2e3   :  { %v1812_v8 = vmax.f32 %v1779_v21, 0.0  ;;  %s3029_s1 = scalar_lea.vmem %s2349_s8, 4096  ;;  %p3034_p3 = scmp.lt.s32.totalorder %s2349_s8, %s2349_s8 }
 0x2e4   :  { %2826 = vmatpush3.bf16.msra.mxu1 %v2825_v15  ;;  %p3030_p2 = scmp.ne.s32.totalorder %s2349_s8, %s3029_s1  ;;  %p3035_p4 = scmp.lt.s32.totalorder %s3029_s1, %s3029_s1 }
 0x2e5   :  { %2031 = vmatprep.mubr.f32.mxu0 %v1812_v8  ;;  %2828 = vmatprep.subr.bf16.mxu1 %v2827_v10 }
 0x2e6   :  { %2032 = vmatmul.mubr.f32.gmra.mrb[94].mxu0 %v1811_v14  ;;  %p3036_p5 = por %p3035_p4, %p3034_p3 }
 0x2e8   :  { %2830 = vmatpush3.bf16.msra.mxu1 %v2829_v32  ;;  %p3037_p6 = pnand %p3036_p5, %p3030_p2 }
 0x2e9   :  { %2832 = vmatprep.subr.bf16.mxu1 %v2831_v33 }
 0x2ec   :  { %2834 = vmatpush3.bf16.msra.mxu1 %v2833_v30 }
 0x2ed   :  { %2836 = vmatprep.subr.bf16.mxu1 %v2835_v29 }
 0x2f0   :  { %2838 = vmatpush3.bf16.msra.mxu1 %v2837_v38 }
 0x2f1   :  { %2840 = vmatprep.subr.bf16.mxu1 %v2839_v27 }
 0x2f4   :  { %2842 = vmatpush3.bf16.msra.mxu1 %v2841_v4 }
 0x33d   :  { %v2395_v11 = vpop.f32.mrb[32].mxu0 }
 0x33e   :  { %v2396_v5 = vpop.f32.mrb[33].mxu0 }
 0x33f   :  { %v2397_v12 = vadd.f32 %v2396_v5, %v2395_v11 }
 0x341   :  { %v1062_v43 = vadd.f32 %v2397_v12, %v3828_v40  ;;  %v2398_v49 = vpop.f32.mrb[34].mxu0 }
 0x342   :  { %v2399_v44 = vpop.f32.mrb[35].mxu0 }
 0x343   :  { %v1140_v57 = vsub.f32 0.0, %v1062_v43  ;;  %v2400_v45 = vadd.f32 %v2399_v44, %v2398_v49 }
 0x345   :  { %v1156_v48 = vmul.f32 1.442695, %v1140_v57  ;;  %v1067_v51 = vadd.f32 %v2400_v45, %v3828_v40  ;;  %v2401_v52 = vpop.f32.mrb[36].mxu0 }
 0x346   :  { %v2402_v58 = vpop.f32.mrb[37].mxu0 }
 0x347   :  { %2857 = vpow2.f32 %v1156_v48  ;;  %v1141_v41 = vsub.f32 0.0, %v1067_v51  ;;  %v2403_v59 = vadd.f32 %v2402_v58, %v2401_v52 }
 0x349   :  { %v1158_v42 = vmul.f32 1.442695, %v1141_v41  ;;  %v1072_v46 = vadd.f32 %v2403_v59, %v3828_v40  ;;  %v2404_v60 = vpop.f32.mrb[38].mxu0 }
 0x34a   :  { %v2405_v61 = vpop.f32.mrb[39].mxu0 }
 0x34b   :  { %2859 = vpow2.f32 %v1158_v42  ;;  %v1142_v13 = vsub.f32 0.0, %v1072_v46  ;;  %v2406_v0 = vadd.f32 %v2405_v61, %v2404_v60 }
 0x34d   :  { %v1160_v53 = vmul.f32 1.442695, %v1142_v13  ;;  %v1077_v54 = vadd.f32 %v2406_v0, %v3828_v40  ;;  %v2407_v1 = vpop.f32.mrb[40].mxu0 }
 0x34e   :  { %v2408_v2 = vpop.f32.mrb[41].mxu0 }
 0x34f   :  { %2861 = vpow2.f32 %v1160_v53  ;;  %v1143_v7 = vsub.f32 0.0, %v1077_v54  ;;  %v2409_v50 = vadd.f32 %v2408_v2, %v2407_v1 }
 0x351   :  { %v2858_v63 = vpop.eup %2857  ;;  %v1162_v56 = vmul.f32 1.442695, %v1143_v7  ;;  %v1082_v21 = vadd.f32 %v2409_v50, %v3828_v40  ;;  %v2410_v8 = vpop.f32.mrb[42].mxu0 }
 0x352   :  { %v1188_v14 = vadd.f32 1.0, %v2858_v63  ;;  %v2411_v62 = vpop.f32.mrb[43].mxu0 }
 0x353   :  { %2863 = vpow2.f32 %v1162_v56  ;;  %v1144_v47 = vsub.f32 0.0, %v1082_v21  ;;  %v2412_v55 = vadd.f32 %v2411_v62, %v2410_v8 }
 0x354   :  { %2865 = vrcp.f32 %v1188_v14 }
 0x355   :  { %v2860_v25 = vpop.eup %2859  ;;  %v1164_v26 = vmul.f32 1.442695, %v1144_v47  ;;  %v1087_v15 = vadd.f32 %v2412_v55, %v3828_v40  ;;  %v2413_v3 = vpop.f32.mrb[44].mxu0 }
 0x356   :  { %v1189_v17 = vadd.f32 1.0, %v2860_v25  ;;  %v2414_v10 = vpop.f32.mrb[45].mxu0 }
 0x357   :  { %2867 = vpow2.f32 %v1164_v26  ;;  %v1145_v28 = vsub.f32 0.0, %v1087_v15  ;;  %v2415_v31 = vadd.f32 %v2414_v10, %v2413_v3 }
 0x358   :  { %2869 = vrcp.f32 %v1189_v17 }
 0x359   :  { %v2862_v32 = vpop.eup %2861  ;;  %v1166_v16 = vmul.f32 1.442695, %v1145_v28  ;;  %v1092_v9 = vadd.f32 %v2415_v31, %v3828_v40  ;;  %v2416_v33 = vpop.f32.mrb[46].mxu0 }
 0x35a   :  { %v1190_v19 = vadd.f32 1.0, %v2862_v32  ;;  %v2417_v35 = vpop.f32.mrb[47].mxu0 }
 0x35b   :  { %2871 = vpow2.f32 %v1166_v16  ;;  %v1146_v30 = vsub.f32 0.0, %v1092_v9  ;;  %v2418_v24 = vadd.f32 %v2417_v35, %v2416_v33 }
 0x35c   :  { %2873 = vrcp.f32 %v1190_v19 }
 0x35d   :  { %v2864_v34 = vpop.eup %2863  ;;  %v1168_v29 = vmul.f32 1.442695, %v1146_v30  ;;  %v1097_v36 = vadd.f32 %v2418_v24, %v3828_v40  ;;  %v2419_v37 = vpop.f32.mrb[48].mxu0 }
 0x35e   :  { %v2866_v38 = vpop.eup %2865  ;;  %v1191_v6 = vadd.f32 1.0, %v2864_v34  ;;  %v2420_v20 = vpop.f32.mrb[49].mxu0 }
 0x35f   :  { %1220 = vst [vmem:[#allocation7] sm:$0xff] %v2866_v38  ;;  %2875 = vpow2.f32 %v1168_v29  ;;  %v1147_v27 = vsub.f32 0.0, %v1097_v36  ;;  %v2421_v39 = vadd.f32 %v2420_v20, %v2419_v37 }
 0x360   :  { %2877 = vrcp.f32 %v1191_v6 }
 0x361   :  { %v2868_v18 = vpop.eup %2867  ;;  %v1170_v4 = vmul.f32 1.442695, %v1147_v27  ;;  %v1102_v11 = vadd.f32 %v2421_v39, %v3828_v40  ;;  %v2422_v5 = vpop.f32.mrb[50].mxu0 }
 0x362   :  { %v2870_v12 = vpop.eup %2869  ;;  %v1192_v43 = vadd.f32 1.0, %v2868_v18  ;;  %v2423_v49 = vpop.f32.mrb[51].mxu0 }
 0x363   :  { %1221 = vst [vmem:[#allocation7 + $0x8] sm:$0xff] %v2870_v12  ;;  %2879 = vpow2.f32 %v1170_v4  ;;  %v1148_v44 = vsub.f32 0.0, %v1102_v11  ;;  %v2424_v57 = vadd.f32 %v2423_v49, %v2422_v5 }
 0x364   :  { %2881 = vrcp.f32 %v1192_v43 }
 0x365   :  { %v2872_v45 = vpop.eup %2871  ;;  %v1172_v48 = vmul.f32 1.442695, %v1148_v44  ;;  %v1107_v51 = vadd.f32 %v2424_v57, %v3828_v40  ;;  %v2425_v52 = vpop.f32.mrb[52].mxu0 }
 0x366   :  { %v2874_v58 = vpop.eup %2873  ;;  %v1193_v41 = vadd.f32 1.0, %v2872_v45  ;;  %v2426_v59 = vpop.f32.mrb[53].mxu0 }
 0x367   :  { %1222 = vst [vmem:[#allocation7 + $0x10] sm:$0xff] %v2874_v58  ;;  %2883 = vpow2.f32 %v1172_v48  ;;  %v1149_v42 = vsub.f32 0.0, %v1107_v51  ;;  %v2427_v46 = vadd.f32 %v2426_v59, %v2425_v52 }
 0x368   :  { %2885 = vrcp.f32 %v1193_v41 }
 0x369   :  { %v2876_v60 = vpop.eup %2875  ;;  %v1174_v61 = vmul.f32 1.442695, %v1149_v42  ;;  %v1112_v13 = vadd.f32 %v2427_v46, %v3828_v40  ;;  %v2428_v0 = vpop.f32.mrb[54].mxu0 }
 0x36a   :  { %v2878_v53 = vpop.eup %2877  ;;  %v1194_v54 = vadd.f32 1.0, %v2876_v60  ;;  %v2429_v1 = vpop.f32.mrb[55].mxu0 }
 0x36b   :  { %1223 = vst [vmem:[#allocation7 + $0x18] sm:$0xff] %v2878_v53  ;;  %2887 = vpow2.f32 %v1174_v61  ;;  %v1150_v2 = vsub.f32 0.0, %v1112_v13  ;;  %v2430_v7 = vadd.f32 %v2429_v1, %v2428_v0 }
 0x36c   :  { %2889 = vrcp.f32 %v1194_v54 }
 0x36d   :  { %v2880_v50 = vpop.eup %2879  ;;  %v1176_v63 = vmul.f32 1.442695, %v1150_v2  ;;  %v1117_v56 = vadd.f32 %v2430_v7, %v3828_v40  ;;  %v2431_v21 = vpop.f32.mrb[56].mxu0 }
 0x36e   :  { %v2882_v8 = vpop.eup %2881  ;;  %v1195_v14 = vadd.f32 1.0, %v2880_v50  ;;  %v2432_v62 = vpop.f32.mrb[57].mxu0 }
 0x36f   :  { %1224 = vst [vmem:[#allocation7 + $0x20] sm:$0xff] %v2882_v8  ;;  %2891 = vpow2.f32 %v1176_v63  ;;  %v1151_v47 = vsub.f32 0.0, %v1117_v56  ;;  %v2433_v55 = vadd.f32 %v2432_v62, %v2431_v21 }
 0x370   :  { %2893 = vrcp.f32 %v1195_v14 }
 0x371   :  { %v2884_v25 = vpop.eup %2883  ;;  %v1178_v26 = vmul.f32 1.442695, %v1151_v47  ;;  %v1122_v15 = vadd.f32 %v2433_v55, %v3828_v40  ;;  %v2434_v3 = vpop.f32.mrb[58].mxu0 }
 0x372   :  { %v2886_v17 = vpop.eup %2885  ;;  %v1196_v10 = vadd.f32 1.0, %v2884_v25  ;;  %v2435_v28 = vpop.f32.mrb[59].mxu0 }
 0x373   :  { %1225 = vst [vmem:[#allocation7 + $0x28] sm:$0xff] %v2886_v17  ;;  %2895 = vpow2.f32 %v1178_v26  ;;  %v1152_v31 = vsub.f32 0.0, %v1122_v15  ;;  %v2436_v32 = vadd.f32 %v2435_v28, %v2434_v3 }
 0x374   :  { %2897 = vrcp.f32 %v1196_v10 }
 0x375   :  { %v2888_v16 = vpop.eup %2887  ;;  %v1180_v9 = vmul.f32 1.442695, %v1152_v31  ;;  %v1127_v33 = vadd.f32 %v2436_v32, %v3828_v40  ;;  %v2437_v19 = vpop.f32.mrb[60].mxu0 }
 0x376   :  { %v2890_v35 = vpop.eup %2889  ;;  %v1197_v30 = vadd.f32 1.0, %v2888_v16  ;;  %v2438_v24 = vpop.f32.mrb[61].mxu0 }
 0x377   :  { %1226 = vst [vmem:[#allocation7 + $0x30] sm:$0xff] %v2890_v35  ;;  %2899 = vpow2.f32 %v1180_v9  ;;  %v1153_v34 = vsub.f32 0.0, %v1127_v33  ;;  %v2439_v29 = vadd.f32 %v2438_v24, %v2437_v19 }
 0x378   :  { %2901 = vrcp.f32 %v1197_v30 }
 0x379   :  { %v2892_v36 = vpop.eup %2891  ;;  %v1182_v37 = vmul.f32 1.442695, %v1153_v34  ;;  %v1132_v38 = vadd.f32 %v2439_v29, %v3828_v40  ;;  %v2440_v6 = vpop.f32.mrb[62].mxu0 }
 0x37a   :  { %v2894_v20 = vpop.eup %2893  ;;  %v1198_v27 = vadd.f32 1.0, %v2892_v36  ;;  %v2441_v39 = vpop.f32.mrb[63].mxu0 }
 0x37b   :  { %1227 = vst [vmem:[#allocation7 + $0x38] sm:$0xff] %v2894_v20  ;;  %2903 = vpow2.f32 %v1182_v37  ;;  %v1154_v18 = vsub.f32 0.0, %v1132_v38  ;;  %v2442_v4 = vadd.f32 %v2441_v39, %v2440_v6 }
 0x37c   :  { %2905 = vrcp.f32 %v1198_v27 }
 0x37d   :  { %v2896_v11 = vpop.eup %2895  ;;  %v1184_v5 = vmul.f32 1.442695, %v1154_v18  ;;  %v1137_v12 = vadd.f32 %v2442_v4, %v3828_v40  ;;  %v1943_v43 = vpop.f32.mrb[64].mxu0 }
 0x37e   :  { %v2898_v49 = vpop.eup %2897  ;;  %v1199_v44 = vadd.f32 1.0, %v2896_v11  ;;  %v1944_v57 = vadd.f32 %v1943_v43, %v3696_v23  ;;  %v1945_v45 = vpop.f32.mrb[65].mxu0 }
 0x37f   :  { %1228 = vst [vmem:[#allocation7 + $0x40] sm:$0xff] %v2898_v49  ;;  %2907 = vpow2.f32 %v1184_v5  ;;  %v1155_v48 = vsub.f32 0.0, %v1137_v12  ;;  %v1946_v51 = vadd.f32 %v1945_v45, %v3699_v22 }
 0x380   :  { %2909 = vrcp.f32 %v1199_v44  ;;  %v2038_v60 = vmax.f32 %v1944_v57, 0.0 }
 0x381   :  { %v2900_v52 = vpop.eup %2899  ;;  %v1186_v58 = vmul.f32 1.442695, %v1155_v48  ;;  %v2039_v41 = vmax.f32 %v1946_v51, 0.0  ;;  %v1949_v59 = vpop.f32.mrb[66].mxu0 }
 0x382   :  { %v2902_v42 = vpop.eup %2901  ;;  %v1200_v46 = vadd.f32 1.0, %v2900_v52  ;;  %v1950_v61 = vadd.f32 %v1949_v59, %v3696_v23  ;;  %v1951_v13 = vpop.f32.mrb[67].mxu0 }
 0x383   :  { %1229 = vst [vmem:[#allocation7 + $0x48] sm:$0xff] %v2902_v42  ;;  %2911 = vpow2.f32 %v1186_v58  ;;  %v1952_v0 = vadd.f32 %v1951_v13, %v3699_v22  ;;  %2166 = vmatprep.mubr.f32.mxu1 %v2039_v41 }
 0x384   :  { %2913 = vrcp.f32 %v1200_v46  ;;  %2167 = vmatmul.mubr.f32.vlgmr.msra.gmra.mrb[64].mxu1 %v2038_v60  ;;  %v2040_v50 = vmax.f32 %v1950_v61, 0.0 }
 0x385   :  { %v2904_v53 = vpop.eup %2903  ;;  %v2041_v54 = vmax.f32 %v1952_v0, 0.0  ;;  %v1955_v1 = vpop.f32.mrb[68].mxu0 }
 0x386   :  { %v2906_v2 = vpop.eup %2905  ;;  %v1201_v7 = vadd.f32 1.0, %v2904_v53  ;;  %v1956_v63 = vadd.f32 %v1955_v1, %v3696_v23  ;;  %v1957_v56 = vpop.f32.mrb[69].mxu0 }
 0x387   :  { %1230 = vst [vmem:[#allocation7 + $0x50] sm:$0xff] %v2906_v2  ;;  %v1958_v21 = vadd.f32 %v1957_v56, %v3699_v22  ;;  %2171 = vmatprep.mubr.f32.mxu1 %v2041_v54 }
 0x388   :  { %2915 = vrcp.f32 %v1201_v7  ;;  %2172 = vmatmul.mubr.f32.gmra.mrb[66].mxu1 %v2040_v50  ;;  %v2042_v25 = vmax.f32 %v1956_v63, 0.0 }
 0x389   :  { %v2908_v8 = vpop.eup %2907  ;;  %v2043_v14 = vmax.f32 %v1958_v21, 0.0  ;;  %v1961_v62 = vpop.f32.mrb[70].mxu0 }
 0x38a   :  { %v2910_v47 = vpop.eup %2909  ;;  %v1202_v55 = vadd.f32 1.0, %v2908_v8  ;;  %v1962_v26 = vadd.f32 %v1961_v62, %v3696_v23  ;;  %v1963_v15 = vpop.f32.mrb[71].mxu0 }
 0x38b   :  { %1231 = vst [vmem:[#allocation7 + $0x58] sm:$0xff] %v2910_v47  ;;  %v1964_v3 = vadd.f32 %v1963_v15, %v3699_v22  ;;  %2176 = vmatprep.mubr.f32.mxu1 %v2043_v14 }
 0x38c   :  { %2917 = vrcp.f32 %v1202_v55  ;;  %2177 = vmatmul.mubr.f32.gmra.mrb[68].mxu1 %v2042_v25  ;;  %v2044_v16 = vmax.f32 %v1962_v26, 0.0 }
 0x38d   :  { %v2912_v17 = vpop.eup %2911  ;;  %v2045_v10 = vmax.f32 %v1964_v3, 0.0  ;;  %v1967_v28 = vpop.f32.mrb[72].mxu0 }
 0x38e   :  { %v2914_v31 = vpop.eup %2913  ;;  %v1203_v32 = vadd.f32 1.0, %v2912_v17  ;;  %v1968_v9 = vadd.f32 %v1967_v28, %v3696_v23  ;;  %v1969_v33 = vpop.f32.mrb[73].mxu0 }
 0x38f   :  { %1232 = vst [vmem:[#allocation7 + $0x60] sm:$0xff] %v2914_v31  ;;  %v1970_v19 = vadd.f32 %v1969_v33, %v3699_v22  ;;  %2181 = vmatprep.mubr.f32.mxu1 %v2045_v10 }
 0x390   :  { %2919 = vrcp.f32 %v1203_v32  ;;  %2182 = vmatmul.mubr.f32.gmra.mrb[70].mxu1 %v2044_v16  ;;  %v2046_v34 = vmax.f32 %v1968_v9, 0.0 }
 0x391   :  { %v2047_v35 = vmax.f32 %v1970_v19, 0.0  ;;  %v1973_v30 = vpop.f32.mrb[74].mxu0 }
 0x392   :  { %v2916_v24 = vpop.eup %2915  ;;  %v1974_v29 = vadd.f32 %v1973_v30, %v3696_v23  ;;  %v1975_v36 = vpop.f32.mrb[75].mxu0 }
 0x393   :  { %1233 = vst [vmem:[#allocation7 + $0x68] sm:$0xff] %v2916_v24  ;;  %v1976_v37 = vadd.f32 %v1975_v36, %v3699_v22  ;;  %2186 = vmatprep.mubr.f32.mxu1 %v2047_v35 }
 0x394   :  { %2187 = vmatmul.mubr.f32.gmra.mrb[72].mxu1 %v2046_v34  ;;  %v2048_v27 = vmax.f32 %v1974_v29, 0.0 }
 0x395   :  { %v2049_v38 = vmax.f32 %v1976_v37, 0.0  ;;  %v1979_v6 = vpop.f32.mrb[76].mxu0 }
 0x396   :  { %v2918_v20 = vpop.eup %2917  ;;  %v1980_v39 = vadd.f32 %v1979_v6, %v3696_v23  ;;  %v1981_v18 = vpop.f32.mrb[77].mxu0 }
 0x397   :  { %1234 = vst [vmem:[#allocation7 + $0x70] sm:$0xff] %v2918_v20  ;;  %v1982_v4 = vadd.f32 %v1981_v18, %v3699_v22  ;;  %2191 = vmatprep.mubr.f32.mxu1 %v2049_v38 }
 0x398   :  { %2192 = vmatmul.mubr.f32.gmra.mrb[74].mxu1 %v2048_v27  ;;  %v2050_v43 = vmax.f32 %v1980_v39, 0.0 }
 0x399   :  { %v2051_v11 = vmax.f32 %v1982_v4, 0.0  ;;  %v1985_v5 = vpop.f32.mrb[78].mxu0 }
 0x39a   :  { %v2920_v12 = vpop.eup %2919  ;;  %v1986_v49 = vadd.f32 %v1985_v5, %v3696_v23  ;;  %v1987_v44 = vpop.f32.mrb[79].mxu0 }
 0x39b   :  { %1235 = vst [vmem:[#allocation7 + $0x78] sm:$0xff] %v2920_v12  ;;  %v1988_v57 = vadd.f32 %v1987_v44, %v3699_v22  ;;  %2196 = vmatprep.mubr.f32.mxu1 %v2051_v11 }
 0x39c   :  { %2197 = vmatmul.mubr.f32.gmra.mrb[76].mxu1 %v2050_v43  ;;  %v2052_v51 = vmax.f32 %v1986_v49, 0.0 }
 0x39d   :  { %v2053_v45 = vmax.f32 %v1988_v57, 0.0  ;;  %v1991_v48 = vpop.f32.mrb[80].mxu0 }
 0x39e   :  { %v1992_v52 = vadd.f32 %v1991_v48, %v3696_v23  ;;  %v1993_v58 = vpop.f32.mrb[81].mxu0 }
 0x39f   :  { %v1994_v41 = vadd.f32 %v1993_v58, %v3699_v22  ;;  %2201 = vmatprep.mubr.f32.mxu1 %v2053_v45 }
 0x3a0   :  { %2202 = vmatmul.mubr.f32.gmra.mrb[78].mxu1 %v2052_v51  ;;  %v2054_v46 = vmax.f32 %v1992_v52, 0.0 }
 0x3a1   :  { %v2055_v59 = vmax.f32 %v1994_v41, 0.0  ;;  %v1997_v42 = vpop.f32.mrb[82].mxu0 }
 0x3a2   :  { %v1998_v60 = vadd.f32 %v1997_v42, %v3696_v23  ;;  %v1999_v61 = vpop.f32.mrb[83].mxu0 }
 0x3a3   :  { %v2000_v13 = vadd.f32 %v1999_v61, %v3699_v22  ;;  %2206 = vmatprep.mubr.f32.mxu1 %v2055_v59 }
 0x3a4   :  { %2207 = vmatmul.mubr.f32.gmra.mrb[80].mxu1 %v2054_v46  ;;  %v2056_v54 = vmax.f32 %v1998_v60, 0.0 }
 0x3a5   :  { %v2057_v0 = vmax.f32 %v2000_v13, 0.0  ;;  %v2003_v53 = vpop.f32.mrb[84].mxu0 }
 0x3a6   :  { %v2004_v1 = vadd.f32 %v2003_v53, %v3696_v23  ;;  %v2005_v2 = vpop.f32.mrb[85].mxu0 }
 0x3a7   :  { %v2006_v7 = vadd.f32 %v2005_v2, %v3699_v22  ;;  %2211 = vmatprep.mubr.f32.mxu1 %v2057_v0 }
 0x3a8   :  { %2212 = vmatmul.mubr.f32.gmra.mrb[82].mxu1 %v2056_v54  ;;  %v2058_v56 = vmax.f32 %v2004_v1, 0.0 }
 0x3a9   :  { %v2059_v50 = vmax.f32 %v2006_v7, 0.0  ;;  %v2009_v63 = vpop.f32.mrb[86].mxu0 }
 0x3aa   :  { %v2010_v21 = vadd.f32 %v2009_v63, %v3696_v23  ;;  %v2011_v8 = vpop.f32.mrb[87].mxu0 }
 0x3ab   :  { %v2012_v14 = vadd.f32 %v2011_v8, %v3699_v22  ;;  %2216 = vmatprep.mubr.f32.mxu1 %v2059_v50 }
 0x3ac   :  { %2217 = vmatmul.mubr.f32.gmra.mrb[84].mxu1 %v2058_v56  ;;  %v2060_v55 = vmax.f32 %v2010_v21, 0.0 }
 0x3ad   :  { %v2061_v62 = vmax.f32 %v2012_v14, 0.0  ;;  %v2015_v47 = vpop.f32.mrb[88].mxu0 }
 0x3ae   :  { %v2016_v25 = vadd.f32 %v2015_v47, %v3696_v23  ;;  %v2017_v26 = vpop.f32.mrb[89].mxu0 }
 0x3af   :  { %v2018_v15 = vadd.f32 %v2017_v26, %v3699_v22  ;;  %2221 = vmatprep.mubr.f32.mxu1 %v2061_v62 }
 0x3b0   :  { %2222 = vmatmul.mubr.f32.gmra.mrb[86].mxu1 %v2060_v55  ;;  %v2062_v10 = vmax.f32 %v2016_v25, 0.0 }
 0x3b1   :  { %v2063_v3 = vmax.f32 %v2018_v15, 0.0  ;;  %v2021_v17 = vpop.f32.mrb[90].mxu0 }
 0x3b2   :  { %v2022_v28 = vadd.f32 %v2021_v17, %v3696_v23  ;;  %v2023_v31 = vpop.f32.mrb[91].mxu0 }
 0x3b3   :  { %v2024_v32 = vadd.f32 %v2023_v31, %v3699_v22  ;;  %2226 = vmatprep.mubr.f32.mxu1 %v2063_v3 }
 0x3b4   :  { %2227 = vmatmul.mubr.f32.gmra.mrb[88].mxu1 %v2062_v10  ;;  %v2064_v33 = vmax.f32 %v2022_v28, 0.0 }
 0x3b5   :  { %v2065_v16 = vmax.f32 %v2024_v32, 0.0  ;;  %v2027_v9 = vpop.f32.mrb[92].mxu0 }
 0x3b6   :  { %v2028_v19 = vadd.f32 %v2027_v9, %v3696_v23  ;;  %v2029_v35 = vpop.f32.mrb[93].mxu0 }
 0x3b7   :  { %v2030_v30 = vadd.f32 %v2029_v35, %v3699_v22  ;;  %2231 = vmatprep.mubr.f32.mxu1 %v2065_v16 }
 0x3b8   :  { %2232 = vmatmul.mubr.f32.gmra.mrb[90].mxu1 %v2064_v33  ;;  %v2066_v29 = vmax.f32 %v2028_v19, 0.0 }
 0x3b9   :  { %v2067_v24 = vmax.f32 %v2030_v30, 0.0  ;;  %v2033_v34 = vpop.f32.mrb[94].mxu0 }
 0x3ba   :  { %v2034_v36 = vadd.f32 %v2033_v34, %v3696_v23  ;;  %v2035_v37 = vpop.f32.mrb[95].mxu0 }
 0x3bb   :  { %v2036_v38 = vadd.f32 %v2035_v37, %v3699_v22  ;;  %2236 = vmatprep.mubr.f32.mxu1 %v2067_v24 }
 0x3bc   :  { %2237 = vmatmul.mubr.f32.gmra.mrb[92].mxu1 %v2066_v29  ;;  %v2068_v20 = vmax.f32 %v2034_v36, 0.0 }
 0x3bd   :  { %v2069_v6 = vmax.f32 %v2036_v38, 0.0 }
 0x3bf   :  { %2241 = vmatprep.mubr.f32.mxu1 %v2069_v6 }
 0x3c0   :  { %2242 = vmatmul.mubr.f32.gmra.mrb[94].mxu1 %v2068_v20 }
 0x457   :  { %v2475_v27 = vpop.f32.mrb[64].mxu1 }
 0x458   :  { %v2476_v39 = vpop.f32.mrb[65].mxu1 }
 0x459   :  { %v2477_v18 = vadd.f32 %v2476_v39, %v2475_v27 }
 0x45b   :  { %v2169_v4 = vadd.f32 %v2477_v18, %v3828_v40  ;;  %v2478_v11 = vpop.f32.mrb[66].mxu1 }
 0x45c   :  { %v2479_v5 = vpop.f32.mrb[67].mxu1 }
 0x45d   :  { %v2247_v12 = vsub.f32 0.0, %v2169_v4  ;;  %v2480_v43 = vadd.f32 %v2479_v5, %v2478_v11 }
 0x45f   :  { %v2263_v49 = vmul.f32 1.442695, %v2247_v12  ;;  %v2174_v23 = vadd.f32 %v2480_v43, %v3828_v40  ;;  %v2481_v44 = vpop.f32.mrb[68].mxu1 }
 0x460   :  { %v2482_v22 = vpop.f32.mrb[69].mxu1 }
 0x461   :  { %2921 = vpow2.f32 %v2263_v49  ;;  %v2248_v57 = vsub.f32 0.0, %v2174_v23  ;;  %v2483_v45 = vadd.f32 %v2482_v22, %v2481_v44 }
 0x463   :  { %v2265_v48 = vmul.f32 1.442695, %v2248_v57  ;;  %v2179_v51 = vadd.f32 %v2483_v45, %v3828_v40  ;;  %v2484_v52 = vpop.f32.mrb[70].mxu1 }
 0x464   :  { %v2485_v58 = vpop.f32.mrb[71].mxu1 }
 0x465   :  { %2923 = vpow2.f32 %v2265_v48  ;;  %v2249_v41 = vsub.f32 0.0, %v2179_v51  ;;  %v2486_v59 = vadd.f32 %v2485_v58, %v2484_v52 }
 0x467   :  { %v2267_v42 = vmul.f32 1.442695, %v2249_v41  ;;  %v2184_v46 = vadd.f32 %v2486_v59, %v3828_v40  ;;  %v2487_v60 = vpop.f32.mrb[72].mxu1 }
 0x468   :  { %v2488_v61 = vpop.f32.mrb[73].mxu1 }
 0x469   :  { %2925 = vpow2.f32 %v2267_v42  ;;  %v2250_v13 = vsub.f32 0.0, %v2184_v46  ;;  %v2489_v0 = vadd.f32 %v2488_v61, %v2487_v60 }
 0x46b   :  { %v2922_v53 = vpop.eup %2921  ;;  %v2269_v54 = vmul.f32 1.442695, %v2250_v13  ;;  %v2189_v1 = vadd.f32 %v2489_v0, %v3828_v40  ;;  %v2490_v2 = vpop.f32.mrb[74].mxu1 }
 0x46c   :  { %v2295_v7 = vadd.f32 1.0, %v2922_v53  ;;  %v2491_v50 = vpop.f32.mrb[75].mxu1 }
 0x46d   :  { %2927 = vpow2.f32 %v2269_v54  ;;  %v2251_v63 = vsub.f32 0.0, %v2189_v1  ;;  %v2492_v56 = vadd.f32 %v2491_v50, %v2490_v2 }
 0x46e   :  { %2929 = vrcp.f32 %v2295_v7 }
 0x46f   :  { %v2924_v21 = vpop.eup %2923  ;;  %v2271_v8 = vmul.f32 1.442695, %v2251_v63  ;;  %v2194_v14 = vadd.f32 %v2492_v56, %v3828_v40  ;;  %v2493_v62 = vpop.f32.mrb[76].mxu1 }
 0x470   :  { %v2296_v47 = vadd.f32 1.0, %v2924_v21  ;;  %v2494_v55 = vpop.f32.mrb[77].mxu1 }
 0x471   :  { %2931 = vpow2.f32 %v2271_v8  ;;  %v2252_v25 = vsub.f32 0.0, %v2194_v14  ;;  %v2495_v26 = vadd.f32 %v2494_v55, %v2493_v62 }
 0x472   :  { %2933 = vrcp.f32 %v2296_v47 }
 0x473   :  { %v2926_v15 = vpop.eup %2925  ;;  %v2273_v3 = vmul.f32 1.442695, %v2252_v25  ;;  %v2199_v17 = vadd.f32 %v2495_v26, %v3828_v40  ;;  %v2496_v10 = vpop.f32.mrb[78].mxu1 }
 0x474   :  { %v2297_v28 = vadd.f32 1.0, %v2926_v15  ;;  %v2497_v31 = vpop.f32.mrb[79].mxu1 }
 0x475   :  { %2935 = vpow2.f32 %v2273_v3  ;;  %v2253_v32 = vsub.f32 0.0, %v2199_v17  ;;  %v2498_v16 = vadd.f32 %v2497_v31, %v2496_v10 }
 0x476   :  { %2937 = vrcp.f32 %v2297_v28 }
 0x477   :  { %v2928_v9 = vpop.eup %2927  ;;  %v2275_v33 = vmul.f32 1.442695, %v2253_v32  ;;  %v2204_v19 = vadd.f32 %v2498_v16, %v3828_v40  ;;  %v2499_v35 = vpop.f32.mrb[80].mxu1 }
 0x478   :  { %v2930_v30 = vpop.eup %2929  ;;  %v2298_v24 = vadd.f32 1.0, %v2928_v9  ;;  %v2500_v34 = vpop.f32.mrb[81].mxu1 }
 0x479   :  { %2327 = vst [vmem:[#allocation7 + $0x80] sm:$0xff] %v2930_v30  ;;  %2939 = vpow2.f32 %v2275_v33  ;;  %v2254_v29 = vsub.f32 0.0, %v2204_v19  ;;  %v2501_v36 = vadd.f32 %v2500_v34, %v2499_v35 }
 0x47a   :  { %2941 = vrcp.f32 %v2298_v24 }
 0x47b   :  { %v2932_v37 = vpop.eup %2931  ;;  %v2277_v38 = vmul.f32 1.442695, %v2254_v29  ;;  %v2209_v6 = vadd.f32 %v2501_v36, %v3828_v40  ;;  %v2502_v20 = vpop.f32.mrb[82].mxu1 }
 0x47c   :  { %v2934_v27 = vpop.eup %2933  ;;  %v2299_v39 = vadd.f32 1.0, %v2932_v37  ;;  %v2503_v18 = vpop.f32.mrb[83].mxu1 }
 0x47d   :  { %2328 = vst [vmem:[#allocation7 + $0x88] sm:$0xff] %v2934_v27  ;;  %2943 = vpow2.f32 %v2277_v38  ;;  %v2255_v4 = vsub.f32 0.0, %v2209_v6  ;;  %v2504_v11 = vadd.f32 %v2503_v18, %v2502_v20 }
 0x47e   :  { %2945 = vrcp.f32 %v2299_v39 }
 0x47f   :  { %v2936_v5 = vpop.eup %2935  ;;  %v2279_v12 = vmul.f32 1.442695, %v2255_v4  ;;  %v2214_v43 = vadd.f32 %v2504_v11, %v3828_v40  ;;  %v2505_v49 = vpop.f32.mrb[84].mxu1 }
 0x480   :  { %v2938_v23 = vpop.eup %2937  ;;  %v2300_v44 = vadd.f32 1.0, %v2936_v5  ;;  %v2506_v22 = vpop.f32.mrb[85].mxu1 }
 0x481   :  { %2329 = vst [vmem:[#allocation7 + $0x90] sm:$0xff] %v2938_v23  ;;  %2947 = vpow2.f32 %v2279_v12  ;;  %v2256_v57 = vsub.f32 0.0, %v2214_v43  ;;  %v2507_v45 = vadd.f32 %v2506_v22, %v2505_v49 }
 0x482   :  { %2949 = vrcp.f32 %v2300_v44 }
 0x483   :  { %v2940_v48 = vpop.eup %2939  ;;  %v2281_v51 = vmul.f32 1.442695, %v2256_v57  ;;  %v2219_v52 = vadd.f32 %v2507_v45, %v3828_v40  ;;  %v2508_v58 = vpop.f32.mrb[86].mxu1 }
 0x484   :  { %v2942_v41 = vpop.eup %2941  ;;  %v2301_v59 = vadd.f32 1.0, %v2940_v48  ;;  %v2509_v42 = vpop.f32.mrb[87].mxu1 }
 0x485   :  { %2330 = vst [vmem:[#allocation7 + $0x98] sm:$0xff] %v2942_v41  ;;  %2951 = vpow2.f32 %v2281_v51  ;;  %v2257_v46 = vsub.f32 0.0, %v2219_v52  ;;  %v2510_v60 = vadd.f32 %v2509_v42, %v2508_v58 }
 0x486   :  { %2953 = vrcp.f32 %v2301_v59 }
 0x487   :  { %v2944_v61 = vpop.eup %2943  ;;  %v2283_v13 = vmul.f32 1.442695, %v2257_v46  ;;  %v2224_v0 = vadd.f32 %v2510_v60, %v3828_v40  ;;  %v2511_v53 = vpop.f32.mrb[88].mxu1 }
 0x488   :  { %v2946_v54 = vpop.eup %2945  ;;  %v2302_v1 = vadd.f32 1.0, %v2944_v61  ;;  %v2512_v2 = vpop.f32.mrb[89].mxu1 }
 0x489   :  { %2331 = vst [vmem:[#allocation7 + $0xa0] sm:$0xff] %v2946_v54  ;;  %2955 = vpow2.f32 %v2283_v13  ;;  %v2258_v7 = vsub.f32 0.0, %v2224_v0  ;;  %v2513_v50 = vadd.f32 %v2512_v2, %v2511_v53 }
 0x48a   :  { %2957 = vrcp.f32 %v2302_v1 }
 0x48b   :  { %v2948_v63 = vpop.eup %2947  ;;  %v2285_v56 = vmul.f32 1.442695, %v2258_v7  ;;  %v2229_v21 = vadd.f32 %v2513_v50, %v3828_v40  ;;  %v2514_v8 = vpop.f32.mrb[90].mxu1 }
 0x48c   :  { %v2950_v14 = vpop.eup %2949  ;;  %v2303_v62 = vadd.f32 1.0, %v2948_v63  ;;  %v2515_v47 = vpop.f32.mrb[91].mxu1 }
 0x48d   :  { %2332 = vst [vmem:[#allocation7 + $0xa8] sm:$0xff] %v2950_v14  ;;  %2959 = vpow2.f32 %v2285_v56  ;;  %v2259_v55 = vsub.f32 0.0, %v2229_v21  ;;  %v2516_v25 = vadd.f32 %v2515_v47, %v2514_v8 }
 0x48e   :  { %2961 = vrcp.f32 %v2303_v62 }
 0x48f   :  { %v2952_v26 = vpop.eup %2951  ;;  %v2287_v15 = vmul.f32 1.442695, %v2259_v55  ;;  %v2234_v3 = vadd.f32 %v2516_v25, %v3828_v40  ;;  %v2517_v17 = vpop.f32.mrb[92].mxu1 }
 0x490   :  { %v2954_v10 = vpop.eup %2953  ;;  %v2304_v28 = vadd.f32 1.0, %v2952_v26  ;;  %v2518_v31 = vpop.f32.mrb[93].mxu1 }
 0x491   :  { %2333 = vst [vmem:[#allocation7 + $0xb0] sm:$0xff] %v2954_v10  ;;  %2963 = vpow2.f32 %v2287_v15  ;;  %v2260_v32 = vsub.f32 0.0, %v2234_v3  ;;  %v2519_v16 = vadd.f32 %v2518_v31, %v2517_v17 }
 0x492   :  { %2965 = vrcp.f32 %v2304_v28 }
 0x493   :  { %v2956_v9 = vpop.eup %2955  ;;  %v2289_v33 = vmul.f32 1.442695, %v2260_v32  ;;  %v2239_v19 = vadd.f32 %v2519_v16, %v3828_v40  ;;  %v2520_v35 = vpop.f32.mrb[94].mxu1 }
 0x494   :  { %v2958_v30 = vpop.eup %2957  ;;  %v2305_v24 = vadd.f32 1.0, %v2956_v9  ;;  %v2521_v34 = vpop.f32.mrb[95].mxu1 }
 0x495   :  { %2334 = vst [vmem:[#allocation7 + $0xb8] sm:$0xff] %v2958_v30  ;;  %2967 = vpow2.f32 %v2289_v33  ;;  %v2261_v29 = vsub.f32 0.0, %v2239_v19  ;;  %v2522_v36 = vadd.f32 %v2521_v34, %v2520_v35 }
 0x496   :  { %2969 = vrcp.f32 %v2305_v24 }
 0x497   :  { %v2960_v37 = vpop.eup %2959  ;;  %v2291_v38 = vmul.f32 1.442695, %v2261_v29  ;;  %v2244_v6 = vadd.f32 %v2522_v36, %v3828_v40 }
 0x498   :  { %v2962_v20 = vpop.eup %2961  ;;  %v2306_v27 = vadd.f32 1.0, %v2960_v37 }
 0x499   :  { %2335 = vst [vmem:[#allocation7 + $0xc0] sm:$0xff] %v2962_v20  ;;  %2971 = vpow2.f32 %v2291_v38  ;;  %v2262_v39 = vsub.f32 0.0, %v2244_v6 }
 0x49a   :  { %2973 = vrcp.f32 %v2306_v27 }
 0x49b   :  { %v2964_v18 = vpop.eup %2963  ;;  %v2293_v4 = vmul.f32 1.442695, %v2262_v39 }
 0x49c   :  { %v2966_v11 = vpop.eup %2965  ;;  %v2307_v5 = vadd.f32 1.0, %v2964_v18 }
 0x49d   :  { %2336 = vst [vmem:[#allocation7 + $0xc8] sm:$0xff] %v2966_v11  ;;  %2975 = vpow2.f32 %v2293_v4 }
 0x49e   :  { %2977 = vrcp.f32 %v2307_v5 }
 0x49f   :  { %v2968_v12 = vpop.eup %2967 }
 0x4a0   :  { %v2970_v43 = vpop.eup %2969  ;;  %v2308_v49 = vadd.f32 1.0, %v2968_v12 }
 0x4a1   :  { %2337 = vst [vmem:[#allocation7 + $0xd0] sm:$0xff] %v2970_v43 }
 0x4a2   :  { %2979 = vrcp.f32 %v2308_v49 }
 0x4a3   :  { %v2972_v23 = vpop.eup %2971 }
 0x4a4   :  { %v2974_v40 = vpop.eup %2973  ;;  %v2309_v44 = vadd.f32 1.0, %v2972_v23 }
 0x4a5   :  { %2338 = vst [vmem:[#allocation7 + $0xd8] sm:$0xff] %v2974_v40 }
 0x4a6   :  { %2981 = vrcp.f32 %v2309_v44 }
 0x4a7   :  { %v2976_v22 = vpop.eup %2975 }
 0x4a8   :  { %v2978_v57 = vpop.eup %2977  ;;  %v2310_v45 = vadd.f32 1.0, %v2976_v22 }
 0x4a9   :  { %2339 = vst [vmem:[#allocation7 + $0xe0] sm:$0xff] %v2978_v57 }
 0x4aa   :  { %2983 = vrcp.f32 %v2310_v45 }
 0x4ac   :  { %v2980_v48 = vpop.eup %2979 }
 0x4ad   :  { %2340 = vst [vmem:[#allocation7 + $0xe8] sm:$0xff] %v2980_v48 }
 0x4b0   :  { %v2982_v51 = vpop.eup %2981 }
 0x4b1   :  { %2341 = vst [vmem:[#allocation7 + $0xf0] sm:$0xff] %v2982_v51 }
 0x4b4   :  { %v2984_v52 = vpop.eup %2983 }
 0x4b5   :  { %2342 = vst [vmem:[#allocation7 + $0xf8] sm:$0xff] %v2984_v52 }
 0x4b6   :  { %3040 = shalt.err (!%p3037_p6)
}
 0x4b7   :  { %s3041_s4 = scalar_lea.hbm %s3915_s9, 4096 }
 0x4b8   :  { %p3042_p7 = scmp.ne.s32.totalorder %s3915_s9, %s3041_s4  ;;  %p3045_p8 = scmp.lt.u32.totalorder %s3041_s4, %s3915_s9 }
 0x4ba   :  { %p3047_p9 = pnand %p3045_p8, %p3042_p7 }
 0x4bc   :  { %3050 = shalt.err (!%p3047_p9)
}
 0x4bd   :  { %s3064_s17 = smov 128   ;;  %s3065_s18 = smov 8  }
 0x4be   :  { %2354 = dma.vmem_to_hbm [thread:$0]  %s2349_s8, 4096, %s3915_s9, [#allocation4], %s3064_s17, %s3064_s17, %s3065_s18  }
 0x4bf   :  { %3055 = dma.done.wait [#allocation4], 4096  }
 0x4c0   :  { %3056 = vsyncadd [#allocation4], 4294963200 }
 0x4c1   :  { %2358 = vsyncpa [#allocation3], 1 }
 0x4c2   :  { %2359 = vsyncpa [#allocation6], 1 }
 0x4c3   :  { %2360 = vsyncpa [#allocation4], 1 }

</bundles_post_ra>
